<compile_context>
chip_gen: v5e
topology: v5e:2x2
jax: 0.10.0
libtpu: 0.0.40
codegen_flags: <defaults>
</compile_context>

<pallas_src>
import functools

import jax
import jax.numpy as jnp
import numpy as np
from jax.experimental import pallas as pl
from jax.experimental.pallas import tpu as pltpu


def fused_kernel(s_ref, x_ref, w1_ref, b1_ref, w2_ref, gamma_ref, beta_ref,
                 o_ref, y_ref, *, eps):
    """One grid step = one tile of output channels. NCHW-native, lane-dense HW."""
    N, C_in, HW = x_ref.shape
    tile_co = o_ref.shape[1]
    inv_p = 1.0 / float(N * HW)

    # --- gate = sigmoid(W1 @ relu(s) + b1), channel-major (C_in, N), f32 -------
    # Cheap (matrix-vector + EUP sigmoid); recomputed per step so the channel-tile
    # grid axis stays safely "parallel" under megacore sharding.
    s = jnp.maximum(s_ref[...], 0.0)                                      # (Csq, N)
    g_lin = jnp.dot(w1_ref[...], s, preferred_element_type=jnp.float32)   # (C_in, N)
    gate = jax.nn.sigmoid(g_lin + b1_ref[...])                            # (C_in, N)

    # --- gated input y = gate * x, staged lane-dense (C_in, N*HW) bf16 in VMEM -
    for n in range(N):
        gb = gate[:, n:n + 1].astype(jnp.bfloat16)                        # (C_in, 1)
        y_ref[:, n * HW:(n + 1) * HW] = x_ref[n] * gb                     # bf16

    # --- z = W2_tile @ y : one wide MXU matmul, stored straight into o_ref -----
    z = jnp.dot(w2_ref[...], y_ref[...],
                preferred_element_type=jnp.float32)                       # (tile_co, N*HW)
    for n in range(N):
        o_ref[n] = z[:, n * HW:(n + 1) * HW]

    # --- BN batch statistics for this channel tile (biased var, centered pass) -
    ssum = jnp.zeros((tile_co, 1), jnp.float32)
    for n in range(N):
        ssum = ssum + jnp.sum(o_ref[n], axis=1, keepdims=True)
    mean = ssum * inv_p
    vsum = jnp.zeros((tile_co, 1), jnp.float32)
    for n in range(N):
        d = o_ref[n] - mean
        vsum = vsum + jnp.sum(d * d, axis=1, keepdims=True)
    var = vsum * inv_p
    scale = gamma_ref[...] * jax.lax.rsqrt(var + eps)                     # (tile_co, 1)
    shift = beta_ref[...] - mean * scale                                  # (tile_co, 1)

    # --- normalize + affine in place (NCHW output, HW on lanes) ----------------
    for n in range(N):
        o_ref[n] = o_ref[n] * scale + shift


def run_module(x209, x207, w1, b1, w2, gamma, beta, *, eps=1e-5, tile_co=None):
    N, Csq = x209.shape[0], x209.shape[1]
    _, C, H, W = x207.shape
    HW = H * W

    if tile_co is None:
        tile_co = C
        for cand in (512, 256, 128, 64, 32, 16, 8):
            if C % cand == 0:
                tile_co = cand
                break
    assert C % tile_co == 0, "C must be a multiple of tile_co (see TODO about padding)"
    num_tiles = C // tile_co

    # Layout glue: pure reshapes / tiny transposes only (no big HBM round trips).
    s_t = jnp.transpose(x209.reshape(N, Csq), (1, 0)).astype(jnp.float32)  # (Csq, N)
    x = x207.reshape(N, C, HW).astype(jnp.bfloat16)                         # NCHW, bf16 DMA
    w1m = w1.reshape(C, Csq).astype(jnp.float32)                            # gate path in f32
    b1m = b1.reshape(C, 1).astype(jnp.float32)
    w2m = w2.reshape(C, C).astype(jnp.bfloat16)                             # bf16 MXU weights
    gam = gamma.reshape(C, 1).astype(jnp.float32)
    bet = beta.reshape(C, 1).astype(jnp.float32)

    # VMEM budget: resident inputs + double-buffered tiled blocks + staging scratch.
    resident = x.size * 2 + w1m.size * 4 + s_t.size * 4 + b1m.size * 4
    per_tile = tile_co * C * 2 + 2 * tile_co * 4 + N * tile_co * HW * 4
    scratch = C * N * HW * 2
    est = resident + 2 * per_tile + scratch
    vmem_limit = int(min(max(2 * est + (4 << 20), 16 << 20), 60 << 20))

    grid_spec = pltpu.PrefetchScalarGridSpec(
        num_scalar_prefetch=0,
        grid=(num_tiles,),
        in_specs=[
            pl.BlockSpec((Csq, N), lambda i: (0, 0)),          # squeeze input (resident)
            pl.BlockSpec((N, C, HW), lambda i: (0, 0, 0)),     # x, bf16 (resident)
            pl.BlockSpec((C, Csq), lambda i: (0, 0)),          # W1 (resident)
            pl.BlockSpec((C, 1), lambda i: (0, 0)),            # b1 (resident)
            pl.BlockSpec((tile_co, C), lambda i: (i, 0)),      # W2 row tile (pipelined)
            pl.BlockSpec((tile_co, 1), lambda i: (i, 0)),      # gamma tile
            pl.BlockSpec((tile_co, 1), lambda i: (i, 0)),      # beta tile
        ],
        out_specs=pl.BlockSpec((N, tile_co, HW), lambda i: (0, i, 0)),
        scratch_shapes=[pltpu.VMEM((C, N * HW), jnp.bfloat16)],  # gated input staging
    )

    out = pl.pallas_call(
        functools.partial(fused_kernel, eps=eps),
        out_shape=jax.ShapeDtypeStruct((N, C, HW), jnp.float32),
        grid_spec=grid_spec,
        compiler_params=pltpu.CompilerParams(
            dimension_semantics=("parallel",),     # channel tiles independent -> v7x 2-TC
            vmem_limit_bytes=vmem_limit,
        ),
    )(s_t, x, w1m, b1m, w2m, gam, bet)

    return out.reshape(N, C, H, W)


def reference(x209, x207, w1, b1, w2, gamma, beta, eps=1e-5):
    N, Csq = x209.shape[0], x209.shape[1]
    _, C, H, W = x207.shape
    s = jnp.maximum(x209.reshape(N, Csq), 0.0)
    g = jax.nn.sigmoid(s @ w1.reshape(C, Csq).T + b1)                    # (N, C)
    y = x207 * g[:, :, None, None]
    z = jnp.einsum('oc,ncp->nop', w2.reshape(C, C),
                   y.reshape(N, C, H * W)).reshape(N, C, H, W)
    mean = jnp.mean(z, axis=(0, 2, 3), keepdims=True)
    var = jnp.mean((z - mean) ** 2, axis=(0, 2, 3), keepdims=True)
    zn = (z - mean) / jnp.sqrt(var + eps)
    return zn * gamma[None, :, None, None] + beta[None, :, None, None]


if __name__ == "__main__":
    # Small shapes consistent with M.forward:
    #   x209: [N, Csq, 1, 1] (squeeze path), x207: [N, C, H, W]
    #   conv2d67: Csq -> C (1x1, bias), conv2d68: C -> C (1x1, no bias), BN over C.
    # C=256 with tile_co=128 exercises a 2-step channel-tile grid.
    N, Csq, C, H, W = 2, 32, 256, 16, 16

    key = jax.random.PRNGKey(0)
    ks = jax.random.split(key, 7)
    x209 = jax.random.normal(ks[0], (N, Csq, 1, 1), jnp.float32)
    x207 = jax.random.normal(ks[1], (N, C, H, W), jnp.float32)
    w1 = 0.05 * jax.random.normal(ks[2], (C, Csq, 1, 1), jnp.float32)   # conv2d67.weight
    b1 = 0.05 * jax.random.normal(ks[3], (C,), jnp.float32)             # conv2d67.bias
    w2 = 0.05 * jax.random.normal(ks[4], (C, C, 1, 1), jnp.float32)     # conv2d68.weight
    gamma = 1.0 + 0.1 * jax.random.normal(ks[5], (C,), jnp.float32)     # bn weight
    beta = 0.1 * jax.random.normal(ks[6], (C,), jnp.float32)            # bn bias

    out = jax.block_until_ready(
        run_module(x209, x207, w1, b1, w2, gamma, beta, tile_co=128))
    ref = jax.block_until_ready(reference(x209, x207, w1, b1, w2, gamma, beta))

    # bf16 activations + bf16 MXU weights (f32 accumulation) => ~1e-2-level error
    # after BN rescale; tolerance loosened accordingly.
    np.testing.assert_allclose(np.asarray(out), np.asarray(ref), rtol=2e-2, atol=2e-2)

    print("KERNEL_OK")
</pallas_src>

<mosaic_0001>
module attributes {stable_mosaic.version = 11 : i64} {
  func.func @fused_kernel(%arg0: i32, %arg1: memref<32x2xf32, #tpu.memory_space<vmem>>, %arg2: memref<2x256x256xbf16, #tpu.memory_space<vmem>>, %arg3: memref<256x32xf32, #tpu.memory_space<vmem>>, %arg4: memref<256x1xf32, #tpu.memory_space<vmem>>, %arg5: memref<128x256xbf16, #tpu.memory_space<vmem>>, %arg6: memref<128x1xf32, #tpu.memory_space<vmem>>, %arg7: memref<128x1xf32, #tpu.memory_space<vmem>>, %arg8: memref<2x128x256xf32, #tpu.memory_space<vmem>>, %arg9: memref<256x512xbf16, #tpu.memory_space<vmem>>) attributes {dimension_semantics = [#tpu.dimension_semantics<parallel>], iteration_bounds = array<i64: 2>, scalar_prefetch = 0 : i64, scratch_operands = 1 : i64, tpu.core_type = #tpu.core_type<tc>, window_params = [{pipeline_mode = #tpu.pipeline_mode<synchronous>, transform_indices = @transform_0, window_bounds = array<i64: 32, 2>}, {pipeline_mode = #tpu.pipeline_mode<synchronous>, transform_indices = @transform_1, window_bounds = array<i64: 2, 256, 256>}, {pipeline_mode = #tpu.pipeline_mode<synchronous>, transform_indices = @transform_2, window_bounds = array<i64: 256, 32>}, {pipeline_mode = #tpu.pipeline_mode<synchronous>, transform_indices = @transform_3, window_bounds = array<i64: 256, 1>}, {transform_indices = @transform_4, window_bounds = array<i64: 128, 256>}, {transform_indices = @transform_5, window_bounds = array<i64: 128, 1>}, {transform_indices = @transform_6, window_bounds = array<i64: 128, 1>}, {transform_indices = @transform_7, window_bounds = array<i64: 2, 128, 256>}]} {
    %c0 = arith.constant 0 : index
    %c0_0 = arith.constant 0 : index
    %0 = vector.load %arg1[%c0, %c0_0] : memref<32x2xf32, #tpu.memory_space<vmem>>, vector<32x2xf32>
    %cst = arith.constant 0.000000e+00 : f32
    %1 = vector.broadcast %cst : f32 to vector<32x2xf32>
    %2 = arith.maximumf %0, %1 : vector<32x2xf32>
    %c0_1 = arith.constant 0 : index
    %c0_2 = arith.constant 0 : index
    %3 = vector.load %arg3[%c0_1, %c0_2] : memref<256x32xf32, #tpu.memory_space<vmem>>, vector<256x32xf32>
    %cst_3 = arith.constant dense<0.000000e+00> : vector<256x2xf32>
    %4 = tpu.matmul %3, %2, %cst_3 {dimension_numbers = #tpu.dot_dimension_numbers<[1], [0], [0], [1], [0, 0, 1, 1], [], []>} : vector<256x32xf32>, vector<32x2xf32>, vector<256x2xf32> -> vector<256x2xf32>
    %c0_4 = arith.constant 0 : index
    %c0_5 = arith.constant 0 : index
    %5 = vector.load %arg4[%c0_4, %c0_5] : memref<256x1xf32, #tpu.memory_space<vmem>>, vector<256x1xf32>
    %6 = vector.broadcast %5 : vector<256x1xf32> to vector<256x2xf32>
    %7 = arith.addf %4, %6 : vector<256x2xf32>
    %8 = arith.negf %7 : vector<256x2xf32>
    %9 = math.exp %8 : vector<256x2xf32>
    %cst_6 = arith.constant 1.000000e+00 : f32
    %10 = vector.broadcast %cst_6 : f32 to vector<256x2xf32>
    %11 = arith.addf %10, %9 : vector<256x2xf32>
    %12 = arith.divf %10, %11 : vector<256x2xf32>
    %13 = vector.extract_strided_slice %12 {offsets = [0, 0], sizes = [256, 1], strides = [1, 1]} : vector<256x2xf32> to vector<256x1xf32>
    %14 = arith.truncf %13 : vector<256x1xf32> to vector<256x1xbf16>
    %c0_7 = arith.constant 0 : index
    %c0_8 = arith.constant 0 : index
    %c0_9 = arith.constant 0 : index
    %15 = vector.load %arg2[%c0_7, %c0_8, %c0_9] : memref<2x256x256xbf16, #tpu.memory_space<vmem>>, vector<1x256x256xbf16>
    %16 = vector.shape_cast %15 : vector<1x256x256xbf16> to vector<256x256xbf16>
    %17 = vector.broadcast %14 : vector<256x1xbf16> to vector<256x256xbf16>
    %18 = arith.mulf %16, %17 : vector<256x256xbf16>
    %c0_10 = arith.constant 0 : index
    %c0_11 = arith.constant 0 : index
    %19 = vector.load %arg9[%c0_10, %c0_11] : memref<256x512xbf16, #tpu.memory_space<vmem>>, vector<256x256xbf16>
    tpu.vector_store %arg9[%c0_10, %c0_11], %18 {strides = array<i32>} : memref<256x512xbf16, #tpu.memory_space<vmem>>, vector<256x256xbf16>,
    %20 = vector.extract_strided_slice %12 {offsets = [0, 1], sizes = [256, 1], strides = [1, 1]} : vector<256x2xf32> to vector<256x1xf32>
    %21 = arith.truncf %20 : vector<256x1xf32> to vector<256x1xbf16>
    %c1 = arith.constant 1 : index
    %c0_12 = arith.constant 0 : index
    %c0_13 = arith.constant 0 : index
    %22 = vector.load %arg2[%c1, %c0_12, %c0_13] : memref<2x256x256xbf16, #tpu.memory_space<vmem>>, vector<1x256x256xbf16>
    %23 = vector.shape_cast %22 : vector<1x256x256xbf16> to vector<256x256xbf16>
    %24 = vector.broadcast %21 : vector<256x1xbf16> to vector<256x256xbf16>
    %25 = arith.mulf %23, %24 : vector<256x256xbf16>
    %c0_14 = arith.constant 0 : index
    %c256 = arith.constant 256 : index
    %26 = vector.load %arg9[%c0_14, %c256] : memref<256x512xbf16, #tpu.memory_space<vmem>>, vector<256x256xbf16>
    tpu.vector_store %arg9[%c0_14, %c256], %25 {strides = array<i32>} : memref<256x512xbf16, #tpu.memory_space<vmem>>, vector<256x256xbf16>,
    %c0_15 = arith.constant 0 : index
    %c0_16 = arith.constant 0 : index
    %27 = vector.load %arg5[%c0_15, %c0_16] : memref<128x256xbf16, #tpu.memory_space<vmem>>, vector<128x256xbf16>
    %c0_17 = arith.constant 0 : index
    %c0_18 = arith.constant 0 : index
    %28 = vector.load %arg9[%c0_17, %c0_18] : memref<256x512xbf16, #tpu.memory_space<vmem>>, vector<256x512xbf16>
    %cst_19 = arith.constant dense<0.000000e+00> : vector<128x512xf32>
    %29 = tpu.matmul %27, %28, %cst_19 {dimension_numbers = #tpu.dot_dimension_numbers<[1], [0], [0], [1], [0, 0, 1, 1], [], []>} : vector<128x256xbf16>, vector<256x512xbf16>, vector<128x512xf32> -> vector<128x512xf32>
    %30 = vector.extract_strided_slice %29 {offsets = [0, 0], sizes = [128, 256], strides = [1, 1]} : vector<128x512xf32> to vector<128x256xf32>
    %c0_20 = arith.constant 0 : index
    %c0_21 = arith.constant 0 : index
    %c0_22 = arith.constant 0 : index
    %31 = vector.load %arg8[%c0_20, %c0_21, %c0_22] : memref<2x128x256xf32, #tpu.memory_space<vmem>>, vector<1x128x256xf32>
    %32 = vector.shape_cast %31 : vector<1x128x256xf32> to vector<128x256xf32>
    %33 = vector.shape_cast %30 : vector<128x256xf32> to vector<1x128x256xf32>
    tpu.vector_store %arg8[%c0_20, %c0_21, %c0_22], %33 {strides = array<i32>} : memref<2x128x256xf32, #tpu.memory_space<vmem>>, vector<1x128x256xf32>,
    %34 = vector.extract_strided_slice %29 {offsets = [0, 256], sizes = [128, 256], strides = [1, 1]} : vector<128x512xf32> to vector<128x256xf32>
    %c1_23 = arith.constant 1 : index
    %c0_24 = arith.constant 0 : index
    %c0_25 = arith.constant 0 : index
    %35 = vector.load %arg8[%c1_23, %c0_24, %c0_25] : memref<2x128x256xf32, #tpu.memory_space<vmem>>, vector<1x128x256xf32>
    %36 = vector.shape_cast %35 : vector<1x128x256xf32> to vector<128x256xf32>
    %37 = vector.shape_cast %34 : vector<128x256xf32> to vector<1x128x256xf32>
    tpu.vector_store %arg8[%c1_23, %c0_24, %c0_25], %37 {strides = array<i32>} : memref<2x128x256xf32, #tpu.memory_space<vmem>>, vector<1x128x256xf32>,
    %cst_26 = arith.constant 0.000000e+00 : f32
    %38 = vector.broadcast %cst_26 : f32 to vector<128x1xf32>
    %c0_27 = arith.constant 0 : index
    %c0_28 = arith.constant 0 : index
    %c0_29 = arith.constant 0 : index
    %39 = vector.load %arg8[%c0_27, %c0_28, %c0_29] : memref<2x128x256xf32, #tpu.memory_space<vmem>>, vector<1x128x256xf32>
    %40 = vector.shape_cast %39 : vector<1x128x256xf32> to vector<128x256xf32>
    %cst_30 = arith.constant dense<0.000000e+00> : vector<128xf32>
    %41 = vector.multi_reduction <add>, %40, %cst_30 [1] : vector<128x256xf32> to vector<128xf32>
    %42 = vector.shape_cast %41 : vector<128xf32> to vector<128x1xf32>
    %43 = arith.addf %38, %42 : vector<128x1xf32>
    %c1_31 = arith.constant 1 : index
    %c0_32 = arith.constant 0 : index
    %c0_33 = arith.constant 0 : index
    %44 = vector.load %arg8[%c1_31, %c0_32, %c0_33] : memref<2x128x256xf32, #tpu.memory_space<vmem>>, vector<1x128x256xf32>
    %45 = vector.shape_cast %44 : vector<1x128x256xf32> to vector<128x256xf32>
    %cst_34 = arith.constant dense<0.000000e+00> : vector<128xf32>
    %46 = vector.multi_reduction <add>, %45, %cst_34 [1] : vector<128x256xf32> to vector<128xf32>
    %47 = vector.shape_cast %46 : vector<128xf32> to vector<128x1xf32>
    %48 = arith.addf %43, %47 : vector<128x1xf32>
    %cst_35 = arith.constant 0.001953125 : f32
    %49 = vector.broadcast %cst_35 : f32 to vector<128x1xf32>
    %50 = arith.mulf %48, %49 : vector<128x1xf32>
    %cst_36 = arith.constant 0.000000e+00 : f32
    %51 = vector.broadcast %cst_36 : f32 to vector<128x1xf32>
    %c0_37 = arith.constant 0 : index
    %c0_38 = arith.constant 0 : index
    %c0_39 = arith.constant 0 : index
    %52 = vector.load %arg8[%c0_37, %c0_38, %c0_39] : memref<2x128x256xf32, #tpu.memory_space<vmem>>, vector<1x128x256xf32>
    %53 = vector.shape_cast %52 : vector<1x128x256xf32> to vector<128x256xf32>
    %54 = vector.broadcast %50 : vector<128x1xf32> to vector<128x256xf32>
    %55 = arith.subf %53, %54 : vector<128x256xf32>
    %56 = arith.mulf %55, %55 : vector<128x256xf32>
    %cst_40 = arith.constant dense<0.000000e+00> : vector<128xf32>
    %57 = vector.multi_reduction <add>, %56, %cst_40 [1] : vector<128x256xf32> to vector<128xf32>
    %58 = vector.shape_cast %57 : vector<128xf32> to vector<128x1xf32>
    %59 = arith.addf %51, %58 : vector<128x1xf32>
    %c1_41 = arith.constant 1 : index
    %c0_42 = arith.constant 0 : index
    %c0_43 = arith.constant 0 : index
    %60 = vector.load %arg8[%c1_41, %c0_42, %c0_43] : memref<2x128x256xf32, #tpu.memory_space<vmem>>, vector<1x128x256xf32>
    %61 = vector.shape_cast %60 : vector<1x128x256xf32> to vector<128x256xf32>
    %62 = vector.broadcast %50 : vector<128x1xf32> to vector<128x256xf32>
    %63 = arith.subf %61, %62 : vector<128x256xf32>
    %64 = arith.mulf %63, %63 : vector<128x256xf32>
    %cst_44 = arith.constant dense<0.000000e+00> : vector<128xf32>
    %65 = vector.multi_reduction <add>, %64, %cst_44 [1] : vector<128x256xf32> to vector<128xf32>
    %66 = vector.shape_cast %65 : vector<128xf32> to vector<128x1xf32>
    %67 = arith.addf %59, %66 : vector<128x1xf32>
    %cst_45 = arith.constant 0.001953125 : f32
    %68 = vector.broadcast %cst_45 : f32 to vector<128x1xf32>
    %69 = arith.mulf %67, %68 : vector<128x1xf32>
    %c0_46 = arith.constant 0 : index
    %c0_47 = arith.constant 0 : index
    %70 = vector.load %arg6[%c0_46, %c0_47] : memref<128x1xf32, #tpu.memory_space<vmem>>, vector<128x1xf32>
    %cst_48 = arith.constant 9.99999974E-6 : f32
    %71 = vector.broadcast %cst_48 : f32 to vector<128x1xf32>
    %72 = arith.addf %69, %71 : vector<128x1xf32>
    %73 = math.rsqrt %72 : vector<128x1xf32>
    %74 = arith.mulf %70, %73 : vector<128x1xf32>
    %c0_49 = arith.constant 0 : index
    %c0_50 = arith.constant 0 : index
    %75 = vector.load %arg7[%c0_49, %c0_50] : memref<128x1xf32, #tpu.memory_space<vmem>>, vector<128x1xf32>
    %76 = arith.mulf %50, %74 : vector<128x1xf32>
    %77 = arith.subf %75, %76 : vector<128x1xf32>
    %c0_51 = arith.constant 0 : index
    %c0_52 = arith.constant 0 : index
    %c0_53 = arith.constant 0 : index
    %78 = vector.load %arg8[%c0_51, %c0_52, %c0_53] : memref<2x128x256xf32, #tpu.memory_space<vmem>>, vector<1x128x256xf32>
    %79 = vector.shape_cast %78 : vector<1x128x256xf32> to vector<128x256xf32>
    %80 = vector.broadcast %74 : vector<128x1xf32> to vector<128x256xf32>
    %81 = arith.mulf %79, %80 : vector<128x256xf32>
    %82 = vector.broadcast %77 : vector<128x1xf32> to vector<128x256xf32>
    %83 = arith.addf %81, %82 : vector<128x256xf32>
    %c0_54 = arith.constant 0 : index
    %c0_55 = arith.constant 0 : index
    %c0_56 = arith.constant 0 : index
    %84 = vector.load %arg8[%c0_54, %c0_55, %c0_56] : memref<2x128x256xf32, #tpu.memory_space<vmem>>, vector<1x128x256xf32>
    %85 = vector.shape_cast %84 : vector<1x128x256xf32> to vector<128x256xf32>
    %86 = vector.shape_cast %83 : vector<128x256xf32> to vector<1x128x256xf32>
    tpu.vector_store %arg8[%c0_54, %c0_55, %c0_56], %86 {strides = array<i32>} : memref<2x128x256xf32, #tpu.memory_space<vmem>>, vector<1x128x256xf32>,
    %c1_57 = arith.constant 1 : index
    %c0_58 = arith.constant 0 : index
    %c0_59 = arith.constant 0 : index
    %87 = vector.load %arg8[%c1_57, %c0_58, %c0_59] : memref<2x128x256xf32, #tpu.memory_space<vmem>>, vector<1x128x256xf32>
    %88 = vector.shape_cast %87 : vector<1x128x256xf32> to vector<128x256xf32>
    %89 = vector.broadcast %74 : vector<128x1xf32> to vector<128x256xf32>
    %90 = arith.mulf %88, %89 : vector<128x256xf32>
    %91 = vector.broadcast %77 : vector<128x1xf32> to vector<128x256xf32>
    %92 = arith.addf %90, %91 : vector<128x256xf32>
    %c1_60 = arith.constant 1 : index
    %c0_61 = arith.constant 0 : index
    %c0_62 = arith.constant 0 : index
    %93 = vector.load %arg8[%c1_60, %c0_61, %c0_62] : memref<2x128x256xf32, #tpu.memory_space<vmem>>, vector<1x128x256xf32>
    %94 = vector.shape_cast %93 : vector<1x128x256xf32> to vector<128x256xf32>
    %95 = vector.shape_cast %92 : vector<128x256xf32> to vector<1x128x256xf32>
    tpu.vector_store %arg8[%c1_60, %c0_61, %c0_62], %95 {strides = array<i32>} : memref<2x128x256xf32, #tpu.memory_space<vmem>>, vector<1x128x256xf32>,
    return
  }
  func.func @transform_0(%arg0: i32) -> (i32, i32) {
    %c0_i32 = arith.constant 0 : i32
    %c0_i32_0 = arith.constant 0 : i32
    %c0_i32_1 = arith.constant 0 : i32
    return %c0_i32, %c0_i32_0 : i32, i32
  }
  func.func @transform_1(%arg0: i32) -> (i32, i32, i32) {
    %c0_i32 = arith.constant 0 : i32
    %c0_i32_0 = arith.constant 0 : i32
    %c0_i32_1 = arith.constant 0 : i32
    %c0_i32_2 = arith.constant 0 : i32
    return %c0_i32, %c0_i32_0, %c0_i32_1 : i32, i32, i32
  }
  func.func @transform_2(%arg0: i32) -> (i32, i32) {
    %c0_i32 = arith.constant 0 : i32
    %c0_i32_0 = arith.constant 0 : i32
    %c0_i32_1 = arith.constant 0 : i32
    return %c0_i32, %c0_i32_0 : i32, i32
  }
  func.func @transform_3(%arg0: i32) -> (i32, i32) {
    %c0_i32 = arith.constant 0 : i32
    %c0_i32_0 = arith.constant 0 : i32
    %c0_i32_1 = arith.constant 0 : i32
    return %c0_i32, %c0_i32_0 : i32, i32
  }
  func.func @transform_4(%arg0: i32) -> (i32, i32) {
    %c0_i32 = arith.constant 0 : i32
    %c0_i32_0 = arith.constant 0 : i32
    return %arg0, %c0_i32 : i32, i32
  }
  func.func @transform_5(%arg0: i32) -> (i32, i32) {
    %c0_i32 = arith.constant 0 : i32
    %c0_i32_0 = arith.constant 0 : i32
    return %arg0, %c0_i32 : i32, i32
  }
  func.func @transform_6(%arg0: i32) -> (i32, i32) {
    %c0_i32 = arith.constant 0 : i32
    %c0_i32_0 = arith.constant 0 : i32
    return %arg0, %c0_i32 : i32, i32
  }
  func.func @transform_7(%arg0: i32) -> (i32, i32, i32) {
    %c0_i32 = arith.constant 0 : i32
    %c0_i32_0 = arith.constant 0 : i32
    %c0_i32_1 = arith.constant 0 : i32
    return %c0_i32, %arg0, %c0_i32_0 : i32, i32, i32
  }
}

</mosaic_0001>

<bundles_post_ra>
// kernel: tpu_custom_call.1
= control target key start
LH: loop header
LB: loop body
LE: loop exit
PB: predicated region body
PF: predicated region fallthrough
CT: control target
= control target key end

     0   :  { %12 = vsyncpa [#allocation4], 0  ;;  %s7613_s0 = inlined_call_operand.vmem [shape: f32[32,2], index: 0, kind: input, shape index: {}]   ;;  %s7614_s1 = inlined_call_operand.vmem [shape: bf16[2,256,256], index: 1, kind: input, shape index: {}]   ;;  %s7615_s2 = inlined_call_operand.vmem [shape: f32[256,32], index: 2, kind: input, shape index: {}]   ;;  %s7616_s3 = inlined_call_operand.vmem [shape: f32[256,1], index: 3, kind: input, shape index: {}]   ;;  %s7617_s4 = inlined_call_operand.vmem [shape: bf16[256,256], index: 4, kind: input, shape index: {}]   ;;  %s7618_s5 = inlined_call_operand.vmem [shape: f32[256,1], index: 5, kind: input, shape index: {}]   ;;  %s7619_s6 = inlined_call_operand.vmem [shape: f32[256,1], index: 6, kind: input, shape index: {}]   ;;  %s7620_s7 = inlined_call_operand.hbm [shape: f32[2,256,256], index: 7, kind: output, shape index: {}]  }
   0x1   :  { %14 = vsyncpa [#allocation4 + $0x1], 0  ;;  %s5622_s24 = smov 0   ;;  %s5624_s25 = smov 0  }
   0x2   :  { %s5626_s26 = smov 0   ;;  %s5628_s27 = smov 0  }
   0x3 LB: > { %s5643_s28 = sadd.s32 4294967295, %s5571_s27   ;;  %s4649_s29 = sadd.s32 4294967294, %s5571_s27   ;;  %s5571_s27 = sphi %s5628_s27, %s7746_s27   ;;  %s5567_s26 = sphi %s5626_s26, %s7745_s26   ;;  %s5563_s25 = sphi %s5624_s25, %s7744_s25   ;;  %s5559_s24 = sphi %s5622_s24, %s7743_s24  }
   0x4   : > { %s5647_s30 = sadd.s32 1, %s5571_s27   ;;  %s189_s8 = sadd.s32 1, %s5567_s26 }
   0x5   : > { %s186_s9 = ssub.s32 %s5571_s27, %s5647_s30  ;;  %p199_p0 = scmp.ne.s32.totalorder %s5567_s26, %s5563_s25 }
   0x6   : > { %p187_p1 = scmp.eq.s32.totalorder %s186_s9, 0  ;;  %p200_p2 = scmp.eq.s32.totalorder %s5643_s28, 1 }
   0x7   : > { %p205_p3 = scmp.ne.s32.totalorder %s5563_s25, %s5559_s24  ;;  %p206_p4 = scmp.eq.s32.totalorder %s4649_s29, 1 }
   0x8   : > { %s5658_s10 = scalar_select %p187_p1, %s5567_s26, %s189_s8  }
   0x9   : > { %p5660_p5 = por %p200_p2, %p199_p0  ;;  %p5664_p6 = por %p206_p4, %p205_p3 }
   0xa   : > { %p4652_p7 = scmp.ge.s32.totalorder %s5571_s27, 1  ;;  %p264_p8 = scmp.lt.s32.totalorder %s5571_s27, 3 }
   0xc   : > { %p265_p9 = pnand %p4652_p7, %p264_p8 }
   0xe   : > { %268 = sbr.rel (%p265_p9) target bundleno = 1333 (0x535), region = 48 }
  0x13   : > { %v330_v0 = vld [vmem:[%s7613_s0 + $0x18] sm:$0xff]  ;;  %v329_v1 = vld [vmem:[%s7613_s0 + $0x10] sm:$0xff]  ;;  %v328_v2 = vld [vmem:[%s7613_s0 + $0x8] sm:$0xff]  ;;  %v5573_v5 = vmov 0   ;;  %vm559_vm0 = vcmask 261120   ;;  %s4654_s13 = sshll.u32 %s5643_s28, 4 }
  0x14   : > { %v334_v3 = vmax.f32 %v330_v0, 0.0  ;;  %v333_v4 = vmax.f32 %v329_v1, 0.0  ;;  %5369 = vset.pattern.permute.xlu1 %v5573_v5  ;;  %v369_v6 = vld [vmem:[%s7616_s3 + $0x10] sm:$0xff]  ;;  %5368 = vset.pattern.permute.xlu0 %v5573_v5  ;;  %v327_v7 = vld [vmem:[%s7613_s0] sm:$0xff]  ;;  %v332_v9 = vmax.f32 %v328_v2, 0.0  ;;  %v370_v12 = vld [vmem:[%s7616_s3 + $0x18] sm:$0xff] }
  0x15   : > { %411 = vperm.xlu1 %5369, %v369_v6   ;;  %v367_v8 = vld [vmem:[%s7616_s3] sm:$0xff]  ;;  %5370 = vset.pattern.permute.xlu2 %v5573_v5  ;;  %v331_v10 = vmax.f32 %v327_v7, 0.0  ;;  %v368_v13 = vld [vmem:[%s7616_s3 + $0x8] sm:$0xff]  ;;  %v361_v14 = vld [vmem:[%s7615_s2 + $0xd0] sm:$0xff]  ;;  %p6556_p10 = scmp.lt.s32.totalorder %s4654_s13, 31  ;;  %s304_s8 = sand.u32 1, %s5563_s25  }
  0x16   : > { %668 = vmatpush.msra.mxu0 %v334_v3  ;;  %401 = vperm.xlu0 %5368, %v367_v8   ;;  %v335_v11 = vld [vmem:[%s7615_s2] sm:$0xff]  ;;  %v336_v15 = vld [vmem:[%s7615_s2 + $0x8] sm:$0xff]  ;;  %v374_v16 = vld [vmem:[%s7616_s3 + $0x38] sm:$0xff] }
  0x17   : > { %5294 = vmatpush.msra.mxu3 %v334_v3  ;;  %v373_v17 = vld [vmem:[%s7616_s3 + $0x30] sm:$0xff]  ;;  %v362_v18 = vld [vmem:[%s7615_s2 + $0xd8] sm:$0xff]  ;;  %v371_v19 = vld [vmem:[%s7616_s3 + $0x20] sm:$0xff]  ;;  %s7748_s13 = smov (!%p6556_p10, %s4654_s13), 31 }
  0x18   : > { %669 = vmatpush.msra.mxu0 %v333_v4  ;;  %421 = vperm.xlu2 %5370, %v371_v19   ;;  %v337_v20 = vld [vmem:[%s7615_s2 + $0x10] sm:$0xff]  ;;  %v376_v22 = vld [vmem:[%s7616_s3 + $0x48] sm:$0xff]  ;;  %v363_v23 = vld [vmem:[%s7615_s2 + $0xe0] sm:$0xff]  ;;  %s6569_s19 = sshll.u32 %s7748_s13, 3 }
  0x19   : > { %5295 = vmatpush.msra.mxu3 %v333_v4  ;;  %v377_v21 = vld [vmem:[%s7616_s3 + $0x50] sm:$0xff]  ;;  %v372_v24 = vld [vmem:[%s7616_s3 + $0x28] sm:$0xff]  ;;  %v338_v25 = vld [vmem:[%s7615_s2 + $0x18] sm:$0xff]  ;;  %s6578_s22 = scalar_lea.vmem %s7617_s4, %s6569_s19  ;;  %s7391_s20 = scalar_lea.vmem %s7618_s5, %s6569_s19 }
  0x1a   : > { %670 = vmatpush.msra.mxu0 %v332_v9  ;;  %v380_v26 = vld [vmem:[%s7616_s3 + $0x68] sm:$0xff]  ;;  %v379_v27 = vld [vmem:[%s7616_s3 + $0x60] sm:$0xff]  ;;  %v382_v32 = vld [vmem:[%s7616_s3 + $0x78] sm:$0xff]  ;;  %s7398_s29 = scalar_lea.vmem %s7619_s6, %s6569_s19  ;;  %s4524_s19 = scalar_lea.sflag [#allocation4], %s304_s8 }
  0x1b   : > { %5296 = vmatpush.msra.mxu3 %v332_v9  ;;  %v364_v28 = vld [vmem:[%s7615_s2 + $0xe8] sm:$0xff]  ;;  %v375_v29 = vld [vmem:[%s7616_s3 + $0x40] sm:$0xff]  ;;  %v365_v33 = vld [vmem:[%s7615_s2 + $0xf0] sm:$0xff] }
  0x1c   : > { %671 = vmatpush.msra.mxu0 %v331_v10  ;;  %v339_v30 = vld [vmem:[%s7615_s2 + $0x20] sm:$0xff]  ;;  %v378_v34 = vld [vmem:[%s7616_s3 + $0x58] sm:$0xff]  ;;  %v340_v35 = vld [vmem:[%s7615_s2 + $0x28] sm:$0xff] }
  0x1d   : > { %4661 = vmatmul.msk.f32.vlgmr.msra.gmra.mxu0 %vm559_vm0, %v335_v11  ;;  %416 = vperm.xlu1 %5369, %v370_v12   ;;  %v383_v31 = vld [vmem:[%s7616_s3 + $0x80] sm:$0xff]  ;;  %v386_v36 = vld [vmem:[%s7616_s3 + $0x98] sm:$0xff]  ;;  %v385_v37 = vld [vmem:[%s7616_s3 + $0x90] sm:$0xff] }
  0x1e   : > { %406 = vperm.xlu0 %5368, %v368_v13   ;;  %5297 = vmatpush.msra.mxu3 %v331_v10  ;;  %v366_v38 = vld [vmem:[%s7615_s2 + $0xf8] sm:$0xff]  ;;  %v381_v39 = vld [vmem:[%s7616_s3 + $0x70] sm:$0xff]  ;;  %v388_v42 = vld [vmem:[%s7616_s3 + $0xa8] sm:$0xff] }
  0x1f   : > { %4687 = vmatmul.msk.f32.vlgmr.msra.gmra.mxu3 %vm559_vm0, %v361_v14  ;;  %v341_v40 = vld [vmem:[%s7615_s2 + $0x30] sm:$0xff]  ;;  %v384_v43 = vld [vmem:[%s7616_s3 + $0x88] sm:$0xff]  ;;  %v342_v44 = vld [vmem:[%s7615_s2 + $0x38] sm:$0xff] }
  0x20   : > { %426 = vperm.xlu2 %5370, %v372_v24   ;;  %v389_v41 = vld [vmem:[%s7616_s3 + $0xb0] sm:$0xff]  ;;  %v392_v45 = vld [vmem:[%s7616_s3 + $0xc8] sm:$0xff]  ;;  %v391_v46 = vld [vmem:[%s7616_s3 + $0xc0] sm:$0xff] }
  0x21   : > { %v387_v47 = vld [vmem:[%s7616_s3 + $0xa0] sm:$0xff]  ;;  %v394_v50 = vld [vmem:[%s7616_s3 + $0xd8] sm:$0xff]  ;;  %v344_v52 = vld [vmem:[%s7615_s2 + $0x48] sm:$0xff] }
  0x22   : > { %v343_v48 = vld [vmem:[%s7615_s2 + $0x40] sm:$0xff]  ;;  %v390_v51 = vld [vmem:[%s7616_s3 + $0xb8] sm:$0xff]  ;;  %v397_v54 = vld [vmem:[%s7616_s3 + $0xf0] sm:$0xff] }
  0x23   : > { %v395_v49 = vld [vmem:[%s7616_s3 + $0xe0] sm:$0xff]  ;;  %v398_v53 = vld [vmem:[%s7616_s3 + $0xf8] sm:$0xff]  ;;  %v393_v55 = vld [vmem:[%s7616_s3 + $0xd0] sm:$0xff] }
  0x24   : > { %v345_v56 = vld [vmem:[%s7615_s2 + $0x50] sm:$0xff]  ;;  %v396_v57 = vld [vmem:[%s7616_s3 + $0xe8] sm:$0xff]  ;;  %v346_v58 = vld [vmem:[%s7615_s2 + $0x58] sm:$0xff] }
  0x25   : > { %4662 = vmatmul.msk.f32.gmra.mxu0 %vm559_vm0, %v336_v15  ;;  %436 = vperm.xlu1 %5369, %v374_v16   ;;  %v347_v59 = vld [vmem:[%s7615_s2 + $0x60] sm:$0xff]  ;;  %v348_v60 = vld [vmem:[%s7615_s2 + $0x68] sm:$0xff]  ;;  %v349_v62 = vld [vmem:[%s7615_s2 + $0x70] sm:$0xff] }
  0x26   : > { %431 = vperm.xlu0 %5368, %v373_v17   ;;  %v350_v1 = vld [vmem:[%s7615_s2 + $0x78] sm:$0xff]  ;;  %v351_v6 = vld [vmem:[%s7615_s2 + $0x80] sm:$0xff]  ;;  %v352_v13 = vld [vmem:[%s7615_s2 + $0x88] sm:$0xff] }
  0x27   : > { %4688 = vmatmul.msk.f32.gmra.mxu3 %vm559_vm0, %v362_v18 }
  0x28   : > { %441 = vperm.xlu2 %5370, %v375_v29  }
  0x2d   : > { %4663 = vmatmul.msk.f32.gmra.mxu0 %vm559_vm0, %v337_v20  ;;  %451 = vperm.xlu1 %5369, %v377_v21   ;;  %v353_v21 = vld [vmem:[%s7615_s2 + $0x90] sm:$0xff] }
  0x2e   : > { %446 = vperm.xlu0 %5368, %v376_v22  }
  0x2f   : > { %4689 = vmatmul.msk.f32.gmra.mxu3 %vm559_vm0, %v363_v23 }
  0x30   : > { %456 = vperm.xlu2 %5370, %v378_v34  }
  0x35   : > { %4664 = vmatmul.msk.f32.gmra.mxu0 %vm559_vm0, %v338_v25  ;;  %466 = vperm.xlu1 %5369, %v380_v26  }
  0x36   : > { %461 = vperm.xlu0 %5368, %v379_v27  }
  0x37   : > { %4690 = vmatmul.msk.f32.gmra.mxu3 %vm559_vm0, %v364_v28 }
  0x38   : > { %471 = vperm.xlu2 %5370, %v381_v39  }
  0x3d   : > { %4665 = vmatmul.msk.f32.gmra.mxu0 %vm559_vm0, %v339_v30  ;;  %481 = vperm.xlu1 %5369, %v383_v31  }
  0x3e   : > { %476 = vperm.xlu0 %5368, %v382_v32   ;;  %v354_v32 = vld [vmem:[%s7615_s2 + $0x98] sm:$0xff] }
  0x3f   : > { %4691 = vmatmul.msk.f32.gmra.mxu3 %vm559_vm0, %v365_v33 }
  0x40   : > { %486 = vperm.xlu2 %5370, %v384_v43  }
  0x45   : > { %4666 = vmatmul.msk.f32.gmra.mxu0 %vm559_vm0, %v340_v35  ;;  %496 = vperm.xlu1 %5369, %v386_v36  }
  0x46   : > { %491 = vperm.xlu0 %5368, %v385_v37  }
  0x47   : > { %4692 = vmatmul.msk.f32.gmra.mxu3 %vm559_vm0, %v366_v38 }
  0x48   : > { %501 = vperm.xlu2 %5370, %v387_v47  }
  0x4d   : > { %4667 = vmatmul.msk.f32.gmra.mxu0 %vm559_vm0, %v341_v40  ;;  %511 = vperm.xlu1 %5369, %v389_v41  }
  0x4e   : > { %506 = vperm.xlu0 %5368, %v388_v42  }
  0x50   : > { %516 = vperm.xlu2 %5370, %v390_v51  }
  0x55   : > { %4668 = vmatmul.msk.f32.gmra.mxu0 %vm559_vm0, %v342_v44  ;;  %526 = vperm.xlu1 %5369, %v392_v45  }
  0x56   : > { %521 = vperm.xlu0 %5368, %v391_v46  }
  0x58   : > { %531 = vperm.xlu2 %5370, %v393_v55  }
  0x5d   : > { %4669 = vmatmul.msk.f32.gmra.mxu0 %vm559_vm0, %v343_v48  ;;  %541 = vperm.xlu1 %5369, %v395_v49  }
  0x5e   : > { %536 = vperm.xlu0 %5368, %v394_v50  }
  0x60   : > { %546 = vperm.xlu2 %5370, %v396_v57  }
  0x65   : > { %4670 = vmatmul.msk.f32.gmra.mxu0 %vm559_vm0, %v344_v52  ;;  %556 = vperm.xlu1 %5369, %v398_v53   ;;  %v355_v53 = vld [vmem:[%s7615_s2 + $0xa0] sm:$0xff] }
  0x66   : > { %551 = vperm.xlu0 %5368, %v397_v54  }
  0x6d   : > { %4671 = vmatmul.msk.f32.gmra.mxu0 %vm559_vm0, %v345_v56 }
  0x72   : > { %v5869_v3 = vpop.permute.xlu2 %421 }
  0x75   : > { %4672 = vmatmul.msk.f32.gmra.mxu0 %vm559_vm0, %v346_v58 }
  0x7a   : > { %v5879_v11 = vpop.permute.xlu2 %426 }
  0x7d   : > { %4673 = vmatmul.msk.f32.gmra.mxu0 %vm559_vm0, %v347_v59 }
  0x82   : > { %v5892_v23 = vpop.permute.xlu2 %441 }
  0x85   : > { %4674 = vmatmul.msk.f32.gmra.mxu0 %vm559_vm0, %v348_v60 }
  0x87   : > { %v412_v61 = vpop.permute.xlu1 %411 }
  0x88   : > { %v402_v63 = vpop.permute.xlu0 %401 }
  0x8a   : > { %v5903_v41 = vpop.permute.xlu2 %456 }
  0x8d   : > { %4675 = vmatmul.msk.f32.gmra.mxu0 %vm559_vm0, %v349_v62 }
  0x8f   : > { %v417_v0 = vpop.permute.xlu1 %416 }
  0x90   : > { %v407_v2 = vpop.permute.xlu0 %406 }
  0x95   : > { %4676 = vmatmul.msk.f32.gmra.mxu0 %vm559_vm0, %v350_v1 }
  0x97   : > { %v5874_v8 = vpop.permute.xlu1 %436 }
  0x98   : > { %v5877_v10 = vpop.permute.xlu0 %431 }
  0x9a   : > { %v673_v4 = vpop.f32.mrf.mxu0 }
  0x9b   : > { %v674_v7 = vadd.f32 %v673_v4, %v402_v63 }
  0x9d   : > { %v4693_v9 = vmul.f32 -1.442695, %v674_v7  ;;  %4677 = vmatmul.msk.f32.gmra.mxu0 %vm559_vm0, %v351_v6 }
  0x9f   : > { %5377 = vpow2.f32 %v4693_v9  ;;  %v5884_v17 = vpop.permute.xlu1 %451 }
  0xa0   : > { %v5887_v19 = vpop.permute.xlu0 %446 }
  0xa2   : > { %v676_v12 = vpop.f32.mrf.mxu0  ;;  %v5910_v49 = vpop.f32.mrf.mxu3 }
  0xa3   : > { %v677_v14 = vadd.f32 %v676_v12, %v407_v2  ;;  %v356_v12 = vld [vmem:[%s7615_s2 + $0xa8] sm:$0xff] }
  0xa5   : > { %v5378_v15 = vpop.eup %5377  ;;  %v4694_v16 = vmul.f32 -1.442695, %v677_v14  ;;  %4678 = vmatmul.msk.f32.gmra.mxu0 %vm559_vm0, %v352_v13 }
  0xa6   : > { %v865_v18 = vadd.f32 1.0, %v5378_v15 }
  0xa7   : > { %5379 = vpow2.f32 %v4694_v16  ;;  %v5895_v28 = vpop.permute.xlu1 %466 }
  0xa8   : > { %5381 = vrcp.f32 %v865_v18  ;;  %v908_v33 = vand.u32 2147483648, %v865_v18  ;;  %v5900_v34 = vpop.permute.xlu0 %461  ;;  %v906_v37 = vand.u32 2147483647, %v865_v18  ;;  %vm902_vm2 = vweird.f32 %v865_v18 }
  0xaa   : > { %v679_v20 = vpop.f32.mrf.mxu0  ;;  %v909_v44 = vor.u32 1.1754944e-38, %v908_v33  ;;  %vm907_vm4 = vcmp.eq.f32.partialorder %v906_v37, 8.507059e+37  ;;  %v5936_v15 = vpop.f32.mrf.mxu3  ;;  %v357_v37 = vld [vmem:[%s7615_s2 + $0xb0] sm:$0xff] }
  0xab   : > { %v680_v22 = vadd.f32 %v679_v20, %v412_v61 }
  0xad   : > { %v5380_v24 = vpop.eup %5379  ;;  %v4695_v25 = vmul.f32 -1.442695, %v680_v22  ;;  %4679 = vmatmul.msk.f32.gmra.mxu0 %vm559_vm0, %v353_v21 }
  0xae   : > { %v5382_v26 = vpop.eup %5381  ;;  %v866_v27 = vadd.f32 1.0, %v5380_v24 }
  0xaf   : > { %5383 = vpow2.f32 %v4695_v25  ;;  %v898_v29 = vmul.f32 %v5382_v26, %v865_v18  ;;  %vm903_vm1 = vweird.f32 %v5382_v26  ;;  %v5908_v48 = vpop.permute.xlu1 %481 }
  0xb0   : > { %5385 = vrcp.f32 %v866_v27  ;;  %vm904_vm3 = vmor %vm902_vm2, %vm903_vm1  ;;  %v923_v54 = vand.u32 2147483648, %v866_v27  ;;  %v921_v57 = vand.u32 2147483647, %v866_v27  ;;  %v5919_v58 = vpop.permute.xlu0 %476  ;;  %vm917_vm6 = vweird.f32 %v866_v27 }
  0xb1   : > { %v899_v30 = vsub.f32 1.0, %v898_v29 }
  0xb2   : > { %v682_v31 = vpop.f32.mrf.mxu0  ;;  %vm922_vm8 = vcmp.eq.f32.partialorder %v921_v57, 8.507059e+37 }
  0xb3   : > { %v683_v35 = vadd.f32 %v682_v31, %v417_v0  ;;  %v900_v36 = vmul.f32 %v5382_v26, %v899_v30  ;;  %v924_v0 = vor.u32 1.1754944e-38, %v923_v54 }
  0xb5   : > { %v5384_v38 = vpop.eup %5383  ;;  %v4696_v39 = vmul.f32 -1.442695, %v683_v35  ;;  %4680 = vmatmul.msk.f32.gmra.mxu0 %vm559_vm0, %v354_v32  ;;  %v901_v40 = vadd.f32 %v5382_v26, %v900_v36 }
  0xb6   : > { %v5386_v42 = vpop.eup %5385  ;;  %v5905_v43 = vadd.f32 1.0, %v5384_v38 }
  0xb7   : > { %5387 = vpow2.f32 %v4696_v39  ;;  %v905_v45 = vsel %vm904_vm3, %v5382_v26, %v901_v40  ;;  %v913_v46 = vmul.f32 %v5386_v42, %v866_v27  ;;  %vm918_vm5 = vweird.f32 %v5386_v42  ;;  %v5934_v14 = vpop.permute.xlu1 %496 }
  0xb8   : > { %5389 = vrcp.f32 %v5905_v43  ;;  %v910_v47 = vsel %vm907_vm4, %v909_v44, %v905_v45  ;;  %vm919_vm7 = vmor %vm917_vm6, %vm918_vm5  ;;  %v938_v13 = vand.u32 2147483648, %v5905_v43  ;;  %v936_v20 = vand.u32 2147483647, %v5905_v43  ;;  %v5945_v29 = vpop.permute.xlu0 %491  ;;  %v5962_v45 = vpop.f32.mrf.mxu3 }
  0xb9   : > { %v5912_v50 = vpack.c.bf16 %v910_v47, %v910_v47  ;;  %v914_v51 = vsub.f32 1.0, %v913_v46  ;;  %vm932_vm10 = vweird.f32 %v5905_v43 }
  0xba   : > { %v685_v52 = vpop.f32.mrf.mxu0  ;;  %v939_v27 = vor.u32 1.1754944e-38, %v938_v13  ;;  %vm937_vm12 = vcmp.eq.f32.partialorder %v936_v20, 8.507059e+37 }
  0xbb   : > { %v686_v55 = vadd.f32 %v685_v52, %v5869_v3  ;;  %1443 = vperm.xlu2 %5370, %v5912_v50   ;;  %v915_v56 = vmul.f32 %v5386_v42, %v914_v51  ;;  %v5925_v3 = vpop.permute.xlu2 %471 }
  0xbd   : > { %v5388_v59 = vpop.eup %5387  ;;  %v4697_v60 = vmul.f32 -1.442695, %v686_v55  ;;  %4681 = vmatmul.msk.f32.gmra.mxu0 %vm559_vm0, %v355_v53  ;;  %v916_v61 = vadd.f32 %v5386_v42, %v915_v56 }
  0xbe   : > { %v5390_v62 = vpop.eup %5389  ;;  %v5922_v63 = vadd.f32 1.0, %v5388_v59 }
  0xbf   : > { %5391 = vpow2.f32 %v4697_v60  ;;  %v920_v1 = vsel %vm919_vm7, %v5386_v42, %v916_v61  ;;  %v928_v2 = vmul.f32 %v5390_v62, %v5905_v43  ;;  %vm933_vm9 = vweird.f32 %v5390_v62  ;;  %v5960_v44 = vpop.permute.xlu1 %511  ;;  %v358_v61 = vld [vmem:[%s7615_s2 + $0xb8] sm:$0xff] }
  0xc0   : > { %5393 = vrcp.f32 %v5922_v63  ;;  %v925_v4 = vsel %vm922_vm8, %v924_v0, %v920_v1  ;;  %vm934_vm11 = vmor %vm932_vm10, %vm933_vm9  ;;  %v953_v38 = vand.u32 2147483648, %v5922_v63  ;;  %v951_v42 = vand.u32 2147483647, %v5922_v63  ;;  %v5967_v56 = vpop.permute.xlu0 %506 }
  0xc1   : > { %v5928_v6 = vpack.c.bf16 %v925_v4, %v925_v4  ;;  %v929_v7 = vsub.f32 1.0, %v928_v2  ;;  %vm947_vm14 = vweird.f32 %v5922_v63 }
  0xc2   : > { %v688_v9 = vpop.f32.mrf.mxu0  ;;  %vm952_vm1 = vcmp.eq.f32.partialorder %v951_v42, 8.507059e+37 }
  0xc3   : > { %v689_v16 = vadd.f32 %v688_v9, %v5879_v11  ;;  %1452 = vperm.xlu0 %5368, %v5928_v6   ;;  %v930_v18 = vmul.f32 %v5390_v62, %v929_v7  ;;  %v5951_v35 = vpop.permute.xlu2 %486 }
  0xc5   : > { %v5392_v21 = vpop.eup %5391  ;;  %v4698_v22 = vmul.f32 -1.442695, %v689_v16  ;;  %4682 = vmatmul.msk.f32.gmra.mxu0 %vm559_vm0, %v356_v12  ;;  %v931_v24 = vadd.f32 %v5390_v62, %v930_v18  ;;  %v5986_v18 = vpop.f32.mrf.mxu3 }
  0xc6   : > { %v5394_v25 = vpop.eup %5393  ;;  %v5943_v26 = vadd.f32 1.0, %v5392_v21 }
  0xc7   : > { %5395 = vpow2.f32 %v4698_v22  ;;  %v935_v11 = vsel %vm934_vm11, %v5390_v62, %v931_v24  ;;  %v943_v30 = vmul.f32 %v5394_v25, %v5922_v63  ;;  %vm948_vm13 = vweird.f32 %v5394_v25  ;;  %v5984_v16 = vpop.permute.xlu1 %526 }
  0xc8   : > { %5397 = vrcp.f32 %v5943_v26  ;;  %v940_v31 = vsel %vm937_vm12, %v939_v27, %v935_v11  ;;  %vm949_vm15 = vmor %vm947_vm14, %vm948_vm13  ;;  %v968_v62 = vand.u32 2147483648, %v5943_v26  ;;  %v966_v1 = vand.u32 2147483647, %v5943_v26  ;;  %v359_v27 = vld [vmem:[%s7615_s2 + $0xc0] sm:$0xff] }
  0xc9   : > { %v5949_v32 = vpack.c.bf16 %v940_v31, %v940_v31  ;;  %v944_v33 = vsub.f32 1.0, %v943_v30  ;;  %vm962_vm3 = vweird.f32 %v5943_v26  ;;  %v5994_v30 = vpop.permute.xlu0 %521 }
  0xca   : > { %v691_v36 = vpop.f32.mrf.mxu0  ;;  %vm967_vm5 = vcmp.eq.f32.partialorder %v966_v1, 8.507059e+37 }
  0xcb   : > { %v692_v39 = vadd.f32 %v691_v36, %v5877_v10  ;;  %1461 = vperm.xlu1 %5369, %v5949_v32   ;;  %v945_v40 = vmul.f32 %v5394_v25, %v944_v33  ;;  %v954_v10 = vor.u32 1.1754944e-38, %v953_v38  ;;  %v5978_v2 = vpop.permute.xlu2 %501 }
  0xcd   : > { %v5396_v43 = vpop.eup %5395  ;;  %v4699_v46 = vmul.f32 -1.442695, %v692_v39  ;;  %4683 = vmatmul.msk.f32.gmra.mxu0 %vm559_vm0, %v357_v37  ;;  %v946_v47 = vadd.f32 %v5394_v25, %v945_v40 }
  0xce   : > { %v5398_v51 = vpop.eup %5397  ;;  %v870_v52 = vadd.f32 1.0, %v5396_v43 }
  0xcf   : > { %5399 = vpow2.f32 %v4699_v46  ;;  %v950_v53 = vsel %vm949_vm15, %v5394_v25, %v946_v47  ;;  %v958_v54 = vmul.f32 %v5398_v51, %v5943_v26  ;;  %vm963_vm2 = vweird.f32 %v5398_v51 }
  0xd0   : > { %5401 = vrcp.f32 %v870_v52  ;;  %v955_v55 = vsel %vm952_vm1, %v954_v10, %v950_v53  ;;  %vm964_vm4 = vmor %vm962_vm3, %vm963_vm2  ;;  %v983_v11 = vand.u32 2147483648, %v870_v52  ;;  %v981_v36 = vand.u32 2147483647, %v870_v52  ;;  %v542_v10 = vpop.permute.xlu1 %541  ;;  %v763_v53 = vpop.f32.mrf.mxu3 }
  0xd1   : > { %v5969_v57 = vpack.c.bf16 %v955_v55, %v955_v55  ;;  %v959_v59 = vsub.f32 1.0, %v958_v54  ;;  %vm977_vm7 = vweird.f32 %v870_v52 }
  0xd2   : > { %v694_v60 = vpop.f32.mrf.mxu0  ;;  %v984_v46 = vor.u32 1.1754944e-38, %v983_v11  ;;  %vm982_vm9 = vcmp.eq.f32.partialorder %v981_v36, 8.507059e+37 }
  0xd3   : > { %v695_v63 = vadd.f32 %v694_v60, %v5874_v8  ;;  %1470 = vperm.xlu2 %5370, %v5969_v57   ;;  %v960_v0 = vmul.f32 %v5398_v51, %v959_v59  ;;  %v969_v8 = vor.u32 1.1754944e-38, %v968_v62  ;;  %v5999_v40 = vpop.permute.xlu2 %516  ;;  %v360_v59 = vld [vmem:[%s7615_s2 + $0xc8] sm:$0xff] }
  0xd5   : > { %v5400_v4 = vpop.eup %5399  ;;  %v4700_v7 = vmul.f32 -1.442695, %v695_v63  ;;  %4684 = vmatmul.msk.f32.gmra.mxu0 %vm559_vm0, %v358_v61  ;;  %v961_v9 = vadd.f32 %v5398_v51, %v960_v0  ;;  %v6014_v0 = vpop.permute.xlu0 %536 }
  0xd6   : > { %v5402_v12 = vpop.eup %5401  ;;  %v5982_v13 = vadd.f32 1.0, %v5400_v4 }
  0xd7   : > { %5403 = vpow2.f32 %v4700_v7  ;;  %v965_v20 = vsel %vm964_vm4, %v5398_v51, %v961_v9  ;;  %v973_v21 = vmul.f32 %v5402_v12, %v870_v52  ;;  %vm978_vm6 = vweird.f32 %v5402_v12 }
  0xd8   : > { %5405 = vrcp.f32 %v5982_v13  ;;  %v970_v22 = vsel %vm967_vm5, %v969_v8, %v965_v20  ;;  %vm979_vm8 = vmor %vm977_vm7, %vm978_vm6  ;;  %v998_v60 = vand.u32 2147483648, %v5982_v13  ;;  %v996_v63 = vand.u32 2147483647, %v5982_v13  ;;  %v557_v11 = vpop.permute.xlu1 %556 }
  0xd9   : > { %v5989_v24 = vpack.c.bf16 %v970_v22, %v970_v22  ;;  %v974_v25 = vsub.f32 1.0, %v973_v21  ;;  %vm992_vm11 = vweird.f32 %v5982_v13 }
  0xda   : > { %v697_v26 = vpop.f32.mrf.mxu0  ;;  %vm997_vm13 = vcmp.eq.f32.partialorder %v996_v63, 8.507059e+37 }
  0xdb   : > { %v698_v31 = vadd.f32 %v697_v26, %v5892_v23  ;;  %1479 = vperm.xlu0 %5368, %v5989_v24   ;;  %v975_v33 = vmul.f32 %v5402_v12, %v974_v25  ;;  %v6021_v21 = vpop.permute.xlu2 %531 }
  0xdd   : > { %v5404_v37 = vpop.eup %5403  ;;  %v4701_v38 = vmul.f32 -1.442695, %v698_v31  ;;  %4685 = vmatmul.msk.f32.gmra.mxu0 %vm559_vm0, %v359_v27  ;;  %v976_v39 = vadd.f32 %v5402_v12, %v975_v33  ;;  %v766_v31 = vpop.f32.mrf.mxu3 }
  0xde   : > { %v5406_v42 = vpop.eup %5405  ;;  %v6001_v43 = vadd.f32 1.0, %v5404_v37 }
  0xdf   : > { %5407 = vpow2.f32 %v4701_v38  ;;  %v980_v23 = vsel %vm979_vm8, %v5402_v12, %v976_v39  ;;  %v988_v47 = vmul.f32 %v5406_v42, %v5982_v13  ;;  %vm993_vm10 = vweird.f32 %v5406_v42 }
  0xe0   : > { %5409 = vrcp.f32 %v6001_v43  ;;  %v985_v51 = vsel %vm982_vm9, %v984_v46, %v980_v23  ;;  %vm994_vm12 = vmor %vm992_vm11, %vm993_vm10  ;;  %v1013_v13 = vand.u32 2147483648, %v6001_v43  ;;  %v1011_v37 = vand.u32 2147483647, %v6001_v43 }
  0xe1   : > { %v6005_v54 = vpack.c.bf16 %v985_v51, %v985_v51  ;;  %v989_v52 = vsub.f32 1.0, %v988_v47  ;;  %v758_v38 = vadd.f32 %v5962_v45, %v542_v10  ;;  %vm1007_vm14 = vweird.f32 %v6001_v43 }
  0xe2   : > { %v700_v55 = vpop.f32.mrf.mxu0  ;;  %v767_v47 = vadd.f32 %v766_v31, %v557_v11  ;;  %vm1012_vm1 = vcmp.eq.f32.partialorder %v1011_v37, 8.507059e+37 }
  0xe3   : > { %v701_v61 = vadd.f32 %v700_v55, %v5887_v19  ;;  %1488 = vperm.xlu1 %5369, %v6005_v54   ;;  %v990_v62 = vmul.f32 %v5406_v42, %v989_v52  ;;  %v999_v19 = vor.u32 1.1754944e-38, %v998_v60  ;;  %v1014_v52 = vor.u32 1.1754944e-38, %v1013_v13 }
  0xe4   : > { %v4721_v60 = vmul.f32 -1.442695, %v758_v38  ;;  %v4724_v63 = vmul.f32 -1.442695, %v767_v47 }
  0xe5   : > { %v5408_v1 = vpop.eup %5407  ;;  %v4702_v4 = vmul.f32 -1.442695, %v701_v61  ;;  %4686 = vmatmul.msk.f32.gmra.mxu0 %vm559_vm0, %v360_v59  ;;  %v991_v7 = vadd.f32 %v5406_v42, %v990_v62  ;;  %v547_v62 = vpop.permute.xlu2 %546 }
  0xe6   : > { %v5410_v9 = vpop.eup %5409  ;;  %v6018_v12 = vadd.f32 1.0, %v5408_v1 }
  0xe7   : > { %5411 = vpow2.f32 %v4702_v4  ;;  %v995_v8 = vsel %vm994_vm12, %v5406_v42, %v991_v7  ;;  %v1003_v20 = vmul.f32 %v5410_v9, %v6001_v43  ;;  %vm1008_vm0 = vweird.f32 %v5410_v9 }
  0xe8   : > { %5413 = vrcp.f32 %v6018_v12  ;;  %v1000_v22 = vsel %vm997_vm13, %v999_v19, %v995_v8  ;;  %vm1009_vm15 = vmor %vm1007_vm14, %vm1008_vm0  ;;  %v1028_v4 = vand.u32 2147483648, %v6018_v12  ;;  %v1026_v19 = vand.u32 2147483647, %v6018_v12 }
  0xe9   : > { %v6024_v25 = vpack.c.bf16 %v1000_v22, %v1000_v22  ;;  %v1004_v26 = vsub.f32 1.0, %v1003_v20  ;;  %v761_v8 = vadd.f32 %v5986_v18, %v547_v62  ;;  %vm1022_vm3 = vweird.f32 %v6018_v12 }
  0xea   : > { %v703_v27 = vpop.f32.mrf.mxu0  ;;  %vm1027_vm5 = vcmp.eq.f32.partialorder %v1026_v19, 8.507059e+37 }
  0xeb   : > { %v704_v33 = vadd.f32 %v703_v27, %v5884_v17  ;;  %1497 = vperm.xlu2 %5370, %v6024_v25   ;;  %v1005_v36 = vmul.f32 %v5410_v9, %v1004_v26  ;;  %v552_v17 = vpop.permute.xlu0 %551 }
  0xec   : > { %v764_v43 = vadd.f32 %v763_v53, %v552_v17 }
  0xed   : > { %v5412_v39 = vpop.eup %5411  ;;  %v4703_v42 = vmul.f32 -1.442695, %v704_v33  ;;  %v1006_v46 = vadd.f32 %v5410_v9, %v1005_v36 }
  0xee   : > { %v5414_v23 = vpop.eup %5413  ;;  %v6032_v51 = vadd.f32 1.0, %v5412_v39  ;;  %v4723_v53 = vmul.f32 -1.442695, %v764_v43 }
  0xef   : > { %5415 = vpow2.f32 %v4703_v42  ;;  %v1010_v55 = vsel %vm1009_vm15, %v5410_v9, %v1006_v46  ;;  %v1018_v59 = vmul.f32 %v5414_v23, %v6018_v12  ;;  %vm1023_vm2 = vweird.f32 %v5414_v23 }
  0xf0   : > { %5417 = vrcp.f32 %v6032_v51  ;;  %v1015_v45 = vsel %vm1012_vm1, %v1014_v52, %v1010_v55  ;;  %vm1024_vm4 = vmor %vm1022_vm3, %vm1023_vm2  ;;  %v4722_v12 = vmul.f32 -1.442695, %v761_v8  ;;  %v1043_v39 = vand.u32 2147483648, %v6032_v51 }
  0xf1   : > { %v6036_v10 = vpack.c.bf16 %v1015_v45, %v1015_v45  ;;  %v1019_v61 = vsub.f32 1.0, %v1018_v59  ;;  %5419 = vpow2.f32 %v4721_v60  ;;  %vm1037_vm7 = vweird.f32 %v6032_v51 }
  0xf2   : > { %v706_v1 = vpop.f32.mrf.mxu0  ;;  %5421 = vpow2.f32 %v4724_v63  ;;  %v1044_v45 = vor.u32 1.1754944e-38, %v1043_v39 }
  0xf3   : > { %v707_v7 = vadd.f32 %v706_v1, %v5903_v41  ;;  %1506 = vperm.xlu0 %5368, %v6036_v10   ;;  %v1020_v9 = vmul.f32 %v5414_v23, %v1019_v61  ;;  %v1029_v41 = vor.u32 1.1754944e-38, %v1028_v4 }
  0xf5   : > { %v5416_v20 = vpop.eup %5415  ;;  %v4704_v22 = vmul.f32 -1.442695, %v707_v7  ;;  %v1021_v26 = vadd.f32 %v5414_v23, %v1020_v9 }
  0xf6   : > { %v5418_v27 = vpop.eup %5417  ;;  %v6044_v13 = vadd.f32 1.0, %v5416_v20 }
  0xf7   : > { %5423 = vpow2.f32 %v4704_v22  ;;  %v1025_v11 = vsel %vm1024_vm4, %v5414_v23, %v1021_v26  ;;  %v1033_v31 = vmul.f32 %v5418_v27, %v6032_v51  ;;  %v5420_v37 = vpop.eup %5419  ;;  %vm1038_vm6 = vweird.f32 %v5418_v27 }
  0xf8   : > { %5425 = vrcp.f32 %v6044_v13  ;;  %v1030_v18 = vsel %vm1027_vm5, %v1029_v41, %v1025_v11  ;;  %v1041_v23 = vand.u32 2147483647, %v6032_v51  ;;  %v5422_v47 = vpop.eup %5421  ;;  %vm1039_vm8 = vmor %vm1037_vm7, %vm1038_vm6  ;;  %v6058_v62 = vadd.f32 1.0, %v5420_v37 }
  0xf9   : > { %v6048_v33 = vpack.c.bf16 %v1030_v18, %v1030_v18  ;;  %5427 = vpow2.f32 %v4723_v53  ;;  %v1034_v36 = vsub.f32 1.0, %v1033_v31  ;;  %v6061_v1 = vadd.f32 1.0, %v5422_v47 }
  0xfa   : > { %v709_v38 = vpop.f32.mrf.mxu0  ;;  %5429 = vpow2.f32 %v4722_v12  ;;  %vm1042_vm9 = vcmp.eq.f32.partialorder %v1041_v23, 8.507059e+37  ;;  %v1058_v19 = vand.u32 2147483648, %v6044_v13  ;;  %v1056_v26 = vand.u32 2147483647, %v6044_v13 }
  0xfb   : > { %v710_v42 = vadd.f32 %v709_v38, %v5900_v34  ;;  %1515 = vperm.xlu1 %5369, %v6048_v33   ;;  %v1035_v46 = vmul.f32 %v5418_v27, %v1034_v36  ;;  %vm1052_vm11 = vweird.f32 %v6044_v13  ;;  %vm1367_vm2 = vweird.f32 %v6061_v1 }
  0xfc   : > { %v1059_v18 = vor.u32 1.1754944e-38, %v1058_v19  ;;  %vm1057_vm13 = vcmp.eq.f32.partialorder %v1056_v26, 8.507059e+37 }
  0xfd   : > { %v5424_v52 = vpop.eup %5423  ;;  %v4705_v17 = vmul.f32 -1.442695, %v710_v42  ;;  %v1036_v55 = vadd.f32 %v5418_v27, %v1035_v46 }
  0xfe   : > { %v5426_v59 = vpop.eup %5425  ;;  %v6055_v60 = vadd.f32 1.0, %v5424_v52 }
  0xff   : > { %v5428_v61 = vpop.eup %5427  ;;  %5431 = vpow2.f32 %v4705_v17  ;;  %v1040_v34 = vsel %vm1039_vm8, %v5418_v27, %v1036_v55  ;;  %v1048_v43 = vmul.f32 %v5426_v59, %v6044_v13  ;;  %vm1053_vm10 = vweird.f32 %v5426_v59 }
 0x100   : > { %5433 = vrcp.f32 %v6055_v60  ;;  %v1045_v63 = vsel %vm1042_vm9, %v1044_v45, %v1040_v34  ;;  %v6065_v7 = vadd.f32 1.0, %v5428_v61  ;;  %v5430_v8 = vpop.eup %5429  ;;  %vm1054_vm12 = vmor %vm1052_vm11, %vm1053_vm10  ;;  %v1073_v46 = vand.u32 2147483648, %v6055_v60 }
 0x101   : > { %v6063_v51 = vpack.c.bf16 %v1045_v63, %v1045_v63  ;;  %v1049_v4 = vsub.f32 1.0, %v1048_v43  ;;  %5435 = vrcp.f32 %v6058_v62  ;;  %v1071_v17 = vand.u32 2147483647, %v6055_v60 }
 0x102   : > { %v712_v9 = vpop.f32.mrf.mxu0  ;;  %5437 = vrcp.f32 %v6061_v1  ;;  %vm1067_vm14 = vweird.f32 %v6055_v60  ;;  %v1074_v63 = vor.u32 1.1754944e-38, %v1073_v46  ;;  %vm1352_vm4 = vweird.f32 %v6065_v7 }
 0x103   : > { %v713_v20 = vadd.f32 %v712_v9, %v5895_v28  ;;  %1524 = vperm.xlu2 %5370, %v6063_v51   ;;  %v1050_v22 = vmul.f32 %v5426_v59, %v1049_v4  ;;  %5439 = vrcp.f32 %v6065_v7  ;;  %v6077_v28 = vadd.f32 1.0, %v5430_v8 }
 0x104   : > { %v5574_v4 = vmov 839922192   ;;  %v1373_v9 = vand.u32 2147483648, %v6061_v1  ;;  %vm1072_vm1 = vcmp.eq.f32.partialorder %v1071_v17, 8.507059e+37 }
 0x105   : > { %v5432_v53 = vpop.eup %5431  ;;  %v4706_v27 = vmul.f32 -1.442695, %v713_v20  ;;  %v1051_v41 = vadd.f32 %v5426_v59, %v1050_v22  ;;  %vm1337_vm9 = vweird.f32 %v6077_v28 }
 0x106   : > { %v5434_v11 = vpop.eup %5433  ;;  %v6074_v31 = vadd.f32 1.0, %v5432_v53 }
 0x107   : > { %5441 = vpow2.f32 %v4706_v27  ;;  %v1055_v36 = vsel %vm1054_vm12, %v5426_v59, %v1051_v41  ;;  %v1063_v12 = vmul.f32 %v5434_v11, %v6055_v60  ;;  %v6083_v39 = vpop.eup %5435  ;;  %vm1068_vm0 = vweird.f32 %v5434_v11 }
 0x108   : > { %5443 = vrcp.f32 %v6074_v31  ;;  %v1060_v37 = vsel %vm1057_vm13, %v1059_v18, %v1055_v36  ;;  %v6087_v23 = vpop.eup %5437  ;;  %vm1069_vm15 = vmor %vm1067_vm14, %vm1068_vm0  ;;  %v1371_v41 = vand.u32 2147483647, %v6061_v1  ;;  %v1409_v36 = vld [vmem:[%s7614_s1] sm:$0xff]  ;;  %vm1082_vm5 = vweird.f32 %v6074_v31 }
 0x109   : > { %v6081_v38 = vpack.c.bf16 %v1060_v37, %v1060_v37  ;;  %v1064_v13 = vsub.f32 1.0, %v1063_v12  ;;  %5445 = vrcp.f32 %v6077_v28  ;;  %v6092_v55 = vpop.eup %5439  ;;  %v1363_v26 = vmul.f32 %v6087_v23, %v6061_v1 }
 0x10a   : > { %v715_v42 = vpop.f32.mrf.mxu0  ;;  %v1348_v60 = vmul.f32 %v6092_v55, %v6065_v7  ;;  %v1088_v37 = vand.u32 2147483648, %v6074_v31  ;;  %vm1368_vm8 = vweird.f32 %v6087_v23  ;;  %vm6141_vm10 = vcmp.eq.f32.partialorder %v1371_v41, 8.507059e+37 }
 0x10b   : > { %v716_v47 = vadd.f32 %v715_v42, %v5925_v3  ;;  %1533 = vperm.xlu0 %5368, %v6081_v38   ;;  %v1065_v52 = vmul.f32 %v5434_v11, %v1064_v13  ;;  %v1447_v3 = vunpack.c.l.s4 %v5574_v4  ;;  %v6120_v13 = vor.u32 1.1754944e-38, %v1373_v9  ;;  %vm6159_vm0 = vmor %vm1367_vm2, %vm1368_vm8 }
 0x10c   : > { %v1341_v42 = vand.u32 2147483647, %v6077_v28  ;;  %v1349_v17 = vsub.f32 1.0, %v1348_v60  ;;  %v1729_v4 = vunpack.c.l.bf16 %v1409_v36  ;;  %v1089_v60 = vor.u32 1.1754944e-38, %v1088_v37 }
 0x10d   : > { %v5442_v59 = vpop.eup %5441  ;;  %v4707_v45 = vmul.f32 -1.442695, %v716_v47  ;;  %v1066_v61 = vadd.f32 %v5434_v11, %v1065_v52  ;;  %v6116_v12 = vunpack.c.0.s8 %v1447_v3  ;;  %v1086_v52 = vand.u32 2147483647, %v6074_v31 }
 0x10e   : > { %v5444_v34 = vpop.eup %5443  ;;  %v6095_v43 = vadd.f32 1.0, %v5442_v59  ;;  %v1364_v59 = vsub.f32 1.0, %v1363_v26  ;;  %vm1353_vm12 = vweird.f32 %v6092_v55 }
 0x10f   : > { %5447 = vpow2.f32 %v4707_v45  ;;  %v1070_v19 = vsel %vm1069_vm15, %v5434_v11, %v1066_v61  ;;  %v1078_v8 = vmul.f32 %v5444_v34, %v6074_v31  ;;  %v6099_v20 = vpop.eup %5445  ;;  %v6111_v11 = vmul.f32 %v6083_v39, %v6058_v62 }
 0x110   : > { %5449 = vrcp.f32 %v6095_v43  ;;  %v1075_v22 = vsel %vm1072_vm1, %v1074_v63, %v1070_v19  ;;  %vm1083_vm3 = vweird.f32 %v5444_v34  ;;  %v1333_v45 = vmul.f32 %v6099_v20, %v6077_v28  ;;  %vm6173_vm1 = vmor %vm1352_vm4, %vm1353_vm12 }
 0x111   : > { %v6106_v53 = vpack.c.bf16 %v1075_v22, %v1075_v22  ;;  %v1079_v27 = vsub.f32 1.0, %v1078_v8  ;;  %v1730_v8 = vunpack.c.h.bf16 %v1409_v36  ;;  %vm1084_vm6 = vmor %vm1082_vm5, %vm1083_vm3  ;;  %vm1087_vm7 = vcmp.eq.f32.partialorder %v1086_v52, 8.507059e+37 }
 0x112   : > { %v718_v18 = vpop.f32.mrf.mxu0  ;;  %vm1097_vm13 = vweird.f32 %v6095_v43  ;;  %vm1338_vm3 = vweird.f32 %v6099_v20 }
 0x113   : > { %v719_v46 = vadd.f32 %v718_v18, %v5919_v58  ;;  %1542 = vperm.xlu1 %5369, %v6106_v53   ;;  %v1080_v47 = vmul.f32 %v5444_v34, %v1079_v27  ;;  %vm6201_vm5 = vmor %vm1337_vm9, %vm1338_vm3 }
 0x115   : > { %v5448_v61 = vpop.eup %5447  ;;  %v4708_v63 = vmul.f32 -1.442695, %v719_v46  ;;  %v1444_v3 = vpop.permute.xlu2 %1443  ;;  %v1081_v9 = vadd.f32 %v5444_v34, %v1080_v47  ;;  %v1365_v47 = vmul.f32 %v6087_v23, %v1364_v59  ;;  %v1101_v59 = vand.u32 2147483647, %v6095_v43 }
 0x116   : > { %v5450_v58 = vpop.eup %5449  ;;  %v6130_v19 = vadd.f32 1.0, %v5448_v61  ;;  %v1449_v22 = vperm.slane %v1444_v3, %v6116_v12  ;;  %v1103_v3 = vand.u32 2147483648, %v6095_v43 }
 0x117   : > { %5451 = vpow2.f32 %v4708_v63  ;;  %v1085_v26 = vsel %vm1084_vm6, %v5444_v34, %v1081_v9  ;;  %v1093_v27 = vmul.f32 %v5450_v58, %v6095_v43  ;;  %v1334_v34 = vsub.f32 1.0, %v1333_v45 }
 0x118   : > { %5453 = vrcp.f32 %v6130_v19  ;;  %v1793_v18 = vunpack.c.l.bf16 %v1449_v22  ;;  %v1090_v46 = vsel %vm1087_vm7, %v1089_v60, %v1085_v26  ;;  %v1350_v9 = vmul.f32 %v6092_v55, %v1349_v17 }
 0x119   : > { %v6138_v31 = vpack.c.bf16 %v1090_v46, %v1090_v46  ;;  %v1094_v36 = vsub.f32 1.0, %v1093_v27  ;;  %vm1098_vm11 = vweird.f32 %v5450_v58  ;;  %v1356_v45 = vand.u32 2147483647, %v6065_v7 }
 0x11a   : > { %v1825_v52 = vmul.f32 %v1793_v18, %v1729_v4  ;;  %v1826_v61 = vmul.f32 %v1793_v18, %v1730_v8  ;;  %v721_v63 = vpop.f32.mrf.mxu0  ;;  %v1358_v4 = vand.u32 2147483648, %v6065_v7  ;;  %vm1099_vm14 = vmor %vm1097_vm13, %vm1098_vm11  ;;  %v1335_v43 = vmul.f32 %v6099_v20, %v1334_v34 }
 0x11b   : > { %v722_v22 = vadd.f32 %v721_v63, %v5908_v48  ;;  %1551 = vperm.xlu2 %5370, %v6138_v31   ;;  %v1095_v60 = vmul.f32 %v5450_v58, %v1094_v36  ;;  %v1366_v48 = vadd.f32 %v6087_v23, %v1365_v47  ;;  %v1104_v36 = vor.u32 1.1754944e-38, %v1103_v3 }
 0x11c   : > { %v1889_v41 = vpack.c.bf16 %v1826_v61, %v1825_v52  ;;  %v1351_v52 = vadd.f32 %v6092_v55, %v1350_v9  ;;  %vm1102_vm15 = vcmp.eq.f32.partialorder %v1101_v59, 8.507059e+37  ;;  %vm6178_vm2 = vcmp.eq.f32.partialorder %v1356_v45, 8.507059e+37 }
 0x11d   : > { %v5452_v8 = vpop.eup %5451  ;;  %v4709_v26 = vmul.f32 -1.442695, %v722_v22  ;;  %v1096_v27 = vadd.f32 %v5450_v58, %v1095_v60  ;;  %v1370_v7 = vsel %vm6159_vm0, %v6087_v23, %v1366_v48  ;;  %v1343_v9 = vand.u32 2147483648, %v6077_v28 }
 0x11e   : > { %v5454_v18 = vpop.eup %5453  ;;  %v6163_v46 = vadd.f32 1.0, %v5452_v8  ;;  %1921 = vst [vmem:[#allocation2] sm:$0xff] %v1889_v41  ;;  %v1118_v60 = vand.u32 2147483648, %v6130_v19  ;;  %v1355_v59 = vsel %vm6173_vm1, %v6092_v55, %v1351_v52  ;;  %v1359_v41 = vor.u32 1.1754944e-38, %v1358_v4 }
 0x11f   : > { %5455 = vpow2.f32 %v4709_v26  ;;  %v1100_v47 = vsel %vm1099_vm14, %v5450_v58, %v1096_v27  ;;  %v1108_v1 = vmul.f32 %v5454_v18, %v6130_v19  ;;  %v1336_v45 = vadd.f32 %v6099_v20, %v1335_v43 }
 0x120   : > { %5457 = vrcp.f32 %v6163_v46  ;;  %v1105_v63 = vsel %vm1102_vm15, %v1104_v36, %v1100_v47  ;;  %vm1113_vm4 = vweird.f32 %v5454_v18  ;;  %v1116_v23 = vand.u32 2147483647, %v6130_v19 }
 0x121   : > { %v6183_v58 = vpack.c.bf16 %v1105_v63, %v1105_v63  ;;  %v1109_v34 = vsub.f32 1.0, %v1108_v1  ;;  %v1375_v55 = vsel %vm6141_vm10, %v6120_v13, %v1370_v7  ;;  %vm6210_vm6 = vcmp.eq.f32.partialorder %v1341_v42, 8.507059e+37 }
 0x122   : > { %v724_v22 = vpop.f32.mrf.mxu0  ;;  %v1319_v4 = vsub.f32 1.0, %v6111_v11  ;;  %vm1112_vm7 = vweird.f32 %v6130_v19  ;;  %v1344_v52 = vor.u32 1.1754944e-38, %v1343_v9  ;;  %v1119_v37 = vor.u32 1.1754944e-38, %v1118_v60 }
 0x123   : > { %v725_v8 = vadd.f32 %v724_v22, %v5951_v35  ;;  %1560 = vperm.xlu0 %5368, %v6183_v58   ;;  %v1110_v26 = vmul.f32 %v5454_v18, %v1109_v34  ;;  %vm1114_vm8 = vmor %vm1112_vm7, %vm1113_vm4  ;;  %v1360_v28 = vsel %vm6178_vm2, %v1359_v41, %v1355_v59  ;;  %v1340_v13 = vsel %vm6201_vm5, %v6099_v20, %v1336_v45  ;;  %v1412_v20 = vld [vmem:[%s7614_s1 + $0x18] sm:$0xff] }
 0x124   : > { %vm1117_vm9 = vcmp.eq.f32.partialorder %v1116_v23, 8.507059e+37  ;;  %v1320_v1 = vmul.f32 %v6083_v39, %v1319_v4  ;;  %v6228_v63 = vpack.c.bf16 %v1360_v28, %v1360_v28  ;;  %v1345_v3 = vsel %vm6210_vm6, %v1344_v52, %v1340_v13 }
 0x125   : > { %v5456_v48 = vpop.eup %5455  ;;  %v4710_v17 = vmul.f32 -1.442695, %v725_v8  ;;  %v1111_v36 = vadd.f32 %v5454_v18, %v1110_v26  ;;  %v1133_v9 = vand.u32 2147483648, %v6163_v46  ;;  %vm1322_vm10 = vweird.f32 %v6058_v62 }
 0x126   : > { %v5458_v43 = vpop.eup %5457  ;;  %v6216_v47 = vadd.f32 1.0, %v5456_v48  ;;  %vm1323_vm11 = vweird.f32 %v6083_v39  ;;  %v1131_v59 = vand.u32 2147483647, %v6163_v46  ;;  %v6244_v41 = vpack.c.bf16 %v1345_v3, %v1345_v3 }
 0x127   : > { %5459 = vpow2.f32 %v4710_v17  ;;  %v1115_v11 = vsel %vm1114_vm8, %v5454_v18, %v1111_v36  ;;  %v1123_v42 = vmul.f32 %v5458_v43, %v6163_v46  ;;  %v6235_v18 = vpack.c.bf16 %v1375_v55, %v1375_v55  ;;  %vm6254_vm0 = vmor %vm1322_vm10, %vm1323_vm11 }
 0x128   : > { %5461 = vrcp.f32 %v6216_v47  ;;  %v1120_v19 = vsel %vm1117_vm9, %v1119_v37, %v1115_v11  ;;  %vm1128_vm12 = vweird.f32 %v5458_v43  ;;  %v1321_v45 = vadd.f32 %v6083_v39, %v1320_v1 }
 0x129   : > { %v6226_v61 = vpack.c.bf16 %v1120_v19, %v1120_v19  ;;  %v1124_v34 = vsub.f32 1.0, %v1123_v42  ;;  %v1326_v8 = vand.u32 2147483647, %v6058_v62  ;;  %v1328_v26 = vand.u32 2147483648, %v6058_v62 }
 0x12a   : > { %v727_v7 = vpop.f32.mrf.mxu0  ;;  %v1735_v55 = vunpack.c.l.bf16 %v1412_v20  ;;  %vm1127_vm13 = vweird.f32 %v6163_v46  ;;  %v1736_v36 = vunpack.c.h.bf16 %v1412_v20  ;;  %v1134_v37 = vor.u32 1.1754944e-38, %v1133_v9 }
 0x12b   : > { %v728_v22 = vadd.f32 %v727_v7, %v5945_v29  ;;  %1569 = vperm.xlu1 %5369, %v6226_v61   ;;  %1713 = vperm.xlu0 %5368, %v6228_v63   ;;  %v1125_v60 = vmul.f32 %v5458_v43, %v1124_v34  ;;  %vm1129_vm14 = vmor %vm1127_vm13, %vm1128_vm12  ;;  %vm1132_vm15 = vcmp.eq.f32.partialorder %v1131_v59, 8.507059e+37  ;;  %v1329_v11 = vor.u32 1.1754944e-38, %v1328_v26 }
 0x12c   : > { %v1325_v1 = vsel %vm6254_vm0, %v6083_v39, %v1321_v45  ;;  %vm1327_vm1 = vcmp.eq.f32.partialorder %v1326_v8, 8.507059e+37  ;;  %v1148_v20 = vand.u32 2147483648, %v6216_v47  ;;  %v1146_v39 = vand.u32 2147483647, %v6216_v47 }
 0x12d   : > { %v5460_v23 = vpop.eup %5459  ;;  %v4711_v27 = vmul.f32 -1.442695, %v728_v22  ;;  %v1471_v29 = vpop.permute.xlu2 %1470  ;;  %v1126_v35 = vadd.f32 %v5458_v43, %v1125_v60  ;;  %v1330_v59 = vsel %vm1327_vm1, %v1329_v11, %v1325_v1  ;;  %vm1142_vm3 = vweird.f32 %v6216_v47  ;;  %v1411_v1 = vld [vmem:[%s7614_s1 + $0x10] sm:$0xff] }
 0x12e   : > { %v5462_v48 = vpop.eup %5461  ;;  %v6258_v17 = vadd.f32 1.0, %v5460_v23  ;;  %v1476_v52 = vperm.slane %v1471_v29, %v6116_v12  ;;  %v1149_v4 = vor.u32 1.1754944e-38, %v1148_v20  ;;  %vm1147_vm5 = vcmp.eq.f32.partialorder %v1146_v39, 8.507059e+37 }
 0x12f   : > { %5463 = vpow2.f32 %v4711_v27  ;;  %v1130_v28 = vsel %vm1129_vm14, %v5458_v43, %v1126_v35  ;;  %v1138_v46 = vmul.f32 %v5462_v48, %v6216_v47  ;;  %v1410_v43 = vld [vmem:[%s7614_s1 + $0x8] sm:$0xff]  ;;  %vm1143_vm2 = vweird.f32 %v5462_v48 }
 0x130   : > { %5465 = vrcp.f32 %v6258_v17  ;;  %v1796_v62 = vunpack.c.l.bf16 %v1476_v52  ;;  %v1135_v13 = vsel %vm1132_vm15, %v1134_v37, %v1130_v28  ;;  %v1731_v26 = vunpack.c.l.bf16 %v1410_v43  ;;  %vm1144_vm4 = vmor %vm1142_vm3, %vm1143_vm2 }
 0x131   : > { %v6264_v42 = vpack.c.bf16 %v1135_v13, %v1135_v13  ;;  %v1139_v19 = vsub.f32 1.0, %v1138_v46  ;;  %v1732_v29 = vunpack.c.h.bf16 %v1410_v43  ;;  %v752_v43 = vadd.f32 %v5910_v49, %v6021_v21 }
 0x132   : > { %v1831_v3 = vmul.f32 %v1796_v62, %v1735_v55  ;;  %v1832_v34 = vmul.f32 %v1796_v62, %v1736_v36  ;;  %v730_v7 = vpop.f32.mrf.mxu0  ;;  %v1733_v39 = vunpack.c.l.bf16 %v1411_v1  ;;  %vm1157_vm7 = vweird.f32 %v6258_v17 }
 0x133   : > { %v731_v9 = vadd.f32 %v730_v7, %v5934_v14  ;;  %1722 = vperm.xlu1 %5369, %v6235_v18   ;;  %1704 = vperm.xlu0 %5368, %v6244_v41   ;;  %v1140_v22 = vmul.f32 %v5462_v48, %v1139_v19  ;;  %v6287_v19 = vpack.c.bf16 %v1330_v59, %v1330_v59  ;;  %v1161_v7 = vand.u32 2147483647, %v6258_v17 }
 0x134   : > { %v1892_v60 = vpack.c.bf16 %v1832_v34, %v1831_v3  ;;  %1578 = vperm.xlu2 %5370, %v6264_v42  }
 0x135   : > { %v5464_v45 = vpop.eup %5463  ;;  %v4712_v8 = vmul.f32 -1.442695, %v731_v9  ;;  %v1453_v23 = vpop.permute.xlu0 %1452  ;;  %v1141_v27 = vadd.f32 %v5462_v48, %v1140_v22  ;;  %vm1162_vm9 = vcmp.eq.f32.partialorder %v1161_v7, 8.507059e+37 }
 0x136   : > { %v5466_v14 = vpop.eup %5465  ;;  %v6279_v55 = vadd.f32 1.0, %v5464_v45  ;;  %1924 = vst [vmem:[#allocation2 + $0x30] sm:$0xff] %v1892_v60  ;;  %v1458_v35 = vperm.slane %v1453_v23, %v6116_v12 }
 0x137   : > { %5467 = vpow2.f32 %v4712_v8  ;;  %v1145_v36 = vsel %vm1144_vm4, %v5462_v48, %v1141_v27  ;;  %v1153_v52 = vmul.f32 %v5466_v14, %v6258_v17  ;;  %v1163_v48 = vand.u32 2147483648, %v6258_v17 }
 0x138   : > { %5469 = vrcp.f32 %v6279_v55  ;;  %v1794_v37 = vunpack.c.l.bf16 %v1458_v35  ;;  %v1150_v28 = vsel %vm1147_vm5, %v1149_v4, %v1145_v36  ;;  %vm1158_vm6 = vweird.f32 %v5466_v14 }
 0x139   : > { %v6285_v47 = vpack.c.bf16 %v1150_v28, %v1150_v28  ;;  %v1154_v46 = vsub.f32 1.0, %v1153_v52  ;;  %v1734_v8 = vunpack.c.h.bf16 %v1411_v1  ;;  %vm1159_vm8 = vmor %vm1157_vm7, %vm1158_vm6  ;;  %v1164_v49 = vor.u32 1.1754944e-38, %v1163_v48  ;;  %v1415_v28 = vld [vmem:[%s7614_s1 + $0x30] sm:$0xff] }
 0x13a   : > { %v1827_v62 = vmul.f32 %v1794_v37, %v1731_v26  ;;  %v1828_v13 = vmul.f32 %v1794_v37, %v1732_v29  ;;  %v733_v11 = vpop.f32.mrf.mxu0  ;;  %v4719_v27 = vmul.f32 -1.442695, %v752_v43  ;;  %vm1172_vm11 = vweird.f32 %v6279_v55 }
 0x13b   : > { %v734_v3 = vadd.f32 %v733_v11, %v5978_v2  ;;  %1587 = vperm.xlu0 %5368, %v6285_v47   ;;  %v1155_v34 = vmul.f32 %v5466_v14, %v1154_v46 }
 0x13c   : > { %v1890_v20 = vpack.c.bf16 %v1828_v13, %v1827_v62  ;;  %1695 = vperm.xlu2 %5370, %v6287_v19   ;;  %v1176_v13 = vand.u32 2147483647, %v6279_v55 }
 0x13d   : > { %v5468_v9 = vpop.eup %5467  ;;  %v4713_v22 = vmul.f32 -1.442695, %v734_v3  ;;  %v1462_v60 = vpop.permute.xlu1 %1461  ;;  %v1156_v59 = vadd.f32 %v5466_v14, %v1155_v34  ;;  %v1741_v3 = vunpack.c.l.bf16 %v1415_v28 }
 0x13e   : > { %v5470_v2 = vpop.eup %5469  ;;  %v6300_v45 = vadd.f32 1.0, %v5468_v9  ;;  %1922 = vst [vmem:[#allocation2 + $0x10] sm:$0xff] %v1890_v20  ;;  %v1467_v26 = vperm.slane %v1462_v60, %v6116_v12  ;;  %vm1177_vm13 = vcmp.eq.f32.partialorder %v1176_v13, 8.507059e+37 }
 0x13f   : > { %5471 = vpow2.f32 %v4713_v22  ;;  %v1160_v21 = vsel %vm1159_vm8, %v5466_v14, %v1156_v59  ;;  %v1168_v23 = vmul.f32 %v5470_v2, %v6279_v55  ;;  %v1178_v14 = vand.u32 2147483648, %v6279_v55 }
 0x140   : > { %5473 = vrcp.f32 %v6300_v45  ;;  %v1795_v29 = vunpack.c.l.bf16 %v1467_v26  ;;  %v1165_v17 = vsel %vm1162_vm9, %v1164_v49, %v1160_v21  ;;  %vm1173_vm10 = vweird.f32 %v5470_v2 }
 0x141   : > { %v6306_v35 = vpack.c.bf16 %v1165_v17, %v1165_v17  ;;  %v1169_v4 = vsub.f32 1.0, %v1168_v23  ;;  %5475 = vpow2.f32 %v4719_v27  ;;  %vm1174_vm12 = vmor %vm1172_vm11, %vm1173_vm10  ;;  %v1179_v22 = vor.u32 1.1754944e-38, %v1178_v14 }
 0x142   : > { %v1829_v36 = vmul.f32 %v1795_v29, %v1733_v39  ;;  %v1830_v52 = vmul.f32 %v1795_v29, %v1734_v8  ;;  %v736_v37 = vpop.f32.mrf.mxu0  ;;  %v755_v59 = vadd.f32 %v5936_v15, %v6014_v0  ;;  %v1193_v17 = vand.u32 2147483648, %v6300_v45 }
 0x143   : > { %v737_v46 = vadd.f32 %v736_v37, %v5967_v56  ;;  %1596 = vperm.xlu1 %5369, %v6306_v35   ;;  %v1170_v62 = vmul.f32 %v5470_v2, %v1169_v4  ;;  %v1742_v56 = vunpack.c.h.bf16 %v1415_v28  ;;  %v1191_v0 = vand.u32 2147483647, %v6300_v45 }
 0x144   : > { %v1891_v11 = vpack.c.bf16 %v1830_v52, %v1829_v36  ;;  %v4720_v36 = vmul.f32 -1.442695, %v755_v59  ;;  %vm1187_vm14 = vweird.f32 %v6300_v45 }
 0x145   : > { %v5472_v1 = vpop.eup %5471  ;;  %v4714_v48 = vmul.f32 -1.442695, %v737_v46  ;;  %v1498_v34 = vpop.permute.xlu2 %1497  ;;  %v1171_v7 = vadd.f32 %v5470_v2, %v1170_v62  ;;  %vm1192_vm1 = vcmp.eq.f32.partialorder %v1191_v0, 8.507059e+37 }
 0x146   : > { %v5474_v43 = vpop.eup %5473  ;;  %v6316_v20 = vadd.f32 1.0, %v5472_v1  ;;  %1923 = vst [vmem:[#allocation2 + $0x20] sm:$0xff] %v1891_v11  ;;  %v1503_v9 = vperm.slane %v1498_v34, %v6116_v12 }
 0x147   : > { %5477 = vpow2.f32 %v4714_v48  ;;  %v1175_v39 = vsel %vm1174_vm12, %v5470_v2, %v1171_v7  ;;  %v1183_v60 = vmul.f32 %v5474_v43, %v6300_v45  ;;  %v5476_v21 = vpop.eup %5475  ;;  %v1413_v2 = vld [vmem:[%s7614_s1 + $0x20] sm:$0xff]  ;;  %vm1188_vm0 = vweird.f32 %v5474_v43 }
 0x148   : > { %5479 = vrcp.f32 %v6316_v20  ;;  %v1799_v55 = vunpack.c.l.bf16 %v1503_v9  ;;  %v1180_v8 = vsel %vm1177_vm13, %v1179_v22, %v1175_v39  ;;  %v1737_v14 = vunpack.c.l.bf16 %v1413_v2  ;;  %vm1189_vm15 = vmor %vm1187_vm14, %vm1188_vm0 }
 0x149   : > { %v6324_v26 = vpack.c.bf16 %v1180_v8, %v1180_v8  ;;  %v1184_v49 = vsub.f32 1.0, %v1183_v60  ;;  %v1194_v48 = vor.u32 1.1754944e-38, %v1193_v17  ;;  %v6339_v7 = vadd.f32 1.0, %v5476_v21 }
 0x14a   : > { %v1837_v23 = vmul.f32 %v1799_v55, %v1741_v3  ;;  %v1838_v27 = vmul.f32 %v1799_v55, %v1742_v56  ;;  %v739_v29 = vpop.f32.mrf.mxu0  ;;  %v1208_v55 = vand.u32 2147483648, %v6316_v20  ;;  %v1206_v21 = vand.u32 2147483647, %v6316_v20 }
 0x14b   : > { %v740_v4 = vadd.f32 %v739_v29, %v5960_v44  ;;  %1605 = vperm.xlu2 %5370, %v6324_v26   ;;  %v1185_v15 = vmul.f32 %v5474_v43, %v1184_v49  ;;  %v1738_v44 = vunpack.c.h.bf16 %v1413_v2  ;;  %vm1202_vm3 = vweird.f32 %v6316_v20 }
 0x14c   : > { %v1895_v52 = vpack.c.bf16 %v1838_v27, %v1837_v23  ;;  %vm1207_vm5 = vcmp.eq.f32.partialorder %v1206_v21, 8.507059e+37  ;;  %vm1292_vm0 = vweird.f32 %v6339_v7 }
 0x14d   : > { %v5478_v37 = vpop.eup %5477  ;;  %v4715_v28 = vmul.f32 -1.442695, %v740_v4  ;;  %v1480_v46 = vpop.permute.xlu0 %1479  ;;  %v1186_v62 = vadd.f32 %v5474_v43, %v1185_v15 }
 0x14e   : > { %v5480_v13 = vpop.eup %5479  ;;  %v6334_v11 = vadd.f32 1.0, %v5478_v37  ;;  %1927 = vst [vmem:[#allocation2 + $0x60] sm:$0xff] %v1895_v52  ;;  %v1485_v1 = vperm.slane %v1480_v46, %v6116_v12  ;;  %v1209_v52 = vor.u32 1.1754944e-38, %v1208_v55 }
 0x14f   : > { %5481 = vpow2.f32 %v4715_v28  ;;  %v1190_v3 = vsel %vm1189_vm15, %v5474_v43, %v1186_v62  ;;  %v1198_v34 = vmul.f32 %v5480_v13, %v6316_v20  ;;  %v1414_v43 = vld [vmem:[%s7614_s1 + $0x28] sm:$0xff]  ;;  %vm1203_vm2 = vweird.f32 %v5480_v13 }
 0x150   : > { %5483 = vrcp.f32 %v6334_v11  ;;  %v1797_v45 = vunpack.c.l.bf16 %v1485_v1  ;;  %v1195_v56 = vsel %vm1192_vm1, %v1194_v48, %v1190_v3  ;;  %v1739_v2 = vunpack.c.l.bf16 %v1414_v43  ;;  %vm1204_vm4 = vmor %vm1202_vm3, %vm1203_vm2 }
 0x151   : > { %v6342_v9 = vpack.c.bf16 %v1195_v56, %v1195_v56  ;;  %v1199_v22 = vsub.f32 1.0, %v1198_v34  ;;  %5485 = vpow2.f32 %v4720_v36  ;;  %vm1217_vm7 = vweird.f32 %v6334_v11 }
 0x152   : > { %v1833_v39 = vmul.f32 %v1797_v45, %v1737_v14  ;;  %v1834_v60 = vmul.f32 %v1797_v45, %v1738_v44  ;;  %v742_v59 = vpop.f32.mrf.mxu0  ;;  %5487 = vrcp.f32 %v6339_v7  ;;  %v1223_v45 = vand.u32 2147483648, %v6334_v11 }
 0x153   : > { %v743_v8 = vadd.f32 %v742_v59, %v5999_v40  ;;  %1614 = vperm.xlu0 %5368, %v6342_v9   ;;  %v1200_v49 = vmul.f32 %v5480_v13, %v1199_v22  ;;  %v1740_v40 = vunpack.c.h.bf16 %v1414_v43 }
 0x154   : > { %v1893_v23 = vpack.c.bf16 %v1834_v60, %v1833_v39  ;;  %v1221_v39 = vand.u32 2147483647, %v6334_v11 }
 0x155   : > { %v5482_v27 = vpop.eup %5481  ;;  %v4716_v29 = vmul.f32 -1.442695, %v743_v8  ;;  %v1489_v17 = vpop.permute.xlu1 %1488  ;;  %v1201_v4 = vadd.f32 %v5480_v13, %v1200_v49 }
 0x156   : > { %v5484_v15 = vpop.eup %5483  ;;  %v6353_v0 = vadd.f32 1.0, %v5482_v27  ;;  %1925 = vst [vmem:[#allocation2 + $0x40] sm:$0xff] %v1893_v23  ;;  %v1494_v36 = vperm.slane %v1489_v17, %v6116_v12  ;;  %vm1222_vm9 = vcmp.eq.f32.partialorder %v1221_v39, 8.507059e+37 }
 0x157   : > { %5489 = vpow2.f32 %v4716_v29  ;;  %v1205_v37 = vsel %vm1204_vm4, %v5480_v13, %v1201_v4  ;;  %v1213_v28 = vmul.f32 %v5484_v15, %v6334_v11  ;;  %v5486_v14 = vpop.eup %5485  ;;  %v1418_v13 = vld [vmem:[%s7614_s1 + $0x48] sm:$0xff]  ;;  %vm1218_vm6 = vweird.f32 %v5484_v15 }
 0x158   : > { %5491 = vrcp.f32 %v6353_v0  ;;  %v1798_v46 = vunpack.c.l.bf16 %v1494_v36  ;;  %v1210_v20 = vsel %vm1207_vm5, %v1209_v52, %v1205_v37  ;;  %v6361_v1 = vpop.eup %5487  ;;  %v6370_v60 = vadd.f32 1.0, %v5486_v14  ;;  %vm1219_vm8 = vmor %vm1217_vm7, %vm1218_vm6 }
 0x159   : > { %v6359_v62 = vpack.c.bf16 %v1210_v20, %v1210_v20  ;;  %v1214_v44 = vsub.f32 1.0, %v1213_v28  ;;  %v1747_v8 = vunpack.c.l.bf16 %v1418_v13  ;;  %v1288_v11 = vmul.f32 %v6361_v1, %v6339_v7 }
 0x15a   : > { %v1835_v48 = vmul.f32 %v1798_v46, %v1739_v2  ;;  %v1836_v3 = vmul.f32 %v1798_v46, %v1740_v40  ;;  %v745_v34 = vpop.f32.mrf.mxu0  ;;  %v1224_v2 = vor.u32 1.1754944e-38, %v1223_v45  ;;  %v1238_v20 = vand.u32 2147483648, %v6353_v0 }
 0x15b   : > { %v746_v56 = vadd.f32 %v745_v34, %v5994_v30  ;;  %1623 = vperm.xlu1 %5369, %v6359_v62   ;;  %v1215_v22 = vmul.f32 %v5484_v15, %v1214_v44  ;;  %v1748_v30 = vunpack.c.h.bf16 %v1418_v13  ;;  %v1289_v13 = vsub.f32 1.0, %v1288_v11 }
 0x15c   : > { %v1894_v59 = vpack.c.bf16 %v1836_v3, %v1835_v48  ;;  %v1236_v3 = vand.u32 2147483647, %v6353_v0  ;;  %vm1232_vm11 = vweird.f32 %v6353_v0  ;;  %vm1293_vm15 = vweird.f32 %v6361_v1 }
 0x15d   : > { %v5490_v43 = vpop.eup %5489  ;;  %v4717_v55 = vmul.f32 -1.442695, %v746_v56  ;;  %v1525_v49 = vpop.permute.xlu2 %1524  ;;  %v1216_v21 = vadd.f32 %v5484_v15, %v1215_v22  ;;  %vm6425_vm4 = vmor %vm1292_vm0, %vm1293_vm15  ;;  %vm1307_vm7 = vweird.f32 %v6370_v60 }
 0x15e   : > { %v5492_v23 = vpop.eup %5491  ;;  %v6373_v27 = vadd.f32 1.0, %v5490_v43  ;;  %1926 = vst [vmem:[#allocation2 + $0x50] sm:$0xff] %v1894_v59  ;;  %v1530_v29 = vperm.slane %v1525_v49, %v6116_v12  ;;  %v1239_v49 = vor.u32 1.1754944e-38, %v1238_v20  ;;  %vm1237_vm13 = vcmp.eq.f32.partialorder %v1236_v3, 8.507059e+37 }
 0x15f   : > { %5493 = vpow2.f32 %v4717_v55  ;;  %v1220_v17 = vsel %vm1219_vm8, %v5484_v15, %v1216_v21  ;;  %v1228_v4 = vmul.f32 %v5492_v23, %v6353_v0  ;;  %v1416_v15 = vld [vmem:[%s7614_s1 + $0x38] sm:$0xff]  ;;  %vm1233_vm10 = vweird.f32 %v5492_v23 }
 0x160   : > { %5495 = vrcp.f32 %v6373_v27  ;;  %v1802_v40 = vunpack.c.l.bf16 %v1530_v29  ;;  %v1225_v36 = vsel %vm1222_vm9, %v1224_v2, %v1220_v17  ;;  %v1743_v22 = vunpack.c.l.bf16 %v1416_v15  ;;  %vm1234_vm12 = vmor %vm1232_vm11, %vm1233_vm10 }
 0x161   : > { %v6381_v52 = vpack.c.bf16 %v1225_v36, %v1225_v36  ;;  %v1229_v37 = vsub.f32 1.0, %v1228_v4  ;;  %5497 = vrcp.f32 %v6370_v60  ;;  %v1298_v20 = vand.u32 2147483648, %v6339_v7 }
 0x162   : > { %v1843_v28 = vmul.f32 %v1802_v40, %v1747_v8  ;;  %v1844_v14 = vmul.f32 %v1802_v40, %v1748_v30  ;;  %v748_v46 = vpop.f32.mrf.mxu0  ;;  %v1290_v40 = vmul.f32 %v6361_v1, %v1289_v13  ;;  %vm1247_vm1 = vweird.f32 %v6373_v27 }
 0x163   : > { %v749_v44 = vadd.f32 %v748_v46, %v5984_v16  ;;  %1632 = vperm.xlu2 %5370, %v6381_v52   ;;  %v1230_v48 = vmul.f32 %v5492_v23, %v1229_v37  ;;  %v1744_v16 = vunpack.c.h.bf16 %v1416_v15  ;;  %v1253_v37 = vand.u32 2147483648, %v6373_v27 }
 0x164   : > { %v1898_v34 = vpack.c.bf16 %v1844_v14, %v1843_v28  ;;  %v1251_v14 = vand.u32 2147483647, %v6373_v27  ;;  %v1296_v15 = vand.u32 2147483647, %v6339_v7 }
 0x165   : > { %v5494_v45 = vpop.eup %5493  ;;  %v4718_v56 = vmul.f32 -1.442695, %v749_v44  ;;  %v1507_v39 = vpop.permute.xlu0 %1506  ;;  %v1231_v59 = vadd.f32 %v5492_v23, %v1230_v48 }
 0x166   : > { %v5496_v43 = vpop.eup %5495  ;;  %v6392_v55 = vadd.f32 1.0, %v5494_v45  ;;  %1930 = vst [vmem:[#allocation2 + $0x90] sm:$0xff] %v1898_v34  ;;  %v1512_v8 = vperm.slane %v1507_v39, %v6116_v12  ;;  %v1291_v45 = vadd.f32 %v6361_v1, %v1290_v40  ;;  %vm1252_vm3 = vcmp.eq.f32.partialorder %v1251_v14, 8.507059e+37 }
 0x167   : > { %5499 = vpow2.f32 %v4718_v56  ;;  %v1235_v21 = vsel %vm1234_vm12, %v5492_v23, %v1231_v59  ;;  %v1243_v30 = vmul.f32 %v5496_v43, %v6373_v27  ;;  %v6397_v29 = vpop.eup %5497  ;;  %v1417_v23 = vld [vmem:[%s7614_s1 + $0x40] sm:$0xff]  ;;  %vm1248_vm14 = vweird.f32 %v5496_v43 }
 0x168   : > { %5501 = vrcp.f32 %v6392_v55  ;;  %v1800_v0 = vunpack.c.l.bf16 %v1512_v8  ;;  %v1240_v2 = vsel %vm1237_vm13, %v1239_v49, %v1235_v21  ;;  %v1303_v44 = vmul.f32 %v6397_v29, %v6370_v60  ;;  %vm1249_vm2 = vmor %vm1247_vm1, %vm1248_vm14 }
 0x169   : > { %v6400_v17 = vpack.c.bf16 %v1240_v2, %v1240_v2  ;;  %v1244_v4 = vsub.f32 1.0, %v1243_v30  ;;  %v1745_v3 = vunpack.c.l.bf16 %v1417_v23  ;;  %v1746_v39 = vunpack.c.h.bf16 %v1417_v23 }
 0x16a   : > { %v1839_v36 = vmul.f32 %v1800_v0, %v1743_v22  ;;  %v1840_v11 = vmul.f32 %v1800_v0, %v1744_v16  ;;  %v1254_v16 = vor.u32 1.1754944e-38, %v1253_v37  ;;  %v1304_v0 = vsub.f32 1.0, %v1303_v44  ;;  %v1421_v37 = vld [vmem:[%s7614_s1 + $0x60] sm:$0xff] }
 0x16b   : > { %1641 = vperm.xlu0 %5368, %v6400_v17   ;;  %v1245_v28 = vmul.f32 %v5496_v43, %v1244_v4  ;;  %vm6433_vm5 = vcmp.eq.f32.partialorder %v1296_v15, 8.507059e+37  ;;  %v1299_v4 = vor.u32 1.1754944e-38, %v1298_v20  ;;  %v1268_v23 = vand.u32 2147483648, %v6392_v55 }
 0x16c   : > { %v1896_v46 = vpack.c.bf16 %v1840_v11, %v1839_v36  ;;  %v1295_v11 = vsel %vm6425_vm4, %v6361_v1, %v1291_v45  ;;  %v1266_v14 = vand.u32 2147483647, %v6392_v55  ;;  %v1305_v15 = vmul.f32 %v6397_v29, %v1304_v0 }
 0x16d   : > { %v5500_v48 = vpop.eup %5499  ;;  %v1516_v34 = vpop.permute.xlu1 %1515  ;;  %v1246_v13 = vadd.f32 %v5496_v43, %v1245_v28  ;;  %v1300_v1 = vsel %vm6433_vm5, %v1299_v4, %v1295_v11  ;;  %vm1262_vm8 = vweird.f32 %v6392_v55  ;;  %vm1308_vm9 = vweird.f32 %v6397_v29 }
 0x16e   : > { %v5502_v56 = vpop.eup %5501  ;;  %v6417_v22 = vadd.f32 1.0, %v5500_v48  ;;  %1928 = vst [vmem:[#allocation2 + $0x70] sm:$0xff] %v1896_v46  ;;  %v1521_v59 = vperm.slane %v1516_v34, %v6116_v12  ;;  %v1754_v34 = vunpack.c.h.bf16 %v1421_v37  ;;  %v1269_v45 = vor.u32 1.1754944e-38, %v1268_v23  ;;  %vm6466_vm12 = vmor %vm1307_vm7, %vm1308_vm9 }
 0x16f   : > { %v1250_v8 = vsel %vm1249_vm2, %v5496_v43, %v1246_v13  ;;  %v1258_v49 = vmul.f32 %v5502_v56, %v6392_v55  ;;  %vm1263_vm6 = vweird.f32 %v5502_v56  ;;  %vm1267_vm11 = vcmp.eq.f32.partialorder %v1266_v14, 8.507059e+37 }
 0x170   : > { %5503 = vrcp.f32 %v6417_v22  ;;  %v1801_v21 = vunpack.c.l.bf16 %v1521_v59  ;;  %v1255_v30 = vsel %vm1252_vm3, %v1254_v16, %v1250_v8  ;;  %vm1264_vm10 = vmor %vm1262_vm8, %vm1263_vm6  ;;  %v1313_v16 = vand.u32 2147483648, %v6370_v60 }
 0x171   : > { %v6431_v2 = vpack.c.bf16 %v1255_v30, %v1255_v30  ;;  %v1259_v40 = vsub.f32 1.0, %v1258_v49  ;;  %v1306_v55 = vadd.f32 %v6397_v29, %v1305_v15  ;;  %v1311_v49 = vand.u32 2147483647, %v6370_v60 }
 0x172   : > { %v1841_v7 = vmul.f32 %v1801_v21, %v1745_v3  ;;  %v1842_v36 = vmul.f32 %v1801_v21, %v1746_v39  ;;  %v1753_v3 = vunpack.c.l.bf16 %v1421_v37  ;;  %v6458_v21 = vpack.c.bf16 %v1300_v1, %v1300_v1 }
 0x173   : > { %1650 = vperm.xlu1 %5369, %v6431_v2   ;;  %v1260_v28 = vmul.f32 %v5502_v56, %v1259_v40  ;;  %v1283_v40 = vand.u32 2147483648, %v6417_v22  ;;  %v1281_v60 = vand.u32 2147483647, %v6417_v22  ;;  %v1314_v11 = vor.u32 1.1754944e-38, %v1313_v16 }
 0x174   : > { %v1897_v46 = vpack.c.bf16 %v1842_v36, %v1841_v7  ;;  %v1419_v7 = vld [vmem:[%s7614_s1 + $0x50] sm:$0xff]  ;;  %v1310_v37 = vsel %vm6466_vm12, %v6397_v29, %v1306_v55  ;;  %vm1312_vm0 = vcmp.eq.f32.partialorder %v1311_v49, 8.507059e+37  ;;  %vm1277_vm14 = vweird.f32 %v6417_v22 }
 0x175   : > { %v1552_v20 = vpop.permute.xlu2 %1551  ;;  %v1261_v44 = vadd.f32 %v5502_v56, %v1260_v28  ;;  %v1750_v15 = vunpack.c.h.bf16 %v1419_v7  ;;  %v1284_v1 = vor.u32 1.1754944e-38, %v1283_v40  ;;  %vm1282_vm1 = vcmp.eq.f32.partialorder %v1281_v60, 8.507059e+37  ;;  %v1424_v40 = vld [vmem:[%s7614_s1 + $0x78] sm:$0xff] }
 0x176   : > { %v5504_v48 = vpop.eup %5503  ;;  %1929 = vst [vmem:[#allocation2 + $0x80] sm:$0xff] %v1897_v46  ;;  %v1557_v13 = vperm.slane %v1552_v20, %v6116_v12  ;;  %v1749_v46 = vunpack.c.l.bf16 %v1419_v7  ;;  %v5575_v16 = vmov 1   ;;  %v1759_v7 = vunpack.c.l.bf16 %v1424_v40 }
 0x177   : > { %v1265_v39 = vsel %vm1264_vm10, %v5502_v56, %v1261_v44  ;;  %v1273_v59 = vmul.f32 %v5504_v48, %v6417_v22  ;;  %vm1278_vm13 = vweird.f32 %v5504_v48  ;;  %v1420_v22 = vld [vmem:[%s7614_s1 + $0x58] sm:$0xff] }
 0x178   : > { %v1805_v8 = vunpack.c.l.bf16 %v1557_v13  ;;  %v1270_v27 = vsel %vm1267_vm11, %v1269_v45, %v1265_v39  ;;  %vm1279_vm15 = vmor %vm1277_vm14, %vm1278_vm13  ;;  %v1752_v55 = vunpack.c.h.bf16 %v1420_v22 }
 0x179   : > { %v6460_v30 = vpack.c.bf16 %v1270_v27, %v1270_v27  ;;  %v1274_v0 = vsub.f32 1.0, %v1273_v59  ;;  %v1751_v27 = vunpack.c.l.bf16 %v1420_v22 }
 0x17a   : > { %v1849_v43 = vmul.f32 %v1805_v8, %v1753_v3  ;;  %v1850_v4 = vmul.f32 %v1805_v8, %v1754_v34  ;;  %v1315_v3 = vsel %vm1312_vm0, %v1314_v11, %v1310_v37 }
 0x17b   : > { %1677 = vperm.xlu1 %5369, %v6458_v21   ;;  %1659 = vperm.xlu2 %5370, %v6460_v30   ;;  %v1275_v36 = vmul.f32 %v5504_v48, %v1274_v0  ;;  %v6484_v59 = vpack.c.bf16 %v1315_v3, %v1315_v3 }
 0x17c   : > { %v1901_v23 = vpack.c.bf16 %v1850_v4, %v1849_v43 }
 0x17d   : > { %v1534_v28 = vpop.permute.xlu0 %1533  ;;  %v1276_v14 = vadd.f32 %v5504_v48, %v1275_v36  ;;  %v1760_v36 = vunpack.c.h.bf16 %v1424_v40 }
 0x17e   : > { %1933 = vst [vmem:[#allocation2 + $0xc0] sm:$0xff] %v1901_v23  ;;  %v1539_v20 = vperm.slane %v1534_v28, %v6116_v12 }
 0x17f   : > { %v1280_v44 = vsel %vm1279_vm15, %v5504_v48, %v1276_v14 }
 0x180   : > { %v1803_v34 = vunpack.c.l.bf16 %v1539_v20  ;;  %v1285_v13 = vsel %vm1282_vm1, %v1284_v1, %v1280_v44 }
 0x181   : > { %v6482_v45 = vpack.c.bf16 %v1285_v13, %v1285_v13 }
 0x182   : > { %v1845_v29 = vmul.f32 %v1803_v34, %v1749_v46  ;;  %v1846_v39 = vmul.f32 %v1803_v34, %v1750_v15 }
 0x183   : > { %5371 = vset.pattern.permute.xlu1 %v5575_v16  ;;  %1668 = vperm.xlu0 %5368, %v6482_v45  }
 0x184   : > { %v1899_v8 = vpack.c.bf16 %v1846_v39, %v1845_v29  ;;  %1686 = vperm.xlu2 %5370, %v6484_v59   ;;  %1987 = vperm.xlu1 %5371, %v5912_v50  }
 0x185   : > { %v1543_v48 = vpop.permute.xlu1 %1542 }
 0x186   : > { %1931 = vst [vmem:[#allocation2 + $0xa0] sm:$0xff] %v1899_v8  ;;  %v1548_v49 = vperm.slane %v1543_v48, %v6116_v12 }
 0x188   : > { %v1804_v0 = vunpack.c.l.bf16 %v1548_v49 }
 0x18a   : > { %v1847_v56 = vmul.f32 %v1804_v0, %v1751_v27  ;;  %v1848_v43 = vmul.f32 %v1804_v0, %v1752_v55 }
 0x18b   : > { %5373 = vset.pattern.permute.xlu0 %v5575_v16 }
 0x18c   : > { %v1900_v4 = vpack.c.bf16 %v1848_v43, %v1847_v56  ;;  %5372 = vset.pattern.permute.xlu2 %v5575_v16  ;;  %2003 = vperm.xlu0 %5373, %v5949_v32   ;;  %v1422_v32 = vld [vmem:[%s7614_s1 + $0x68] sm:$0xff]  ;;  %v1439_v16 = vld [vmem:[%s7614_s1 + $0xf0] sm:$0xff] }
 0x18d   : > { %2011 = vperm.xlu1 %5371, %v5969_v57   ;;  %1995 = vperm.xlu2 %5372, %v5928_v6   ;;  %v1437_v57 = vld [vmem:[%s7614_s1 + $0xe0] sm:$0xff]  ;;  %v1755_v14 = vunpack.c.l.bf16 %v1422_v32  ;;  %v1756_v46 = vunpack.c.h.bf16 %v1422_v32  ;;  %v1789_v56 = vunpack.c.l.bf16 %v1439_v16  ;;  %v1790_v43 = vunpack.c.h.bf16 %v1439_v16 }
 0x18e   : > { %1932 = vst [vmem:[#allocation2 + $0xb0] sm:$0xff] %v1900_v4  ;;  %v1579_v50 = vpop.permute.xlu2 %1578  ;;  %v1785_v1 = vunpack.c.l.bf16 %v1437_v57  ;;  %v1786_v44 = vunpack.c.h.bf16 %v1437_v57  ;;  %v1425_v16 = vld [vmem:[%s7614_s1 + $0x80] sm:$0xff] }
 0x18f   : > { %v1584_v60 = vperm.slane %v1579_v50, %v6116_v12 }
 0x191   : > { %v1808_v11 = vunpack.c.l.bf16 %v1584_v60  ;;  %v1438_v60 = vld [vmem:[%s7614_s1 + $0xe8] sm:$0xff] }
 0x193   : > { %v1855_v23 = vmul.f32 %v1808_v11, %v1759_v7  ;;  %v1856_v37 = vmul.f32 %v1808_v11, %v1760_v36 }
 0x194   : > { %2043 = vperm.xlu0 %5373, %v6036_v10  }
 0x195   : > { %v1904_v6 = vpack.c.bf16 %v1856_v37, %v1855_v23  ;;  %2027 = vperm.xlu1 %5371, %v6005_v54   ;;  %2019 = vperm.xlu2 %5372, %v5989_v24   ;;  %v1561_v28 = vpop.permute.xlu0 %1560  ;;  %v1423_v54 = vld [vmem:[%s7614_s1 + $0x70] sm:$0xff] }
 0x196   : > { %v1566_v15 = vperm.slane %v1561_v28, %v6116_v12  ;;  %v1696_v20 = vpop.permute.xlu2 %1695  ;;  %v1757_v48 = vunpack.c.l.bf16 %v1423_v54  ;;  %v1758_v27 = vunpack.c.h.bf16 %v1423_v54  ;;  %v1427_v37 = vld [vmem:[%s7614_s1 + $0x90] sm:$0xff] }
 0x197   : > { %1936 = vst [vmem:[#allocation2 + $0xf0] sm:$0xff] %v1904_v6  ;;  %v1701_v10 = vperm.slane %v1696_v20, %v6116_v12 }
 0x198   : > { %v1806_v3 = vunpack.c.l.bf16 %v1566_v15  ;;  %v1788_v15 = vunpack.c.h.bf16 %v1438_v60 }
 0x199   : > { %v1821_v34 = vunpack.c.l.bf16 %v1701_v10 }
 0x19a   : > { %v1851_v13 = vmul.f32 %v1806_v3, %v1755_v14  ;;  %v1852_v29 = vmul.f32 %v1806_v3, %v1756_v46  ;;  %v1787_v46 = vunpack.c.l.bf16 %v1438_v60  ;;  %v4903_v60 = vld [vmem:[#allocation2 + $0xa0] sm:$0xf] }
 0x19b   : > { %v1881_v24 = vmul.f32 %v1821_v34, %v1785_v1  ;;  %v1882_v39 = vmul.f32 %v1821_v34, %v1786_v44  ;;  %v1765_v1 = vunpack.c.l.bf16 %v1427_v37  ;;  %v1766_v44 = vunpack.c.h.bf16 %v1427_v37 }
 0x19c   : > { %v1902_v22 = vpack.c.bf16 %v1852_v29, %v1851_v13  ;;  %2067 = vperm.xlu0 %5373, %v6081_v38  }
 0x19d   : > { %v1917_v8 = vpack.c.bf16 %v1882_v39, %v1881_v24  ;;  %2051 = vperm.xlu1 %5371, %v6048_v33   ;;  %2035 = vperm.xlu2 %5372, %v6024_v25   ;;  %v1570_v55 = vpop.permute.xlu1 %1569  ;;  %v1714_v49 = vpop.permute.xlu0 %1713  ;;  %v1440_v25 = vld [vmem:[%s7614_s1 + $0xf8] sm:$0xff] }
 0x19e   : > { %1934 = vst [vmem:[#allocation2 + $0xd0] sm:$0xff] %v1902_v22  ;;  %v1575_v0 = vperm.slane %v1570_v55, %v6116_v12  ;;  %v1719_v4 = vperm.slane %v1714_v49, %v6116_v12  ;;  %v1791_v32 = vunpack.c.l.bf16 %v1440_v25  ;;  %v1792_v57 = vunpack.c.h.bf16 %v1440_v25  ;;  %v5258_v49 = vld [vmem:[#allocation2 + $0xec] sm:$0xf0] }
 0x19f   : > { %1949 = vst [vmem:[#allocation2 + $0x1c0] sm:$0xff] %v1917_v8 }
 0x1a0   : > { %v1807_v40 = vunpack.c.l.bf16 %v1575_v0  ;;  %v1823_v50 = vunpack.c.l.bf16 %v1719_v4  ;;  %v1761_v0 = vunpack.c.l.bf16 %v1425_v16 }
 0x1a2   : > { %v1853_v38 = vmul.f32 %v1807_v40, %v1757_v48  ;;  %v1854_v7 = vmul.f32 %v1807_v40, %v1758_v27  ;;  %v1885_v36 = vmul.f32 %v1823_v50, %v1789_v56  ;;  %v1886_v33 = vmul.f32 %v1823_v50, %v1790_v43 }
 0x1a3   : > { %v1762_v56 = vunpack.c.h.bf16 %v1425_v16 }
 0x1a4   : > { %v1903_v11 = vpack.c.bf16 %v1854_v7, %v1853_v38  ;;  %v1919_v23 = vpack.c.bf16 %v1886_v33, %v1885_v36  ;;  %2091 = vperm.xlu0 %5373, %v6183_v58   ;;  %v1426_v7 = vld [vmem:[%s7614_s1 + $0x88] sm:$0xff]  ;;  %v5250_v36 = vld [vmem:[#allocation2 + $0xac] sm:$0xf0] }
 0x1a5   : > { %2075 = vperm.xlu1 %5371, %v6106_v53   ;;  %2059 = vperm.xlu2 %5372, %v6063_v51   ;;  %v1723_v6 = vpop.permute.xlu1 %1722  ;;  %v1705_v28 = vpop.permute.xlu0 %1704  ;;  %v5254_v40 = vld [vmem:[#allocation2 + $0xcc] sm:$0xf0] }
 0x1a6   : > { %1935 = vst [vmem:[#allocation2 + $0xe0] sm:$0xff] %v1903_v11  ;;  %v1728_v14 = vperm.slane %v1723_v6, %v6116_v12  ;;  %v1710_v20 = vperm.slane %v1705_v28, %v6116_v12  ;;  %v1606_v58 = vpop.permute.xlu2 %1605  ;;  %v1763_v11 = vunpack.c.l.bf16 %v1426_v7 }
 0x1a7   : > { %1951 = vst [vmem:[#allocation2 + $0x1e0] sm:$0xff] %v1919_v23  ;;  %v1611_v10 = vperm.slane %v1606_v58, %v6116_v12  ;;  %v1764_v23 = vunpack.c.h.bf16 %v1426_v7  ;;  %v4871_v58 = vld [vmem:[#allocation2 + $0x60] sm:$0xf] }
 0x1a8   : > { %v1824_v53 = vunpack.c.l.bf16 %v1728_v14  ;;  %v1822_v3 = vunpack.c.l.bf16 %v1710_v20 }
 0x1a9   : > { %v1811_v51 = vunpack.c.l.bf16 %v1611_v10 }
 0x1aa   : > { %v1887_v34 = vmul.f32 %v1824_v53, %v1791_v32  ;;  %v1888_v13 = vmul.f32 %v1824_v53, %v1792_v57  ;;  %v1883_v29 = vmul.f32 %v1822_v3, %v1787_v46  ;;  %v1884_v54 = vmul.f32 %v1822_v3, %v1788_v15  ;;  %v4887_v57 = vld [vmem:[#allocation2 + $0x80] sm:$0xf]  ;;  %v5242_v46 = vld [vmem:[#allocation2 + $0x6c] sm:$0xf0] }
 0x1ab   : > { %v1861_v24 = vmul.f32 %v1811_v51, %v1765_v1  ;;  %v1862_v39 = vmul.f32 %v1811_v51, %v1766_v44  ;;  %v4904_v32 = vor.u32 %v5250_v36, %v4903_v60  ;;  %v5238_v53 = vld [vmem:[#allocation2 + $0x4c] sm:$0xf0]  ;;  %v4855_v51 = vld [vmem:[#allocation2 + $0x40] sm:$0xf] }
 0x1ac   : > { %v1920_v22 = vpack.c.bf16 %v1888_v13, %v1887_v34  ;;  %v1918_v8 = vpack.c.bf16 %v1884_v54, %v1883_v29  ;;  %2227 = vperm.xlu0 %5373, %v6228_v63   ;;  %v4919_v63 = vld [vmem:[#allocation2 + $0xc0] sm:$0xf]  ;;  %v1428_v13 = vld [vmem:[%s7614_s1 + $0x98] sm:$0xff] }
 0x1ad   : > { %v1907_v48 = vpack.c.bf16 %v1862_v39, %v1861_v24  ;;  %2099 = vperm.xlu1 %5371, %v6226_v61   ;;  %2083 = vperm.xlu2 %5372, %v6138_v31   ;;  %v1588_v27 = vpop.permute.xlu0 %1587  ;;  %v4935_v55 = vld [vmem:[#allocation2 + $0xe0] sm:$0xf]  ;;  %v4920_v31 = vor.u32 %v5254_v40, %v4919_v63  ;;  %v5234_v39 = vld [vmem:[#allocation2 + $0x2c] sm:$0xf0]  ;;  %v1767_v16 = vunpack.c.l.bf16 %v1428_v13 }
 0x1ae   : > { %1952 = vst [vmem:[#allocation2 + $0x1f0] sm:$0xff] %v1920_v22  ;;  %v1593_v43 = vperm.slane %v1588_v27, %v6116_v12  ;;  %v4936_v4 = vor.u32 %v5258_v49, %v4935_v55  ;;  %v4839_v29 = vld [vmem:[#allocation2 + $0x20] sm:$0xf]  ;;  %v1768_v22 = vunpack.c.h.bf16 %v1428_v13  ;;  %v5230_v27 = vld [vmem:[#allocation2 + $0xc] sm:$0xf0] }
 0x1af   : > { %1950 = vst [vmem:[#allocation2 + $0x1d0] sm:$0xff] %v1918_v8  ;;  %v1429_v40 = vld [vmem:[%s7614_s1 + $0xa0] sm:$0xff] }
 0x1b0   : > { %1939 = vst [vmem:[#allocation2 + $0x120] sm:$0xff] %v1907_v48  ;;  %v1809_v50 = vunpack.c.l.bf16 %v1593_v43  ;;  %2946 = vmatpush.bf16.msra.mxu1 %v4936_v4  ;;  %5298 = vmatpush.bf16.msra.mxu2 %v4936_v4  ;;  %v4840_v48 = vor.u32 %v5234_v39, %v4839_v29  ;;  %v4775_v43 = vld [vmem:[%s6578_s22 + $0x20] sm:$0xf]  ;;  %v1769_v60 = vunpack.c.l.bf16 %v1429_v40  ;;  %v4873_v29 = vld [vmem:[#allocation2 + $0x70] sm:$0xf0] }
 0x1b1   : > { %5299 = vmatpush.bf16.msrb.mxu3 %v4936_v4  ;;  %v5217_v4 = vld [vmem:[%s6578_s22 + $0x24] sm:$0xf0]  ;;  %v5240_v39 = vld [vmem:[#allocation2 + $0x64] sm:$0xf] }
 0x1b2   : > { %v1857_v61 = vmul.f32 %v1809_v50, %v1761_v0  ;;  %v1858_v38 = vmul.f32 %v1809_v50, %v1762_v56 }
 0x1b4   : > { %v1905_v33 = vpack.c.bf16 %v1858_v38, %v1857_v61  ;;  %2219 = vperm.xlu0 %5373, %v6244_v41   ;;  %2947 = vmatpush.bf16.msra.mxu1 %v4920_v31  ;;  %v5246_v41 = vld [vmem:[#allocation2 + $0x8c] sm:$0xf0]  ;;  %v5063_v61 = vld [vmem:[#allocation2 + $0x1e0] sm:$0xf]  ;;  %v4937_v38 = vld [vmem:[#allocation2 + $0xf0] sm:$0xf0] }
 0x1b5   : > { %2235 = vperm.xlu1 %5371, %v6235_v18   ;;  %2107 = vperm.xlu2 %5372, %v6264_v42   ;;  %v1597_v25 = vpop.permute.xlu1 %1596  ;;  %v4888_v18 = vor.u32 %v5246_v41, %v4887_v57  ;;  %v1430_v42 = vld [vmem:[%s7614_s1 + $0xa8] sm:$0xff]  ;;  %v5290_v56 = vld [vmem:[#allocation2 + $0x1ec] sm:$0xf0]  ;;  %v5065_v50 = vld [vmem:[#allocation2 + $0x1f0] sm:$0xf0] }
 0x1b6   : > { %1937 = vst [vmem:[#allocation2 + $0x100] sm:$0xff] %v1905_v33  ;;  %5300 = vmatpush.bf16.msra.mxu2 %v4920_v31  ;;  %5301 = vmatpush.bf16.msrb.mxu3 %v4920_v31  ;;  %v1602_v37 = vperm.slane %v1597_v25, %v6116_v12  ;;  %v1771_v1 = vunpack.c.l.bf16 %v1430_v42  ;;  %v1772_v44 = vunpack.c.h.bf16 %v1430_v42  ;;  %v5064_v7 = vor.u32 %v5290_v56, %v5063_v61  ;;  %v5288_v33 = vld [vmem:[#allocation2 + $0x1e4] sm:$0xf]  ;;  %v5047_v57 = vld [vmem:[#allocation2 + $0x1c0] sm:$0xf] }
 0x1b7   : > { %v6588_v25 = vor.u32 %v5217_v4, %v4775_v43  ;;  %v5236_v43 = vld [vmem:[#allocation2 + $0x44] sm:$0xf]  ;;  %v4807_v4 = vld [vmem:[%s6578_s22 + $0x60] sm:$0xf] }
 0x1b8   : > { %v1810_v6 = vunpack.c.l.bf16 %v1602_v37  ;;  %2948 = vmatpush.bf16.msra.mxu1 %v4904_v32  ;;  %v5286_v37 = vld [vmem:[#allocation2 + $0x1cc] sm:$0xf0] }
 0x1b9   : > { %v5048_v41 = vor.u32 %v5286_v37, %v5047_v57 }
 0x1ba   : > { %v1859_v28 = vmul.f32 %v1810_v6, %v1763_v11  ;;  %v1860_v14 = vmul.f32 %v1810_v6, %v1764_v23  ;;  %5302 = vmatpush.bf16.msra.mxu2 %v4904_v32  ;;  %5303 = vmatpush.bf16.msrb.mxu3 %v4904_v32  ;;  %v1770_v11 = vunpack.c.h.bf16 %v1429_v40  ;;  %v5068_v23 = vor.u32 %v5288_v33, %v5065_v50  ;;  %v4921_v32 = vld [vmem:[#allocation2 + $0xd0] sm:$0xf0]  ;;  %v5252_v6 = vld [vmem:[#allocation2 + $0xc4] sm:$0xf] }
 0x1bc   : > { %v1906_v15 = vpack.c.bf16 %v1860_v14, %v1859_v28  ;;  %2179 = vperm.xlu0 %5373, %v6460_v30   ;;  %2949 = vmatpush.bf16.msra.mxu1 %v4888_v18  ;;  %v4872_v30 = vor.u32 %v5242_v46, %v4871_v58  ;;  %v4924_v28 = vor.u32 %v5252_v6, %v4921_v32  ;;  %v5284_v14 = vld [vmem:[#allocation2 + $0x1c4] sm:$0xf] }
 0x1bd   : > { %2195 = vperm.xlu1 %5371, %v6458_v21   ;;  %2211 = vperm.xlu2 %5372, %v6287_v19   ;;  %v1633_v20 = vpop.permute.xlu2 %1632  ;;  %v4856_v19 = vor.u32 %v5238_v53, %v4855_v51  ;;  %v5244_v51 = vld [vmem:[#allocation2 + $0x84] sm:$0xf] }
 0x1be   : > { %1938 = vst [vmem:[#allocation2 + $0x110] sm:$0xff] %v1906_v15  ;;  %5304 = vmatpush.bf16.msra.mxu2 %v4888_v18  ;;  %5305 = vmatpush.bf16.msrb.mxu3 %v4888_v18  ;;  %v1638_v10 = vperm.slane %v1633_v20, %v6116_v12  ;;  %v4905_v15 = vld [vmem:[#allocation2 + $0xb0] sm:$0xf0]  ;;  %v1433_v20 = vld [vmem:[%s7614_s1 + $0xc0] sm:$0xff] }
 0x1bf   : > { %v1778_v53 = vunpack.c.h.bf16 %v1433_v20 }
 0x1c0   : > { %v1814_v3 = vunpack.c.l.bf16 %v1638_v10  ;;  %2950 = vmatpush.bf16.msra.mxu1 %v4872_v30 }
 0x1c2   : > { %v1867_v34 = vmul.f32 %v1814_v3, %v1771_v1  ;;  %v1868_v21 = vmul.f32 %v1814_v3, %v1772_v44  ;;  %5306 = vmatpush.bf16.msra.mxu2 %v4872_v30  ;;  %5307 = vmatpush.bf16.msrb.mxu3 %v4872_v30  ;;  %v5248_v1 = vld [vmem:[#allocation2 + $0xa4] sm:$0xf]  ;;  %v1777_v30 = vunpack.c.l.bf16 %v1433_v20 }
 0x1c3   : > { %v4908_v44 = vor.u32 %v5248_v1, %v4905_v15  ;;  %v5228_v15 = vld [vmem:[#allocation2 + $0x4] sm:$0xf] }
 0x1c4   : > { %v1910_v54 = vpack.c.bf16 %v1868_v21, %v1867_v34  ;;  %2171 = vperm.xlu0 %5373, %v6431_v2   ;;  %2951 = vmatpush.bf16.msra.mxu1 %v4856_v19  ;;  %v4889_v21 = vld [vmem:[#allocation2 + $0x90] sm:$0xf0] }
 0x1c5   : > { %2187 = vperm.xlu1 %5371, %v6482_v45   ;;  %2203 = vperm.xlu2 %5372, %v6484_v59   ;;  %v1615_v24 = vpop.permute.xlu0 %1614  ;;  %v4823_v45 = vld [vmem:[#allocation2] sm:$0xf]  ;;  %v5256_v59 = vld [vmem:[#allocation2 + $0xe4] sm:$0xf] }
 0x1c6   : > { %1942 = vst [vmem:[#allocation2 + $0x150] sm:$0xff] %v1910_v54  ;;  %5308 = vmatpush.bf16.msra.mxu2 %v4856_v19  ;;  %5309 = vmatpush.bf16.msrb.mxu3 %v4856_v19  ;;  %v1620_v8 = vperm.slane %v1615_v24, %v6116_v12  ;;  %v4824_v0 = vor.u32 %v5230_v27, %v4823_v45  ;;  %v5219_v54 = vld [vmem:[%s6578_s22 + $0x34] sm:$0xf0] }
 0x1c7   : > { %v4940_v36 = vor.u32 %v5256_v59, %v4937_v38  ;;  %v4892_v19 = vor.u32 %v5244_v51, %v4889_v21  ;;  %v1435_v51 = vld [vmem:[%s7614_s1 + $0xd0] sm:$0xff] }
 0x1c8   : > { %v1812_v2 = vunpack.c.l.bf16 %v1620_v8  ;;  %2952 = vmatpush.bf16.msra.mxu1 %v4840_v48  ;;  %v4876_v8 = vor.u32 %v5240_v39, %v4873_v29 }
 0x1ca   : > { %v1863_v55 = vmul.f32 %v1812_v2, %v1767_v16  ;;  %v1864_v49 = vmul.f32 %v1812_v2, %v1768_v22  ;;  %5310 = vmatpush.bf16.msra.mxu2 %v4840_v48  ;;  %5311 = vmatpush.bf16.msrb.mxu3 %v4840_v48  ;;  %v1436_v16 = vld [vmem:[%s7614_s1 + $0xd8] sm:$0xff] }
 0x1cc   : > { %v1908_v63 = vpack.c.bf16 %v1864_v49, %v1863_v55  ;;  %2131 = vperm.xlu0 %5373, %v6324_v26   ;;  %2953 = vmatpush.bf16.msra.mxu1 %v4824_v0  ;;  %v4857_v55 = vld [vmem:[#allocation2 + $0x50] sm:$0xf0]  ;;  %v1783_v49 = vunpack.c.l.bf16 %v1436_v16 }
 0x1cd   : > { %2147 = vperm.xlu1 %5371, %v6359_v62   ;;  %2163 = vperm.xlu2 %5372, %v6400_v17   ;;  %v1624_v31 = vpop.permute.xlu1 %1623  ;;  %v5049_v62 = vld [vmem:[#allocation2 + $0x1d0] sm:$0xf0]  ;;  %v4860_v50 = vor.u32 %v5236_v43, %v4857_v55 }
 0x1ce   : > { %1940 = vst [vmem:[#allocation2 + $0x130] sm:$0xff] %v1908_v63  ;;  %5312 = vmatpush.bf16.msra.mxu2 %v4824_v0  ;;  %5313 = vmatpush.bf16.msrb.mxu3 %v4824_v0  ;;  %v1629_v26 = vperm.slane %v1624_v31, %v6116_v12  ;;  %v5052_v46 = vor.u32 %v5284_v14, %v5049_v62  ;;  %v1784_v0 = vunpack.c.h.bf16 %v1436_v16  ;;  %v5225_v63 = vld [vmem:[%s6578_s22 + $0x64] sm:$0xf0]  ;;  %v5232_v31 = vld [vmem:[#allocation2 + $0x24] sm:$0xf] }
 0x1cf   : > { %v4726_v62 = vld [vmem:[%s7614_s1 + $0x108] sm:$0xff] }
 0x1d0   : > { %v1813_v17 = vunpack.c.l.bf16 %v1629_v26  ;;  %3093 = vmatpush.bf16.msrb.mxu1 %v5068_v23  ;;  %v4841_v26 = vld [vmem:[#allocation2 + $0x30] sm:$0xf0] }
 0x1d1   : > { %2964 = vmatmul.bf16.vlgmr.msra.gmra.mxu2 %v6588_v25  ;;  %v4844_v32 = vor.u32 %v5232_v31, %v4841_v26 }
 0x1d2   : > { %2995 = vmatpush.bf16.msrb.mxu2 %v5064_v7  ;;  %3044 = vmatpush.bf16.msra.mxu3 %v4940_v36  ;;  %v1865_v18 = vmul.f32 %v1813_v17, %v1769_v60  ;;  %v1866_v42 = vmul.f32 %v1813_v17, %v1770_v11  ;;  %v6617_v7 = vor.u32 %v5225_v63, %v4807_v4  ;;  %v1432_v60 = vld [vmem:[%s7614_s1 + $0xb8] sm:$0xff]  ;;  %v4731_v63 = vld [vmem:[%s7614_s1 + $0x130] sm:$0xff] }
 0x1d3   : > { %v1775_v17 = vunpack.c.l.bf16 %v1432_v60  ;;  %v1776_v57 = vunpack.c.h.bf16 %v1432_v60 }
 0x1d4   : > { %v1909_v58 = vpack.c.bf16 %v1866_v42, %v1865_v18  ;;  %3094 = vmatpush.bf16.msrb.mxu1 %v5052_v46  ;;  %2123 = vperm.xlu0 %5373, %v6306_v35   ;;  %v2244_v18 = vunpack.c.l.bf16 %v4726_v62  ;;  %v2245_v42 = vunpack.c.h.bf16 %v4726_v62  ;;  %v2255_v62 = vunpack.c.h.bf16 %v4731_v63 }
 0x1d5   : > { %2139 = vperm.xlu1 %5371, %v6342_v9   ;;  %2155 = vperm.xlu2 %5372, %v6381_v52   ;;  %v1660_v10 = vpop.permute.xlu2 %1659  ;;  %v4783_v9 = vld [vmem:[%s6578_s22 + $0x30] sm:$0xf] }
 0x1d6   : > { %2996 = vmatpush.bf16.msrb.mxu2 %v5048_v41  ;;  %3045 = vmatpush.bf16.msra.mxu3 %v4924_v28  ;;  %1941 = vst [vmem:[#allocation2 + $0x140] sm:$0xff] %v1909_v58  ;;  %v1665_v3 = vperm.slane %v1660_v10, %v6116_v12  ;;  %v1431_v52 = vld [vmem:[%s7614_s1 + $0xb0] sm:$0xff]  ;;  %v6609_v48 = vor.u32 %v5219_v54, %v4783_v9  ;;  %v5213_v58 = vld [vmem:[%s6578_s22 + $0x4] sm:$0xf0]  ;;  %v1781_v54 = vunpack.c.l.bf16 %v1435_v51 }
 0x1d7   : > { %v1773_v27 = vunpack.c.l.bf16 %v1431_v52  ;;  %v1774_v2 = vunpack.c.h.bf16 %v1431_v52  ;;  %2984 = vmatmul.bf16.vlgmr.msrb.gmra.mxu3 %v6617_v7  ;;  %v4825_v41 = vld [vmem:[#allocation2 + $0x10] sm:$0xf0]  ;;  %v1782_v52 = vunpack.c.h.bf16 %v1435_v51 }
 0x1d8   : > { %v1817_v34 = vunpack.c.l.bf16 %v1665_v3  ;;  %v4828_v20 = vor.u32 %v5228_v15, %v4825_v41  ;;  %v5215_v41 = vld [vmem:[%s6578_s22 + $0x14] sm:$0xf0] }
 0x1da   : > { %3046 = vmatpush.bf16.msra.mxu3 %v4908_v44  ;;  %v1873_v35 = vmul.f32 %v1817_v34, %v1777_v30  ;;  %v1874_v13 = vmul.f32 %v1817_v34, %v1778_v53  ;;  %v4791_v30 = vld [vmem:[%s6578_s22 + $0x40] sm:$0xf]  ;;  %v5221_v53 = vld [vmem:[%s6578_s22 + $0x44] sm:$0xf0] }
 0x1db   : > { %v6642_v29 = vor.u32 %v5221_v53, %v4791_v30  ;;  %v4728_v30 = vld [vmem:[%s7614_s1 + $0x118] sm:$0xff]  ;;  %v4734_v53 = vld [vmem:[%s7614_s1 + $0x148] sm:$0xff] }
 0x1dc   : > { %v1913_v24 = vpack.c.bf16 %v1874_v13, %v1873_v35  ;;  %5376 = vset.pattern.permute.xlu0 %v5573_v5  ;;  %v4729_v13 = vld [vmem:[%s7614_s1 + $0x120] sm:$0xff] }
 0x1dd   : > { %2115 = vperm.xlu2 %5372, %v6285_v47   ;;  %v1642_v22 = vpop.permute.xlu0 %1641  ;;  %5374 = vset.pattern.permute.xlu1 %v5573_v5 }
 0x1de   : > { %3047 = vmatpush.bf16.msra.mxu3 %v4892_v19  ;;  %1945 = vst [vmem:[#allocation2 + $0x180] sm:$0xff] %v1913_v24  ;;  %v1647_v45 = vperm.slane %v1642_v22, %v6116_v12  ;;  %v1687_v59 = vpop.permute.xlu2 %1686  ;;  %v2250_v22 = vunpack.c.l.bf16 %v4729_v13 }
 0x1df   : > { %v1692_v47 = vperm.slane %v1687_v59, %v6116_v12 }
 0x1e0   : > { %v1815_v56 = vunpack.c.l.bf16 %v1647_v45 }
 0x1e1   : > { %v1820_v40 = vunpack.c.l.bf16 %v1692_v47  ;;  %2969 = vmatmul.bf16.gmra.mxu2 %v6609_v48 }
 0x1e2   : > { %3048 = vmatpush.bf16.msra.mxu3 %v4876_v8  ;;  %v1869_v61 = vmul.f32 %v1815_v56, %v1773_v27  ;;  %v1870_v38 = vmul.f32 %v1815_v56, %v1774_v2  ;;  %v2251_v8 = vunpack.c.h.bf16 %v4729_v13  ;;  %v4815_v2 = vld [vmem:[%s6578_s22 + $0x70] sm:$0xf] }
 0x1e3   : > { %v1879_v36 = vmul.f32 %v1820_v40, %v1783_v49  ;;  %v1880_v33 = vmul.f32 %v1820_v40, %v1784_v0  ;;  %v5227_v49 = vld [vmem:[%s6578_s22 + $0x74] sm:$0xf0]  ;;  %v1434_v0 = vld [vmem:[%s7614_s1 + $0xc8] sm:$0xff]  ;;  %v4725_v40 = vld [vmem:[%s7614_s1 + $0x100] sm:$0xff] }
 0x1e4   : > { %v1911_v11 = vpack.c.bf16 %v1870_v38, %v1869_v61  ;;  %v6652_v47 = vor.u32 %v5227_v49, %v4815_v2  ;;  %v1779_v38 = vunpack.c.l.bf16 %v1434_v0  ;;  %v1780_v31 = vunpack.c.h.bf16 %v1434_v0 }
 0x1e5   : > { %v1916_v23 = vpack.c.bf16 %v1880_v33, %v1879_v36  ;;  %v1651_v37 = vpop.permute.xlu1 %1650  ;;  %5375 = vset.pattern.permute.xlu2 %v5573_v5  ;;  %v4759_v5 = vld [vmem:[%s6578_s22] sm:$0xf]  ;;  %v2242_v60 = vunpack.c.l.bf16 %v4725_v40  ;;  %v2261_v49 = vunpack.c.h.bf16 %v4734_v53 }
 0x1e6   : > { %3049 = vmatpush.bf16.msra.mxu3 %v4860_v50  ;;  %1943 = vst [vmem:[#allocation2 + $0x160] sm:$0xff] %v1911_v11  ;;  %v1656_v6 = vperm.slane %v1651_v37, %v6116_v12  ;;  %v6633_v3 = vor.u32 %v5213_v58, %v4759_v5  ;;  %v2243_v11 = vunpack.c.h.bf16 %v4725_v40  ;;  %v4727_v58 = vld [vmem:[%s7614_s1 + $0x110] sm:$0xff]  ;;  %v4732_v40 = vld [vmem:[%s7614_s1 + $0x138] sm:$0xff] }
 0x1e7   : > { %1948 = vst [vmem:[#allocation2 + $0x1b0] sm:$0xff] %v1916_v23  ;;  %v1996_v28 = vpop.permute.xlu2 %1995  ;;  %2989 = vmatmul.bf16.gmra.mxu3 %v6652_v47 }
 0x1e8   : > { %v1816_v14 = vunpack.c.l.bf16 %v1656_v6  ;;  %v2001_v46 = vperm.slane %v1996_v28, %v6116_v12  ;;  %2954 = vmatmul.bf16.vlgmr.msra.gmra.mxu1 %v6633_v3  ;;  %v4767_v6 = vld [vmem:[%s6578_s22 + $0x10] sm:$0xf] }
 0x1e9   : > { %v6668_v15 = vor.u32 %v5215_v41, %v4767_v6 }
 0x1ea   : > { %3050 = vmatpush.bf16.msra.mxu3 %v4844_v32  ;;  %v1871_v1 = vmul.f32 %v1816_v14, %v1775_v17  ;;  %v1872_v44 = vmul.f32 %v1816_v14, %v1776_v57  ;;  %v2307_v10 = vunpack.c.l.bf16 %v2001_v46  ;;  %v2254_v32 = vunpack.c.l.bf16 %v4731_v63  ;;  %v5223_v46 = vld [vmem:[%s6578_s22 + $0x54] sm:$0xf0] }
 0x1ec   : > { %v1912_v34 = vpack.c.bf16 %v1872_v44, %v1871_v1  ;;  %v2340_v21 = vmul.f32 %v2307_v10, %v2244_v18  ;;  %v2341_v19 = vmul.f32 %v2307_v10, %v2245_v42  ;;  %v4799_v42 = vld [vmem:[%s6578_s22 + $0x50] sm:$0xf] }
 0x1ed   : > { %v1678_v35 = vpop.permute.xlu1 %1677  ;;  %v6680_v13 = vor.u32 %v5223_v46, %v4799_v42 }
 0x1ee   : > { %3051 = vmatpush.bf16.msra.mxu3 %v4828_v20  ;;  %1944 = vst [vmem:[#allocation2 + $0x170] sm:$0xff] %v1912_v34  ;;  %v2403_v9 = vpack.c.bf16 %v2341_v19, %v2340_v21  ;;  %v1683_v24 = vperm.slane %v1678_v35, %v6116_v12  ;;  %v5282_v51 = vld [vmem:[#allocation2 + $0x1ac] sm:$0xf0]  ;;  %v5033_v35 = vld [vmem:[#allocation2 + $0x1b0] sm:$0xf0] }
 0x1ef   : > { %v2020_v39 = vpop.permute.xlu2 %2019 }
 0x1f0   : > { %2435 = vst [vmem:[#allocation2 + $0x18] sm:$0xff] %v2403_v9  ;;  %v1819_v16 = vunpack.c.l.bf16 %v1683_v24  ;;  %v2025_v27 = vperm.slane %v2020_v39, %v6116_v12 }
 0x1f1   : > { %2974 = vmatmul.bf16.gmra.mxu2 %v6642_v29 }
 0x1f2   : > { %v1877_v45 = vmul.f32 %v1819_v16, %v1781_v54  ;;  %v1878_v59 = vmul.f32 %v1819_v16, %v1782_v52  ;;  %v2310_v55 = vunpack.c.l.bf16 %v2025_v27  ;;  %v2246_v54 = vunpack.c.l.bf16 %v4727_v58 }
 0x1f3   : > { %v2247_v16 = vunpack.c.h.bf16 %v4727_v58  ;;  %v2249_v27 = vunpack.c.h.bf16 %v4728_v30 }
 0x1f4   : > { %v1915_v56 = vpack.c.bf16 %v1878_v59, %v1877_v45  ;;  %v2346_v43 = vmul.f32 %v2310_v55, %v2250_v22  ;;  %v2347_v4 = vmul.f32 %v2310_v55, %v2251_v8  ;;  %v2248_v8 = vunpack.c.l.bf16 %v4728_v30 }
 0x1f5   : > { %v1669_v50 = vpop.permute.xlu0 %1668  ;;  %v2260_v55 = vunpack.c.l.bf16 %v4734_v53  ;;  %v5274_v58 = vld [vmem:[#allocation2 + $0x16c] sm:$0xf0]  ;;  %v5001_v53 = vld [vmem:[#allocation2 + $0x170] sm:$0xf0] }
 0x1f6   : > { %1947 = vst [vmem:[#allocation2 + $0x1a0] sm:$0xff] %v1915_v56  ;;  %v2406_v61 = vpack.c.bf16 %v2347_v4, %v2346_v43  ;;  %v1674_v36 = vperm.slane %v1669_v50, %v6116_v12  ;;  %v1988_v33 = vpop.permute.xlu1 %1987 }
 0x1f7   : > { %v1993_v26 = vperm.slane %v1988_v33, %v6116_v12  ;;  %v2036_v23 = vpop.permute.xlu2 %2035  ;;  %v4730_v33 = vld [vmem:[%s7614_s1 + $0x128] sm:$0xff]  ;;  %3052 = vmatmul.bf16.vlgmr.msra.gmra.mxu3 %v6633_v3 }
 0x1f8   : > { %2438 = vst [vmem:[#allocation2 + $0x48] sm:$0xff] %v2406_v61  ;;  %v1818_v37 = vunpack.c.l.bf16 %v1674_v36  ;;  %v2041_v17 = vperm.slane %v2036_v23, %v6116_v12  ;;  %2959 = vmatmul.bf16.gmra.mxu1 %v6668_v15  ;;  %v2256_v23 = vunpack.c.l.bf16 %v4732_v40  ;;  %v2252_v42 = vunpack.c.l.bf16 %v4730_v33 }
 0x1f9   : > { %v2306_v57 = vunpack.c.l.bf16 %v1993_v26  ;;  %v2253_v46 = vunpack.c.h.bf16 %v4730_v33 }
 0x1fa   : > { %v1875_v28 = vmul.f32 %v1818_v37, %v1779_v38  ;;  %v1876_v14 = vmul.f32 %v1818_v37, %v1780_v31  ;;  %v2312_v18 = vunpack.c.l.bf16 %v2041_v17  ;;  %v4737_v37 = vld [vmem:[%s7614_s1 + $0x160] sm:$0xff] }
 0x1fb   : > { %v2338_v20 = vmul.f32 %v2306_v57, %v2242_v60  ;;  %v2339_v5 = vmul.f32 %v2306_v57, %v2243_v11  ;;  %v5015_v60 = vld [vmem:[#allocation2 + $0x180] sm:$0xf]  ;;  %v5276_v11 = vld [vmem:[#allocation2 + $0x184] sm:$0xf] }
 0x1fc   : > { %v1914_v1 = vpack.c.bf16 %v1876_v14, %v1875_v28  ;;  %v2350_v44 = vmul.f32 %v2312_v18, %v2254_v32  ;;  %v2351_v10 = vmul.f32 %v2312_v18, %v2255_v62  ;;  %v2257_v14 = vunpack.c.h.bf16 %v4732_v40 }
 0x1fd   : > { %v2402_v34 = vpack.c.bf16 %v2339_v5, %v2338_v20  ;;  %v5031_v21 = vld [vmem:[#allocation2 + $0x1a0] sm:$0xf]  ;;  %v5280_v19 = vld [vmem:[#allocation2 + $0x1a4] sm:$0xf] }
 0x1fe   : > { %1946 = vst [vmem:[#allocation2 + $0x190] sm:$0xff] %v1914_v1  ;;  %v2408_v9 = vpack.c.bf16 %v2351_v10, %v2350_v44  ;;  %v2004_v52 = vpop.permute.xlu0 %2003  ;;  %v5032_v24 = vor.u32 %v5282_v51, %v5031_v21  ;;  %v5036_v39 = vor.u32 %v5280_v19, %v5033_v35  ;;  %v2266_v44 = vunpack.c.l.bf16 %v4737_v37 }
 0x1ff   : > { %2434 = vst [vmem:[#allocation2 + $0x8] sm:$0xff] %v2402_v34  ;;  %v2009_v22 = vperm.slane %v2004_v52, %v6116_v12  ;;  %v2012_v2 = vpop.permute.xlu1 %2011  ;;  %v2060_v45 = vpop.permute.xlu2 %2059  ;;  %v2267_v10 = vunpack.c.h.bf16 %v4737_v37  ;;  %v4999_v34 = vld [vmem:[#allocation2 + $0x160] sm:$0xf] }
 0x200   : > { %2440 = vst [vmem:[#allocation2 + $0x68] sm:$0xff] %v2408_v9  ;;  %v2017_v59 = vperm.slane %v2012_v2, %v6116_v12  ;;  %v2065_v0 = vperm.slane %v2060_v45, %v6116_v12  ;;  %2997 = vmatpush.bf16.msrb.mxu2 %v5032_v24  ;;  %3095 = vmatpush.bf16.msrb.mxu1 %v5036_v39  ;;  %v5272_v9 = vld [vmem:[#allocation2 + $0x164] sm:$0xf] }
 0x201   : > { %v2308_v56 = vunpack.c.l.bf16 %v2009_v22  ;;  %2979 = vmatmul.bf16.gmra.mxu2 %v6680_v13  ;;  %v5000_v35 = vor.u32 %v5274_v58, %v4999_v34  ;;  %v5004_v39 = vor.u32 %v5272_v9, %v5001_v53  ;;  %v5268_v22 = vld [vmem:[#allocation2 + $0x144] sm:$0xf] }
 0x202   : > { %v2309_v43 = vunpack.c.l.bf16 %v2017_v59  ;;  %v2315_v4 = vunpack.c.l.bf16 %v2065_v0  ;;  %v4733_v59 = vld [vmem:[%s7614_s1 + $0x140] sm:$0xff]  ;;  %v4740_v0 = vld [vmem:[%s7614_s1 + $0x178] sm:$0xff] }
 0x203   : > { %v2342_v50 = vmul.f32 %v2308_v56, %v2246_v54  ;;  %v2343_v63 = vmul.f32 %v2308_v56, %v2247_v16  ;;  %v4983_v54 = vld [vmem:[#allocation2 + $0x140] sm:$0xf]  ;;  %v4735_v16 = vld [vmem:[%s7614_s1 + $0x150] sm:$0xff]  ;;  %v2259_v33 = vunpack.c.h.bf16 %v4733_v59  ;;  %v2272_v37 = vunpack.c.l.bf16 %v4740_v0 }
 0x204   : > { %v2344_v61 = vmul.f32 %v2309_v43, %v2248_v8  ;;  %v2345_v38 = vmul.f32 %v2309_v43, %v2249_v27  ;;  %v2356_v31 = vmul.f32 %v2315_v4, %v2260_v55  ;;  %v2357_v36 = vmul.f32 %v2315_v4, %v2261_v49  ;;  %v5270_v55 = vld [vmem:[#allocation2 + $0x14c] sm:$0xf0]  ;;  %v4985_v43 = vld [vmem:[#allocation2 + $0x150] sm:$0xf0] }
 0x205   : > { %v2404_v26 = vpack.c.bf16 %v2343_v63, %v2342_v50  ;;  %v5278_v32 = vld [vmem:[#allocation2 + $0x18c] sm:$0xf0]  ;;  %v5017_v62 = vld [vmem:[#allocation2 + $0x190] sm:$0xf0]  ;;  %v4984_v56 = vor.u32 %v5270_v55, %v4983_v54  ;;  %v2262_v50 = vunpack.c.l.bf16 %v4735_v16  ;;  %v4753_v54 = vld [vmem:[%s7614_s1 + $0x1e0] sm:$0xff] }
 0x206   : > { %v2405_v17 = vpack.c.bf16 %v2345_v38, %v2344_v61  ;;  %v2411_v57 = vpack.c.bf16 %v2357_v36, %v2356_v31  ;;  %v2044_v6 = vpop.permute.xlu0 %2043  ;;  %v5016_v41 = vor.u32 %v5278_v32, %v5015_v60  ;;  %v5020_v28 = vor.u32 %v5276_v11, %v5017_v62 }
 0x207   : > { %2436 = vst [vmem:[#allocation2 + $0x28] sm:$0xff] %v2404_v26  ;;  %v2049_v18 = vperm.slane %v2044_v6, %v6116_v12  ;;  %v2028_v20 = vpop.permute.xlu1 %2027  ;;  %v2084_v5 = vpop.permute.xlu2 %2083  ;;  %v4988_v61 = vor.u32 %v5268_v22, %v4985_v43  ;;  %v2263_v38 = vunpack.c.h.bf16 %v4735_v16  ;;  %v2258_v36 = vunpack.c.l.bf16 %v4733_v59  ;;  %v5266_v26 = vld [vmem:[#allocation2 + $0x12c] sm:$0xf0]  ;;  %v4967_v6 = vld [vmem:[#allocation2 + $0x120] sm:$0xf]  ;;  %3057 = vmatmul.bf16.gmra.mxu3 %v6668_v15 }
 0x208   : > { %2437 = vst [vmem:[#allocation2 + $0x38] sm:$0xff] %v2405_v17  ;;  %v2033_v1 = vperm.slane %v2028_v20, %v6116_v12  ;;  %v2089_v30 = vperm.slane %v2084_v5, %v6116_v12  ;;  %2998 = vmatpush.bf16.msrb.mxu2 %v5016_v41  ;;  %3096 = vmatpush.bf16.msrb.mxu1 %v5020_v28  ;;  %v2273_v32 = vunpack.c.h.bf16 %v4740_v0  ;;  %v4969_v17 = vld [vmem:[#allocation2 + $0x130] sm:$0xf0]  ;;  %v2298_v43 = vunpack.c.l.bf16 %v4753_v54 }
 0x209   : > { %2443 = vst [vmem:[#allocation2 + $0x98] sm:$0xff] %v2411_v57  ;;  %v2313_v51 = vunpack.c.l.bf16 %v2049_v18  ;;  %v5264_v18 = vld [vmem:[#allocation2 + $0x124] sm:$0xf] }
 0x20a   : > { %v2311_v21 = vunpack.c.l.bf16 %v2033_v1  ;;  %v2318_v19 = vunpack.c.l.bf16 %v2089_v30  ;;  %v4972_v58 = vor.u32 %v5264_v18, %v4969_v17  ;;  %v4738_v1 = vld [vmem:[%s7614_s1 + $0x168] sm:$0xff] }
 0x20b   : > { %v2352_v52 = vmul.f32 %v2313_v51, %v2256_v23  ;;  %v2353_v24 = vmul.f32 %v2313_v51, %v2257_v14  ;;  %v4968_v14 = vor.u32 %v5266_v26, %v4967_v6  ;;  %v2268_v22 = vunpack.c.l.bf16 %v4738_v1 }
 0x20c   : > { %v2348_v8 = vmul.f32 %v2311_v21, %v2252_v42  ;;  %v2349_v27 = vmul.f32 %v2311_v21, %v2253_v46  ;;  %v2362_v2 = vmul.f32 %v2318_v19, %v2266_v44  ;;  %v2363_v45 = vmul.f32 %v2318_v19, %v2267_v10  ;;  %2999 = vmatpush.bf16.msrb.mxu2 %v5000_v35  ;;  %v5262_v42 = vld [vmem:[#allocation2 + $0x10c] sm:$0xf0]  ;;  %v4953_v46 = vld [vmem:[#allocation2 + $0x110] sm:$0xf0]  ;;  %v4951_v44 = vld [vmem:[#allocation2 + $0x100] sm:$0xf] }
 0x20d   : > { %v2409_v49 = vpack.c.bf16 %v2353_v24, %v2352_v52  ;;  %3097 = vmatpush.bf16.msrb.mxu1 %v5004_v39  ;;  %v5260_v10 = vld [vmem:[#allocation2 + $0x104] sm:$0xf]  ;;  %v4736_v21 = vld [vmem:[%s7614_s1 + $0x158] sm:$0xff]  ;;  %v4761_v35 = vld [vmem:[%s6578_s22 + $0x8] sm:$0xf0]  ;;  %v4952_v52 = vor.u32 %v5262_v42, %v4951_v44 }
 0x20e   : > { %v2407_v4 = vpack.c.bf16 %v2349_v27, %v2348_v8  ;;  %v2414_v40 = vpack.c.bf16 %v2363_v45, %v2362_v2  ;;  %v2068_v63 = vpop.permute.xlu0 %2067  ;;  %v5212_v19 = vld [vmem:[%s6578_s22 + $0x4] sm:$0xf]  ;;  %v4956_v24 = vor.u32 %v5260_v10, %v4953_v46  ;;  %v2269_v8 = vunpack.c.h.bf16 %v4738_v1 }
 0x20f   : > { %2441 = vst [vmem:[#allocation2 + $0x78] sm:$0xff] %v2409_v49  ;;  %v2073_v31 = vperm.slane %v2068_v63, %v6116_v12  ;;  %v2052_v60 = vpop.permute.xlu1 %2051  ;;  %v2108_v11 = vpop.permute.xlu2 %2107  ;;  %v2264_v45 = vunpack.c.l.bf16 %v4736_v21  ;;  %v2265_v59 = vunpack.c.h.bf16 %v4736_v21  ;;  %v6724_v0 = vor.u32 %v5212_v19, %v4761_v35 }
 0x210   : > { %2439 = vst [vmem:[#allocation2 + $0x58] sm:$0xff] %v2407_v4  ;;  %v2057_v23 = vperm.slane %v2052_v60, %v6116_v12  ;;  %v2113_v62 = vperm.slane %v2108_v11, %v6116_v12  ;;  %3000 = vmatpush.bf16.msrb.mxu2 %v4984_v56  ;;  %v2299_v4 = vunpack.c.h.bf16 %v4753_v54  ;;  %v4756_v54 = vld [vmem:[%s7614_s1 + $0x1f8] sm:$0xff] }
 0x211   : > { %2446 = vst [vmem:[#allocation2 + $0xc8] sm:$0xff] %v2414_v40  ;;  %v2316_v57 = vunpack.c.l.bf16 %v2073_v31  ;;  %3098 = vmatpush.bf16.msrb.mxu1 %v4988_v61 }
 0x212   : > { %v2314_v41 = vunpack.c.l.bf16 %v2057_v23  ;;  %v2321_v28 = vunpack.c.l.bf16 %v2113_v62  ;;  %v4739_v23 = vld [vmem:[%s7614_s1 + $0x170] sm:$0xff] }
 0x213   : > { %v2358_v20 = vmul.f32 %v2316_v57, %v2262_v50  ;;  %v2359_v5 = vmul.f32 %v2316_v57, %v2263_v38  ;;  %v2271_v18 = vunpack.c.h.bf16 %v4739_v23 }
 0x214   : > { %v2354_v30 = vmul.f32 %v2314_v41, %v2258_v36  ;;  %v2355_v53 = vmul.f32 %v2314_v41, %v2259_v33  ;;  %v2368_v51 = vmul.f32 %v2321_v28, %v2272_v37  ;;  %v2369_v34 = vmul.f32 %v2321_v28, %v2273_v32  ;;  %3001 = vmatpush.bf16.msrb.mxu2 %v4968_v14  ;;  %v4755_v36 = vld [vmem:[%s7614_s1 + $0x1f0] sm:$0xff]  ;;  %v4752_v32 = vld [vmem:[%s7614_s1 + $0x1d8] sm:$0xff] }
 0x215   : > { %v2412_v9 = vpack.c.bf16 %v2359_v5, %v2358_v20  ;;  %3099 = vmatpush.bf16.msrb.mxu1 %v4972_v58  ;;  %v2302_v57 = vunpack.c.l.bf16 %v4755_v36  ;;  %v2303_v41 = vunpack.c.h.bf16 %v4755_v36  ;;  %v2270_v14 = vunpack.c.l.bf16 %v4739_v23 }
 0x216   : > { %v2410_v39 = vpack.c.bf16 %v2355_v53, %v2354_v30  ;;  %v2417_v16 = vpack.c.bf16 %v2369_v34, %v2368_v51  ;;  %v2092_v27 = vpop.permute.xlu0 %2091  ;;  %v2296_v5 = vunpack.c.l.bf16 %v4752_v32  ;;  %v2297_v58 = vunpack.c.h.bf16 %v4752_v32  ;;  %v4754_v34 = vld [vmem:[%s7614_s1 + $0x1e8] sm:$0xff] }
 0x217   : > { %2444 = vst [vmem:[#allocation2 + $0xa8] sm:$0xff] %v2412_v9  ;;  %v2097_v2 = vperm.slane %v2092_v27, %v6116_v12  ;;  %v2076_v55 = vpop.permute.xlu1 %2075  ;;  %v2212_v49 = vpop.permute.xlu2 %2211  ;;  %3062 = vmatmul.bf16.gmra.mxu3 %v6588_v25  ;;  %v2300_v27 = vunpack.c.l.bf16 %v4754_v34 }
 0x218   : > { %2442 = vst [vmem:[#allocation2 + $0x88] sm:$0xff] %v2410_v39  ;;  %v2081_v56 = vperm.slane %v2076_v55, %v6116_v12  ;;  %v2217_v40 = vperm.slane %v2212_v49, %v6116_v12  ;;  %3002 = vmatpush.bf16.msrb.mxu2 %v4952_v52  ;;  %v5214_v52 = vld [vmem:[%s6578_s22 + $0x14] sm:$0xf]  ;;  %v2304_v55 = vunpack.c.l.bf16 %v4756_v54  ;;  %v2305_v49 = vunpack.c.h.bf16 %v4756_v54 }
 0x219   : > { %2449 = vst [vmem:[#allocation2 + $0xf8] sm:$0xff] %v2417_v16  ;;  %v2319_v50 = vunpack.c.l.bf16 %v2097_v2  ;;  %3100 = vmatpush.bf16.msrb.mxu1 %v4956_v24  ;;  %v4769_v24 = vld [vmem:[%s6578_s22 + $0x18] sm:$0xf0]  ;;  %v4747_v16 = vld [vmem:[%s7614_s1 + $0x1b0] sm:$0xff]  ;;  %v2301_v2 = vunpack.c.h.bf16 %v4754_v34 }
 0x21a   : > { %v2317_v63 = vunpack.c.l.bf16 %v2081_v56  ;;  %v2334_v61 = vunpack.c.l.bf16 %v2217_v40 }
 0x21b   : > { %v2364_v38 = vmul.f32 %v2319_v50, %v2268_v22  ;;  %v2365_v31 = vmul.f32 %v2319_v50, %v2269_v8  ;;  %3003 = vmatmul.bf16.vlgmr.msrb.gmra.mxu2 %v6724_v0  ;;  %v2286_v50 = vunpack.c.l.bf16 %v4747_v16 }
 0x21c   : > { %v2360_v33 = vmul.f32 %v2317_v63, %v2264_v45  ;;  %v2361_v60 = vmul.f32 %v2317_v63, %v2265_v59  ;;  %v2394_v11 = vmul.f32 %v2334_v61, %v2298_v43  ;;  %v2395_v26 = vmul.f32 %v2334_v61, %v2299_v4  ;;  %3101 = vmatmul.bf16.vlgmr.msrb.gmra.mxu1 %v6724_v0 }
 0x21d   : > { %v2415_v37 = vpack.c.bf16 %v2365_v31, %v2364_v38  ;;  %v6755_v4 = vor.u32 %v5214_v52, %v4769_v24  ;;  %v2287_v63 = vunpack.c.h.bf16 %v4747_v16  ;;  %v4927_v24 = vld [vmem:[#allocation2 + $0xc8] sm:$0xf] }
 0x21e   : > { %v2413_v62 = vpack.c.bf16 %v2361_v60, %v2360_v33  ;;  %v2430_v17 = vpack.c.bf16 %v2395_v26, %v2394_v11  ;;  %v2228_v6 = vpop.permute.xlu0 %2227  ;;  %v4749_v33 = vld [vmem:[%s7614_s1 + $0x1c0] sm:$0xff]  ;;  %v4751_v26 = vld [vmem:[%s7614_s1 + $0x1d0] sm:$0xff] }
 0x21f   : > { %2447 = vst [vmem:[#allocation2 + $0xd8] sm:$0xff] %v2415_v37  ;;  %v2233_v28 = vperm.slane %v2228_v6, %v6116_v12  ;;  %v2100_v42 = vpop.permute.xlu1 %2099  ;;  %v2204_v46 = vpop.permute.xlu2 %2203  ;;  %v2290_v6 = vunpack.c.l.bf16 %v4749_v33 }
 0x220   : > { %2445 = vst [vmem:[#allocation2 + $0xb8] sm:$0xff] %v2413_v62  ;;  %v2105_v20 = vperm.slane %v2100_v42, %v6116_v12  ;;  %v2209_v1 = vperm.slane %v2204_v46, %v6116_v12  ;;  %v2294_v42 = vunpack.c.l.bf16 %v4751_v26  ;;  %v5259_v46 = vld [vmem:[#allocation2 + $0xf4] sm:$0xf0] }
 0x221   : > { %2462 = vst [vmem:[#allocation2 + $0x1c8] sm:$0xff] %v2430_v17  ;;  %v2336_v44 = vunpack.c.l.bf16 %v2233_v28  ;;  %v4746_v17 = vld [vmem:[%s7614_s1 + $0x1a8] sm:$0xff] }
 0x222   : > { %v2320_v10 = vunpack.c.l.bf16 %v2105_v20  ;;  %v2333_v30 = vunpack.c.l.bf16 %v2209_v1  ;;  %v4945_v20 = vld [vmem:[#allocation2 + $0xf8] sm:$0xf0] }
 0x223   : > { %v2398_v53 = vmul.f32 %v2336_v44, %v2302_v57  ;;  %v2399_v51 = vmul.f32 %v2336_v44, %v2303_v41  ;;  %v2284_v44 = vunpack.c.l.bf16 %v4746_v17 }
 0x224   : > { %v2366_v21 = vmul.f32 %v2320_v10, %v2270_v14  ;;  %v2367_v19 = vmul.f32 %v2320_v10, %v2271_v18  ;;  %v2392_v35 = vmul.f32 %v2333_v30, %v2296_v5  ;;  %v2393_v9 = vmul.f32 %v2333_v30, %v2297_v58 }
 0x225   : > { %v2432_v39 = vpack.c.bf16 %v2399_v51, %v2398_v53  ;;  %v2291_v14 = vunpack.c.h.bf16 %v4749_v33  ;;  %v2295_v58 = vunpack.c.h.bf16 %v4751_v26  ;;  %v2285_v10 = vunpack.c.h.bf16 %v4746_v17  ;;  %v4895_v26 = vld [vmem:[#allocation2 + $0x88] sm:$0xf] }
 0x226   : > { %v2416_v22 = vpack.c.bf16 %v2367_v19, %v2366_v21  ;;  %v2429_v8 = vpack.c.bf16 %v2393_v9, %v2392_v35  ;;  %v2220_v45 = vpop.permute.xlu0 %2219  ;;  %v5255_v9 = vld [vmem:[#allocation2 + $0xd4] sm:$0xf0]  ;;  %v4929_v54 = vld [vmem:[#allocation2 + $0xd8] sm:$0xf0] }
 0x227   : > { %2464 = vst [vmem:[#allocation2 + $0x1e8] sm:$0xff] %v2432_v39  ;;  %v2225_v59 = vperm.slane %v2220_v45, %v6116_v12  ;;  %v2236_v56 = vpop.permute.xlu1 %2235  ;;  %v2164_v43 = vpop.permute.xlu2 %2163  ;;  %3067 = vmatmul.bf16.gmra.mxu3 %v6609_v48 }
 0x228   : > { %2448 = vst [vmem:[#allocation2 + $0xe8] sm:$0xff] %v2416_v22  ;;  %v2241_v40 = vperm.slane %v2236_v56, %v6116_v12  ;;  %v2169_v61 = vperm.slane %v2164_v43, %v6116_v12  ;;  %v5253_v22 = vld [vmem:[#allocation2 + $0xcc] sm:$0xf] }
 0x229   : > { %2461 = vst [vmem:[#allocation2 + $0x1b8] sm:$0xff] %v2429_v8  ;;  %v2335_v38 = vunpack.c.l.bf16 %v2225_v59  ;;  %v4748_v8 = vld [vmem:[%s7614_s1 + $0x1b8] sm:$0xff]  ;;  %v4928_v59 = vor.u32 %v5255_v9, %v4927_v24  ;;  %v5245_v24 = vld [vmem:[#allocation2 + $0x8c] sm:$0xf] }
 0x22a   : > { %v2337_v31 = vunpack.c.l.bf16 %v2241_v40  ;;  %v2328_v36 = vunpack.c.l.bf16 %v2169_v61  ;;  %v5216_v61 = vld [vmem:[%s6578_s22 + $0x24] sm:$0xf]  ;;  %v2289_v33 = vunpack.c.h.bf16 %v4748_v8 }
 0x22b   : > { %v2396_v60 = vmul.f32 %v2335_v38, %v2300_v27  ;;  %v2397_v11 = vmul.f32 %v2335_v38, %v2301_v2  ;;  %3008 = vmatmul.bf16.gmra.mxu2 %v6755_v4  ;;  %v6779_v27 = vld [vmem:[%s7614_s1 + $0x1c8] sm:$0xff] }
 0x22c   : > { %v2400_v23 = vmul.f32 %v2337_v31, %v2304_v55  ;;  %v2401_v37 = vmul.f32 %v2337_v31, %v2305_v49  ;;  %v2382_v32 = vmul.f32 %v2328_v36, %v2286_v50  ;;  %v2383_v62 = vmul.f32 %v2328_v36, %v2287_v63  ;;  %3106 = vmatmul.bf16.gmra.mxu1 %v6755_v4  ;;  %v6784_v49 = vld [vmem:[%s7614_s1 + $0x180] sm:$0xff]  ;;  %v5251_v63 = vld [vmem:[#allocation2 + $0xb4] sm:$0xf0]  ;;  %v4777_v38 = vld [vmem:[%s6578_s22 + $0x28] sm:$0xf0] }
 0x22d   : > { %v2431_v57 = vpack.c.bf16 %v2397_v11, %v2396_v60  ;;  %v4932_v55 = vor.u32 %v5253_v22, %v4929_v54  ;;  %v2288_v36 = vunpack.c.l.bf16 %v4748_v8  ;;  %v2292_v60 = vunpack.c.l.bf16 %v6779_v27  ;;  %v4911_v11 = vld [vmem:[#allocation2 + $0xa8] sm:$0xf] }
 0x22e   : > { %v2433_v41 = vpack.c.bf16 %v2401_v37, %v2400_v23  ;;  %v2424_v28 = vpack.c.bf16 %v2383_v62, %v2382_v32  ;;  %v2180_v18 = vpop.permute.xlu0 %2179  ;;  %v2293_v62 = vunpack.c.h.bf16 %v6779_v27  ;;  %v2274_v17 = vunpack.c.l.bf16 %v6784_v49  ;;  %v4897_v27 = vld [vmem:[#allocation2 + $0x98] sm:$0xf0] }
 0x22f   : > { %2463 = vst [vmem:[#allocation2 + $0x1d8] sm:$0xff] %v2431_v57  ;;  %v2185_v5 = vperm.slane %v2180_v18, %v6116_v12  ;;  %v2196_v1 = vpop.permute.xlu1 %2195  ;;  %v2156_v30 = vpop.permute.xlu2 %2155  ;;  %v4943_v53 = vld [vmem:[#allocation2 + $0xe8] sm:$0xf]  ;;  %v5257_v51 = vld [vmem:[#allocation2 + $0xec] sm:$0xf]  ;;  %v2275_v18 = vunpack.c.h.bf16 %v6784_v49 }
 0x230   : > { %2465 = vst [vmem:[#allocation2 + $0x1f8] sm:$0xff] %v2433_v41  ;;  %v2201_v34 = vperm.slane %v2196_v1, %v6116_v12  ;;  %v2161_v21 = vperm.slane %v2156_v30, %v6116_v12  ;;  %v4944_v19 = vor.u32 %v5259_v46, %v4943_v53  ;;  %v4948_v35 = vor.u32 %v5257_v51, %v4945_v20  ;;  %v5071_v57 = vld [vmem:[#allocation2 + $0x1e8] sm:$0xf]  ;;  %v5289_v41 = vld [vmem:[#allocation2 + $0x1ec] sm:$0xf] }
 0x231   : > { %2456 = vst [vmem:[#allocation2 + $0x168] sm:$0xff] %v2424_v28  ;;  %v2330_v52 = vunpack.c.l.bf16 %v2185_v5  ;;  %v4912_v46 = vor.u32 %v5251_v63, %v4911_v11  ;;  %v5249_v30 = vld [vmem:[#allocation2 + $0xac] sm:$0xf]  ;;  %v4900_v63 = vor.u32 %v5245_v24, %v4897_v27  ;;  %v5283_v11 = vld [vmem:[#allocation2 + $0x1b4] sm:$0xf0] }
 0x232   : > { %v2332_v39 = vunpack.c.l.bf16 %v2201_v34  ;;  %v2327_v16 = vunpack.c.l.bf16 %v2161_v21  ;;  %3142 = vmatpush.bf16.msra.mxu2 %v4944_v19  ;;  %3240 = vmatpush.bf16.msrb.mxu0 %v4948_v35  ;;  %v5247_v19 = vld [vmem:[#allocation2 + $0x94] sm:$0xf0]  ;;  %v4785_v27 = vld [vmem:[%s6578_s22 + $0x38] sm:$0xf0] }
 0x233   : > { %v2386_v2 = vmul.f32 %v2330_v52, %v2290_v6  ;;  %v2387_v45 = vmul.f32 %v2330_v52, %v2291_v14  ;;  %v4913_v6 = vld [vmem:[#allocation2 + $0xb8] sm:$0xf0]  ;;  %v4896_v54 = vor.u32 %v5247_v19, %v4895_v26  ;;  %v5055_v52 = vld [vmem:[#allocation2 + $0x1c8] sm:$0xf]  ;;  %v5235_v19 = vld [vmem:[#allocation2 + $0x34] sm:$0xf0] }
 0x234   : > { %v2390_v56 = vmul.f32 %v2332_v39, %v2294_v42  ;;  %v2391_v43 = vmul.f32 %v2332_v39, %v2295_v58  ;;  %v2380_v40 = vmul.f32 %v2327_v16, %v2284_v44  ;;  %v2381_v50 = vmul.f32 %v2327_v16, %v2285_v10  ;;  %v4881_v26 = vld [vmem:[#allocation2 + $0x78] sm:$0xf0] }
 0x235   : > { %v2426_v31 = vpack.c.bf16 %v2387_v45, %v2386_v2  ;;  %v6794_v58 = vor.u32 %v5216_v61, %v4777_v38  ;;  %v4916_v21 = vor.u32 %v5249_v30, %v4913_v6  ;;  %v5243_v2 = vld [vmem:[#allocation2 + $0x74] sm:$0xf0]  ;;  %v4879_v38 = vld [vmem:[#allocation2 + $0x68] sm:$0xf]  ;;  %v4865_v30 = vld [vmem:[#allocation2 + $0x58] sm:$0xf0] }
 0x236   : > { %v2428_v23 = vpack.c.bf16 %v2391_v43, %v2390_v56  ;;  %v2423_v37 = vpack.c.bf16 %v2381_v50, %v2380_v40  ;;  %3143 = vmatpush.bf16.msra.mxu2 %v4928_v59  ;;  %3241 = vmatpush.bf16.msrb.mxu0 %v4932_v55  ;;  %v2172_v32 = vpop.permute.xlu0 %2171  ;;  %v5287_v51 = vld [vmem:[#allocation2 + $0x1d4] sm:$0xf0]  ;;  %v5057_v39 = vld [vmem:[#allocation2 + $0x1d8] sm:$0xf0]  ;;  %v5285_v56 = vld [vmem:[#allocation2 + $0x1cc] sm:$0xf] }
 0x237   : > { %2458 = vst [vmem:[#allocation2 + $0x188] sm:$0xff] %v2426_v31  ;;  %v2177_v28 = vperm.slane %v2172_v32, %v6116_v12  ;;  %v2188_v14 = vpop.permute.xlu1 %2187  ;;  %v2116_v42 = vpop.permute.xlu2 %2115  ;;  %v5291_v20 = vld [vmem:[#allocation2 + $0x1f4] sm:$0xf0]  ;;  %v5073_v5 = vld [vmem:[#allocation2 + $0x1f8] sm:$0xf0]  ;;  %v5056_v8 = vor.u32 %v5287_v51, %v5055_v52  ;;  %v4743_v43 = vld [vmem:[%s7614_s1 + $0x190] sm:$0xff]  ;;  %v5060_v61 = vor.u32 %v5285_v56, %v5057_v39  ;;  %3072 = vmatmul.bf16.gmra.mxu3 %v6642_v29 }
 0x238   : > { %2460 = vst [vmem:[#allocation2 + $0x1a8] sm:$0xff] %v2428_v23  ;;  %v2193_v1 = vperm.slane %v2188_v14, %v6116_v12  ;;  %v2121_v44 = vperm.slane %v2116_v42, %v6116_v12  ;;  %v5072_v10 = vor.u32 %v5291_v20, %v5071_v57  ;;  %v5076_v53 = vor.u32 %v5289_v41, %v5073_v5  ;;  %v4745_v40 = vld [vmem:[%s7614_s1 + $0x1a0] sm:$0xff]  ;;  %v5041_v23 = vld [vmem:[#allocation2 + $0x1b8] sm:$0xf0]  ;;  %v5241_v42 = vld [vmem:[#allocation2 + $0x6c] sm:$0xf] }
 0x239   : > { %2455 = vst [vmem:[#allocation2 + $0x158] sm:$0xff] %v2423_v37  ;;  %v2329_v34 = vunpack.c.l.bf16 %v2177_v28  ;;  %v2278_v37 = vunpack.c.l.bf16 %v4743_v43  ;;  %v2279_v32 = vunpack.c.h.bf16 %v4743_v43  ;;  %v2283_v28 = vunpack.c.h.bf16 %v4745_v40  ;;  %v5237_v52 = vld [vmem:[#allocation2 + $0x4c] sm:$0xf]  ;;  %v4744_v24 = vld [vmem:[%s7614_s1 + $0x198] sm:$0xff] }
 0x23a   : > { %v2331_v35 = vunpack.c.l.bf16 %v2193_v1  ;;  %v2322_v9 = vunpack.c.l.bf16 %v2121_v44  ;;  %3144 = vmatpush.bf16.msra.mxu2 %v4912_v46  ;;  %3191 = vmatpush.bf16.msrb.mxu3 %v5072_v10  ;;  %v4884_v5 = vor.u32 %v5241_v42, %v4881_v26  ;;  %v5239_v1 = vld [vmem:[#allocation2 + $0x54] sm:$0xf0]  ;;  %v4863_v10 = vld [vmem:[#allocation2 + $0x48] sm:$0xf]  ;;  %v4849_v56 = vld [vmem:[#allocation2 + $0x38] sm:$0xf0] }
 0x23b   : > { %v2384_v16 = vmul.f32 %v2329_v34, %v2288_v36  ;;  %v2385_v22 = vmul.f32 %v2329_v34, %v2289_v33  ;;  %3242 = vmatpush.bf16.msrb.mxu0 %v4916_v21  ;;  %3289 = vmatpush.bf16.msra.mxu1 %v5076_v53  ;;  %v4742_v34 = vld [vmem:[%s7614_s1 + $0x188] sm:$0xff] }
 0x23c   : > { %v2388_v45 = vmul.f32 %v2331_v35, %v2292_v60  ;;  %v2389_v59 = vmul.f32 %v2331_v35, %v2293_v62  ;;  %v2370_v55 = vmul.f32 %v2322_v9, %v2274_v17  ;;  %v2371_v49 = vmul.f32 %v2322_v9, %v2275_v18  ;;  %3013 = vmatmul.bf16.gmra.mxu2 %v6794_v58  ;;  %v4847_v21 = vld [vmem:[#allocation2 + $0x28] sm:$0xf] }
 0x23d   : > { %v2425_v50 = vpack.c.bf16 %v2385_v22, %v2384_v16  ;;  %3111 = vmatmul.bf16.gmra.mxu1 %v6794_v58  ;;  %v4880_v60 = vor.u32 %v5243_v2, %v4879_v38  ;;  %v2282_v17 = vunpack.c.l.bf16 %v4745_v40  ;;  %v4868_v16 = vor.u32 %v5237_v52, %v4865_v30  ;;  %v5233_v22 = vld [vmem:[#allocation2 + $0x2c] sm:$0xf]  ;;  %v5220_v52 = vld [vmem:[%s6578_s22 + $0x44] sm:$0xf] }
 0x23e   : > { %v2427_v31 = vpack.c.bf16 %v2389_v59, %v2388_v45  ;;  %v2418_v36 = vpack.c.bf16 %v2371_v49, %v2370_v55  ;;  %3145 = vmatpush.bf16.msra.mxu2 %v4896_v54  ;;  %3192 = vmatpush.bf16.msrb.mxu3 %v5056_v8  ;;  %v2132_v33 = vpop.permute.xlu0 %2131  ;;  %v4864_v54 = vor.u32 %v5239_v1, %v4863_v10  ;;  %v5218_v8 = vld [vmem:[%s6578_s22 + $0x34] sm:$0xf]  ;;  %v2276_v45 = vunpack.c.l.bf16 %v4742_v34  ;;  %v5023_v49 = vld [vmem:[#allocation2 + $0x188] sm:$0xf]  ;;  %v5277_v43 = vld [vmem:[#allocation2 + $0x18c] sm:$0xf] }
 0x23f   : > { %2457 = vst [vmem:[#allocation2 + $0x178] sm:$0xff] %v2425_v50  ;;  %3243 = vmatpush.bf16.msrb.mxu0 %v4900_v63  ;;  %3290 = vmatpush.bf16.msra.mxu1 %v5060_v61  ;;  %v2137_v62 = vperm.slane %v2132_v33, %v6116_v12  ;;  %v2148_v57 = vpop.permute.xlu1 %2147  ;;  %v5039_v6 = vld [vmem:[#allocation2 + $0x1a8] sm:$0xf]  ;;  %v5281_v41 = vld [vmem:[#allocation2 + $0x1ac] sm:$0xf]  ;;  %v4848_v55 = vor.u32 %v5235_v19, %v4847_v21  ;;  %v2277_v40 = vunpack.c.h.bf16 %v4742_v34  ;;  %v2280_v63 = vunpack.c.l.bf16 %v4744_v24 }
 0x240   : > { %2459 = vst [vmem:[#allocation2 + $0x198] sm:$0xff] %v2427_v31  ;;  %v2153_v14 = vperm.slane %v2148_v57, %v6116_v12  ;;  %v5040_v18 = vor.u32 %v5283_v11, %v5039_v6  ;;  %v5044_v46 = vor.u32 %v5281_v41, %v5041_v23  ;;  %v2281_v61 = vunpack.c.h.bf16 %v4744_v24  ;;  %v5229_v57 = vld [vmem:[#allocation2 + $0xc] sm:$0xf]  ;;  %v4993_v34 = vld [vmem:[#allocation2 + $0x158] sm:$0xf0] }
 0x241   : > { %2450 = vst [vmem:[#allocation2 + $0x108] sm:$0xff] %v2418_v36  ;;  %v2324_v20 = vunpack.c.l.bf16 %v2137_v62  ;;  %v6820_v26 = vor.u32 %v5218_v8, %v4785_v27  ;;  %v5273_v1 = vld [vmem:[#allocation2 + $0x16c] sm:$0xf] }
 0x242   : > { %v2326_v44 = vunpack.c.l.bf16 %v2153_v14  ;;  %3146 = vmatpush.bf16.msra.mxu2 %v4880_v60  ;;  %3193 = vmatpush.bf16.msrb.mxu3 %v5040_v18  ;;  %v5231_v14 = vld [vmem:[#allocation2 + $0x14] sm:$0xf0]  ;;  %v5007_v18 = vld [vmem:[#allocation2 + $0x168] sm:$0xf]  ;;  %v4793_v24 = vld [vmem:[%s6578_s22 + $0x48] sm:$0xf0] }
 0x243   : > { %v2374_v53 = vmul.f32 %v2324_v20, %v2278_v37  ;;  %v2375_v51 = vmul.f32 %v2324_v20, %v2279_v32  ;;  %3244 = vmatpush.bf16.msrb.mxu0 %v4884_v5  ;;  %3291 = vmatpush.bf16.msra.mxu1 %v5044_v46  ;;  %v4852_v37 = vor.u32 %v5233_v22, %v4849_v56  ;;  %v4831_v32 = vld [vmem:[#allocation2 + $0x8] sm:$0xf]  ;;  %v4833_v5 = vld [vmem:[#allocation2 + $0x18] sm:$0xf0] }
 0x244   : > { %v2378_v35 = vmul.f32 %v2326_v44, %v2282_v17  ;;  %v2379_v9 = vmul.f32 %v2326_v44, %v2283_v28  ;;  %v4832_v46 = vor.u32 %v5231_v14, %v4831_v32  ;;  %v4836_v10 = vor.u32 %v5229_v57, %v4833_v5  ;;  %v4817_v14 = vld [vmem:[%s6578_s22 + $0x78] sm:$0xf0] }
 0x245   : > { %v2420_v39 = vpack.c.bf16 %v2375_v51, %v2374_v53  ;;  %v5271_v51 = vld [vmem:[#allocation2 + $0x154] sm:$0xf0] }
 0x246   : > { %v2422_v2 = vpack.c.bf16 %v2379_v9, %v2378_v35  ;;  %3147 = vmatpush.bf16.msra.mxu2 %v4864_v54  ;;  %v2124_v59 = vpop.permute.xlu0 %2123  ;;  %v5275_v62 = vld [vmem:[#allocation2 + $0x174] sm:$0xf0]  ;;  %v5009_v6 = vld [vmem:[#allocation2 + $0x178] sm:$0xf0] }
 0x247   : > { %2452 = vst [vmem:[#allocation2 + $0x128] sm:$0xff] %v2420_v39  ;;  %3245 = vmatpush.bf16.msrb.mxu0 %v4868_v16  ;;  %v2129_v50 = vperm.slane %v2124_v59, %v6116_v12  ;;  %v2140_v38 = vpop.permute.xlu1 %2139  ;;  %v5279_v31 = vld [vmem:[#allocation2 + $0x194] sm:$0xf0]  ;;  %v5025_v36 = vld [vmem:[#allocation2 + $0x198] sm:$0xf0]  ;;  %v5008_v20 = vor.u32 %v5275_v62, %v5007_v18  ;;  %v5012_v30 = vor.u32 %v5273_v1, %v5009_v6 }
 0x248   : > { %2454 = vst [vmem:[#allocation2 + $0x148] sm:$0xff] %v2422_v2  ;;  %v2145_v33 = vperm.slane %v2140_v38, %v6116_v12  ;;  %v5024_v60 = vor.u32 %v5279_v31, %v5023_v49  ;;  %v5028_v11 = vor.u32 %v5277_v43, %v5025_v36  ;;  %3077 = vmatmul.bf16.gmra.mxu3 %v6680_v13  ;;  %v4959_v49 = vld [vmem:[#allocation2 + $0x108] sm:$0xf]  ;;  %v5261_v56 = vld [vmem:[#allocation2 + $0x10c] sm:$0xf] }
 0x249   : > { %v2323_v23 = vunpack.c.l.bf16 %v2129_v50  ;;  %v4801_v38 = vld [vmem:[%s6578_s22 + $0x58] sm:$0xf0] }
 0x24a   : > { %v2325_v17 = vunpack.c.l.bf16 %v2145_v33  ;;  %3148 = vmatpush.bf16.msra.mxu2 %v4848_v55  ;;  %3194 = vmatpush.bf16.msrb.mxu3 %v5024_v60 }
 0x24b   : > { %v2372_v41 = vmul.f32 %v2323_v23, %v2276_v45  ;;  %v2373_v28 = vmul.f32 %v2323_v23, %v2277_v40  ;;  %3246 = vmatpush.bf16.msrb.mxu0 %v4852_v37  ;;  %3292 = vmatpush.bf16.msra.mxu1 %v5028_v11  ;;  %v6830_v45 = vor.u32 %v5220_v52, %v4793_v24  ;;  %v5224_v23 = vld [vmem:[%s6578_s22 + $0x64] sm:$0xf]  ;;  %v4809_v37 = vld [vmem:[%s6578_s22 + $0x68] sm:$0xf0] }
 0x24c   : > { %v2376_v12 = vmul.f32 %v2325_v17, %v2280_v63  ;;  %v2377_v42 = vmul.f32 %v2325_v17, %v2281_v61  ;;  %3018 = vmatmul.bf16.gmra.mxu2 %v6820_v26  ;;  %v5222_v61 = vld [vmem:[%s6578_s22 + $0x54] sm:$0xf]  ;;  %v6856_v32 = vor.u32 %v5224_v23, %v4809_v37 }
 0x24d   : > { %v2419_v44 = vpack.c.bf16 %v2373_v28, %v2372_v41  ;;  %3116 = vmatmul.bf16.gmra.mxu1 %v6820_v26  ;;  %v6844_v36 = vor.u32 %v5222_v61, %v4801_v38  ;;  %v5226_v28 = vld [vmem:[%s6578_s22 + $0x74] sm:$0xf]  ;;  %s4653_s22 = sshll.u32 %s304_s8, 9 }
 0x24e   : > { %v2421_v53 = vpack.c.bf16 %v2377_v42, %v2376_v12  ;;  %3149 = vmatpush.bf16.msra.mxu2 %v4832_v46  ;;  %3195 = vmatpush.bf16.msrb.mxu3 %v5008_v20  ;;  %v4975_v39 = vld [vmem:[#allocation2 + $0x128] sm:$0xf]  ;;  %v5265_v22 = vld [vmem:[#allocation2 + $0x12c] sm:$0xf]  ;;  %v6872_v12 = vor.u32 %v5226_v28, %v4817_v14  ;;  %s7019_s16 = scalar_lea.vmem [#allocation3], %s4653_s22 }
 0x24f   : > { %2451 = vst [vmem:[#allocation2 + $0x118] sm:$0xff] %v2419_v44  ;;  %3247 = vmatpush.bf16.msrb.mxu0 %v4836_v10  ;;  %3293 = vmatpush.bf16.msra.mxu1 %v5012_v30  ;;  %v4991_v21 = vld [vmem:[#allocation2 + $0x148] sm:$0xf]  ;;  %v5269_v19 = vld [vmem:[#allocation2 + $0x14c] sm:$0xf] }
 0x250   : > { %2453 = vst [vmem:[#allocation2 + $0x138] sm:$0xff] %v2421_v53  ;;  %v4992_v35 = vor.u32 %v5271_v51, %v4991_v21  ;;  %v4996_v9 = vor.u32 %v5269_v19, %v4993_v34 }
 0x252   : > { %3196 = vmatpush.bf16.msrb.mxu3 %v4992_v35  ;;  %3248 = vmatmul.bf16.vlgmr.msrb.gmra.mxu0 %v6633_v3 }
 0x253   : > { %3294 = vmatpush.bf16.msra.mxu1 %v4996_v9 }
 0x254   : > { %v6825_v54 = vpop.f32.mrf.mxu2 }
 0x256   : > { %v5263_v59 = vld [vmem:[#allocation2 + $0x114] sm:$0xf0]  ;;  %v4961_v55 = vld [vmem:[#allocation2 + $0x118] sm:$0xf0] }
 0x257   : > { %v5267_v16 = vld [vmem:[#allocation2 + $0x134] sm:$0xf0]  ;;  %v4977_v8 = vld [vmem:[#allocation2 + $0x138] sm:$0xf0]  ;;  %v4960_v43 = vor.u32 %v5263_v59, %v4959_v49  ;;  %v4964_v40 = vor.u32 %v5261_v56, %v4961_v55 }
 0x258   : > { %v4976_v27 = vor.u32 %v5267_v16, %v4975_v39  ;;  %v4980_v2 = vor.u32 %v5265_v22, %v4977_v8  ;;  %3082 = vmatmul.bf16.gmra.mxu3 %v6617_v7 }
 0x25a   : > { %3197 = vmatpush.bf16.msrb.mxu3 %v4976_v27  ;;  %3295 = vmatpush.bf16.msra.mxu1 %v4980_v2  ;;  %v6842_v31 = vpop.f32.mrf.mxu3 }
 0x25c   : > { %3023 = vmatmul.bf16.gmra.mxu2 %v6830_v45  ;;  %v6833_v50 = vpop.f32.mrf.mxu2 }
 0x25d   : > { %3121 = vmatmul.bf16.gmra.mxu1 %v6830_v45 }
 0x25e   : > { %3198 = vmatpush.bf16.msrb.mxu3 %v4960_v43  ;;  %3296 = vmatpush.bf16.msra.mxu1 %v4964_v40 }
 0x262   : > { %3253 = vmatmul.bf16.gmra.mxu0 %v6668_v15  ;;  %v6850_v60 = vpop.f32.mrf.mxu3 }
 0x264   : > { %v6837_v63 = vpop.f32.mrf.mxu2 }
 0x265   : > { %v2955_v11 = vpop.f32.mrf.mxu1 }
 0x268   : > { %3087 = vmatmul.bf16.gmra.mxu3 %v6652_v47 }
 0x26a   : > { %v6860_v17 = vpop.f32.mrf.mxu3 }
 0x26c   : > { %3028 = vmatmul.bf16.gmra.mxu2 %v6844_v36  ;;  %v6848_v33 = vpop.f32.mrf.mxu2 }
 0x26d   : > { %3126 = vmatmul.bf16.gmra.mxu1 %v6844_v36  ;;  %v2957_v57 = vpop.f32.mrf.mxu1 }
 0x272   : > { %3258 = vmatmul.bf16.gmra.mxu0 %v6588_v25  ;;  %v6864_v6 = vpop.f32.mrf.mxu3 }
 0x274   : > { %v6858_v62 = vpop.f32.mrf.mxu2 }
 0x275   : > { %v2960_v18 = vpop.f32.mrf.mxu1 }
 0x278   : > { %3199 = vmatmul.bf16.vlgmr.msrb.gmra.mxu3 %v6724_v0 }
 0x27a   : > { %v3053_v42 = vpop.f32.mrf.mxu3 }
 0x27c   : > { %3033 = vmatmul.bf16.gmra.mxu2 %v6856_v32  ;;  %v6866_v41 = vpop.f32.mrf.mxu2 }
 0x27d   : > { %3131 = vmatmul.bf16.gmra.mxu1 %v6856_v32  ;;  %v2962_v5 = vpop.f32.mrf.mxu1 }
 0x282   : > { %3263 = vmatmul.bf16.gmra.mxu0 %v6609_v48  ;;  %v3055_v20 = vpop.f32.mrf.mxu3 }
 0x284   : > { %v6875_v46 = vpop.f32.mrf.mxu2 }
 0x288   : > { %3204 = vmatmul.bf16.gmra.mxu3 %v6755_v4 }
 0x28a   : > { %v3058_v44 = vpop.f32.mrf.mxu3 }
 0x28c   : > { %3038 = vmatmul.bf16.gmra.mxu2 %v6872_v12  ;;  %v6880_v1 = vpop.f32.mrf.mxu2 }
 0x28d   : > { %3136 = vmatmul.bf16.gmra.mxu1 %v6872_v12 }
 0x292   : > { %3268 = vmatmul.bf16.gmra.mxu0 %v6642_v29  ;;  %v3060_v34 = vpop.f32.mrf.mxu3 }
 0x298   : > { %3209 = vmatmul.bf16.gmra.mxu3 %v6794_v58 }
 0x299   : > { %v3102_v10 = vpop.f32.mrf.mxu1 }
 0x29a   : > { %v6883_v30 = vadd.f32 %v3102_v10, %v3053_v42  ;;  %v3063_v52 = vpop.f32.mrf.mxu3 }
 0x29c   : > { %3150 = vmatmul.bf16.vlgmr.msra.gmra.mxu2 %v6633_v3 }
 0x29d   : > { %3297 = vmatmul.bf16.vlgmr.msra.gmra.mxu1 %v6724_v0 }
 0x29e   : > { %v3004_v53 = vpop.f32.mrf.mxu2 }
 0x29f   : > { %v6886_v51 = vadd.f32 %v3004_v53, %v2955_v11 }
 0x2a1   : > { %v3104_v21 = vpop.f32.mrf.mxu1  ;;  %v3435_v19 = vadd.f32 %v6883_v30, %v6886_v51 }
 0x2a2   : > { %3273 = vmatmul.bf16.gmra.mxu0 %v6680_v13  ;;  %v6894_v3 = vadd.f32 %v3104_v21, %v3055_v20  ;;  %v3065_v8 = vpop.f32.mrf.mxu3 }
 0x2a3   : > { %3436 = vadd.xlane.f32.xlu1 %v3435_v19 }
 0x2a6   : > { %v3006_v35 = vpop.f32.mrf.mxu2 }
 0x2a7   : > { %v6892_v9 = vadd.f32 %v3006_v35, %v2957_v57 }
 0x2a8   : > { %3214 = vmatmul.bf16.gmra.mxu3 %v6820_v26 }
 0x2a9   : > { %v3107_v0 = vpop.f32.mrf.mxu1  ;;  %v3438_v24 = vadd.f32 %v6894_v3, %v6892_v9 }
 0x2aa   : > { %v6899_v39 = vadd.f32 %v3107_v0, %v3058_v44  ;;  %v3068_v49 = vpop.f32.mrf.mxu3 }
 0x2ab   : > { %3439 = vadd.xlane.f32.xlu2 %v3438_v24 }
 0x2ac   : > { %3155 = vmatmul.bf16.gmra.mxu2 %v6668_v15 }
 0x2ad   : > { %3302 = vmatmul.bf16.gmra.mxu1 %v6755_v4 }
 0x2ae   : > { %v3009_v16 = vpop.f32.mrf.mxu2 }
 0x2af   : > { %v6902_v22 = vadd.f32 %v3009_v16, %v2960_v18 }
 0x2b1   : > { %v3109_v27 = vpop.f32.mrf.mxu1  ;;  %v3441_v2 = vadd.f32 %v6899_v39, %v6902_v22 }
 0x2b2   : > { %3278 = vmatmul.bf16.gmra.mxu0 %v6617_v7  ;;  %v6910_v15 = vadd.f32 %v3109_v27, %v3060_v34  ;;  %v3070_v38 = vpop.f32.mrf.mxu3 }
 0x2b3   : > { %3442 = vadd.xlane.f32.xlu0 %v3441_v2 }
 0x2b6   : > { %v3011_v59 = vpop.f32.mrf.mxu2 }
 0x2b7   : > { %v6908_v55 = vadd.f32 %v3011_v59, %v2962_v5 }
 0x2b8   : > { %3219 = vmatmul.bf16.gmra.mxu3 %v6830_v45 }
 0x2b9   : > { %v3444_v4 = vadd.f32 %v6910_v15, %v6908_v55 }
 0x2ba   : > { %v3112_v56 = vpop.f32.mrf.mxu1  ;;  %v3073_v57 = vpop.f32.mrf.mxu3 }
 0x2bb   : > { %3445 = vadd.xlane.f32.xlu2 %v3444_v4  ;;  %v6916_v43 = vadd.f32 %v3112_v56, %v3063_v52 }
 0x2bc   : > { %3160 = vmatmul.bf16.gmra.mxu2 %v6588_v25 }
 0x2bd   : > { %3307 = vmatmul.bf16.gmra.mxu1 %v6794_v58 }
 0x2bf   : > { %v3014_v40 = vpop.f32.mrf.mxu2 }
 0x2c0   : > { %v6919_v61 = vadd.f32 %v3014_v40, %v6825_v54 }
 0x2c2   : > { %v3114_v11 = vpop.f32.mrf.mxu1  ;;  %v3447_v23 = vadd.f32 %v6916_v43, %v6919_v61  ;;  %3283 = vmatmul.bf16.gmra.mxu0 %v6652_v47 }
 0x2c3   : > { %v6928_v58 = vadd.f32 %v3114_v11, %v3065_v8 }
 0x2c4   : > { %3448 = vadd.xlane.f32.xlu1 %v3447_v23 }
 0x2c7   : > { %v3016_v37 = vpop.f32.mrf.mxu2 }
 0x2c8   : > { %v6926_v25 = vadd.f32 %v3016_v37, %v6833_v50  ;;  %v3075_v50 = vpop.f32.mrf.mxu3  ;;  %3224 = vmatmul.bf16.gmra.mxu3 %v6844_v36 }
 0x2ca   : > { %v3117_v28 = vpop.f32.mrf.mxu1  ;;  %v3450_v54 = vadd.f32 %v6928_v58, %v6926_v25 }
 0x2cb   : > { %v6934_v14 = vadd.f32 %v3117_v28, %v3068_v49 }
 0x2cc   : > { %3165 = vmatmul.bf16.gmra.mxu2 %v6609_v48  ;;  %3451 = vadd.xlane.f32.xlu2 %v3450_v54 }
 0x2cd   : > { %3312 = vmatmul.bf16.gmra.mxu1 %v6820_v26 }
 0x2cf   : > { %v3019_v18 = vpop.f32.mrf.mxu2  ;;  %v3249_v28 = vpop.f32.mrf.mxu0 }
 0x2d0   : > { %v6937_v42 = vadd.f32 %v3019_v18, %v6837_v63  ;;  %v3078_v26 = vpop.f32.mrf.mxu3 }
 0x2d2   : > { %v3119_v20 = vpop.f32.mrf.mxu1  ;;  %v3453_v5 = vadd.f32 %v6934_v14, %v6937_v42 }
 0x2d3   : > { %v6945_v10 = vadd.f32 %v3119_v20, %v3070_v38 }
 0x2d4   : > { %3454 = vadd.xlane.f32.xlu0 %v3453_v5 }
 0x2d7   : > { %v3021_v44 = vpop.f32.mrf.mxu2  ;;  %v3251_v20 = vpop.f32.mrf.mxu0 }
 0x2d8   : > { %v6943_v48 = vadd.f32 %v3021_v44, %v6848_v33  ;;  %v3080_v33 = vpop.f32.mrf.mxu3  ;;  %3229 = vmatmul.bf16.gmra.mxu3 %v6856_v32 }
 0x2da   : > { %v3122_v53 = vpop.f32.mrf.mxu1  ;;  %v3456_v63 = vadd.f32 %v6945_v10, %v6943_v48 }
 0x2db   : > { %v6951_v34 = vadd.f32 %v3122_v53, %v3073_v57 }
 0x2dc   : > { %3170 = vmatmul.bf16.gmra.mxu2 %v6642_v29  ;;  %3457 = vadd.xlane.f32.xlu1 %v3456_v63 }
 0x2dd   : > { %3317 = vmatmul.bf16.gmra.mxu1 %v6830_v45 }
 0x2df   : > { %v3024_v21 = vpop.f32.mrf.mxu2 }
 0x2e0   : > { %v6954_v19 = vadd.f32 %v3024_v21, %v6858_v62  ;;  %v3083_v45 = vpop.f32.mrf.mxu3  ;;  %v3254_v21 = vpop.f32.mrf.mxu0 }
 0x2e2   : > { %v3124_v35 = vpop.f32.mrf.mxu1  ;;  %v3459_v52 = vadd.f32 %v6951_v34, %v6954_v19 }
 0x2e3   : > { %v6962_v24 = vadd.f32 %v3124_v35, %v3075_v50 }
 0x2e4   : > { %3460 = vadd.xlane.f32.xlu2 %v3459_v52 }
 0x2e7   : > { %v3026_v0 = vpop.f32.mrf.mxu2 }
 0x2e8   : > { %v6960_v29 = vadd.f32 %v3026_v0, %v6866_v41  ;;  %v3085_v41 = vpop.f32.mrf.mxu3  ;;  %3234 = vmatmul.bf16.gmra.mxu3 %v6872_v12  ;;  %v3256_v0 = vpop.f32.mrf.mxu0 }
 0x2ea   : > { %v3127_v16 = vpop.f32.mrf.mxu1  ;;  %v3462_v62 = vadd.f32 %v6962_v24, %v6960_v29 }
 0x2eb   : > { %v6968_v8 = vadd.f32 %v3127_v16, %v3078_v26 }
 0x2ec   : > { %3175 = vmatmul.bf16.gmra.mxu2 %v6680_v13  ;;  %3463 = vadd.xlane.f32.xlu0 %v3462_v62 }
 0x2ed   : > { %3322 = vmatmul.bf16.gmra.mxu1 %v6844_v36  ;;  %7680 = vst [vmem:[#allocation8_spill] sm:$0xff] %v6968_v8 }
 0x2ef   : > { %v3029_v27 = vpop.f32.mrf.mxu2 }
 0x2f0   : > { %v6971_v2 = vadd.f32 %v3029_v27, %v6875_v46  ;;  %v3088_v36 = vpop.f32.mrf.mxu3 }
 0x2f2   : > { %7681 = vst [vmem:[#allocation9_spill] sm:$0xff] %v6971_v2  ;;  %v3129_v59 = vpop.f32.mrf.mxu1  ;;  %v3465_v49 = vadd.f32 %v6968_v8, %v6971_v2 }
 0x2f3   : > { %v6979_v56 = vadd.f32 %v3129_v59, %v3080_v33 }
 0x2f4   : > { %3466 = vadd.xlane.f32.xlu1 %v3465_v49  ;;  %v3259_v49 = vpop.f32.mrf.mxu0 }
 0x2f5   : > { %7683 = vst [vmem:[#allocation11_spill] sm:$0xff] %v6979_v56 }
 0x2f7   : > { %v3031_v4 = vpop.f32.mrf.mxu2 }
 0x2f8   : > { %v6977_v13 = vadd.f32 %v3031_v4, %v6880_v1  ;;  %v3090_v1 = vpop.f32.mrf.mxu3 }
 0x2fa   : > { %7682 = vst [vmem:[#allocation10_spill] sm:$0xff] %v6977_v13  ;;  %v3132_v40 = vpop.f32.mrf.mxu1  ;;  %v3468_v46 = vadd.f32 %v6979_v56, %v6977_v13 }
 0x2fb   : > { %v6985_v38 = vadd.f32 %v3132_v40, %v3083_v45 }
 0x2fc   : > { %3180 = vmatmul.bf16.gmra.mxu2 %v6617_v7  ;;  %3469 = vadd.xlane.f32.xlu2 %v3468_v46 }
 0x2fd   : > { %3327 = vmatmul.bf16.gmra.mxu1 %v6856_v32  ;;  %7684 = vst [vmem:[#allocation12_spill] sm:$0xff] %v6985_v38 }
 0x2ff   : > { %v3034_v11 = vpop.f32.mrf.mxu2 }
 0x300   : > { %v6988_v23 = vadd.f32 %v3034_v11, %v6842_v31  ;;  %v3200_v32 = vpop.f32.mrf.mxu3 }
 0x302   : > { %7685 = vst [vmem:[#allocation13_spill] sm:$0xff] %v6988_v23  ;;  %v3134_v37 = vpop.f32.mrf.mxu1  ;;  %v3471_v57 = vadd.f32 %v6985_v38, %v6988_v23 }
 0x303   : > { %v6995_v7 = vadd.f32 %v3134_v37, %v3085_v41  ;;  %v3261_v37 = vpop.f32.mrf.mxu0 }
 0x304   : > { %3472 = vadd.xlane.f32.xlu0 %v3471_v57 }
 0x305   : > { %7687 = vst [vmem:[#allocation15_spill] sm:$0xff] %v6995_v7 }
 0x307   : > { %v3036_v54 = vpop.f32.mrf.mxu2 }
 0x308   : > { %v6993_v18 = vadd.f32 %v3036_v54, %v6850_v60  ;;  %v3202_v26 = vpop.f32.mrf.mxu3 }
 0x30a   : > { %7686 = vst [vmem:[#allocation14_spill] sm:$0xff] %v6993_v18  ;;  %v3137_v50 = vpop.f32.mrf.mxu1  ;;  %v3474_v31 = vadd.f32 %v6995_v7, %v6993_v18 }
 0x30b   : > { %v7001_v5 = vadd.f32 %v3137_v50, %v3088_v36 }
 0x30c   : > { %3185 = vmatmul.bf16.gmra.mxu2 %v6652_v47  ;;  %3475 = vadd.xlane.f32.xlu1 %v3474_v31 }
 0x30d   : > { %3332 = vmatmul.bf16.gmra.mxu1 %v6872_v12  ;;  %7688 = vst [vmem:[#allocation16_spill] sm:$0xff] %v7001_v5 }
 0x30f   : > { %v3039_v44 = vpop.f32.mrf.mxu2 }
 0x310   : > { %v7004_v60 = vadd.f32 %v3039_v44, %v6860_v17  ;;  %v3205_v35 = vpop.f32.mrf.mxu3 }
 0x312   : > { %7689 = vst [vmem:[#allocation17_spill] sm:$0xff] %v7004_v60  ;;  %v3139_v53 = vpop.f32.mrf.mxu1  ;;  %v3477_v63 = vadd.f32 %v7001_v5, %v7004_v60 }
 0x313   : > { %v7013_v12 = vadd.f32 %v3139_v53, %v3090_v1 }
 0x314   : > { %3478 = vadd.xlane.f32.xlu2 %v3477_v63 }
 0x315   : > { %7691 = vst [vmem:[#allocation19_spill] sm:$0xff] %v7013_v12 }
 0x317   : > { %v3041_v33 = vpop.f32.mrf.mxu2 }
 0x318   : > { %v7011_v47 = vadd.f32 %v3041_v33, %v6864_v6  ;;  %v3207_v62 = vpop.f32.mrf.mxu3 }
 0x31a   : > { %7690 = vst [vmem:[#allocation18_spill] sm:$0xff] %v7011_v47  ;;  %v3298_v52 = vpop.f32.mrf.mxu1  ;;  %v3480_v17 = vadd.f32 %v7013_v12, %v7011_v47 }
 0x31b   : > { %v7017_v45 = vadd.f32 %v3298_v52, %v3249_v28 }
 0x31c   : > { %3481 = vadd.xlane.f32.xlu0 %v3480_v17 }
 0x31d   : > { %5078 = vst [vmem:[%s7019_s16 + $0x108] sm:$0xff] %v7017_v45 }
 0x31f   : > { %v3151_v6 = vpop.f32.mrf.mxu2 }
 0x320   : > { %v7023_v16 = vadd.f32 %v3200_v32, %v3151_v6  ;;  %v3210_v40 = vpop.f32.mrf.mxu3 }
 0x322   : > { %5077 = vst [vmem:[%s7019_s16 + $0x100] sm:$0xff] %v7023_v16  ;;  %v3300_v27 = vpop.f32.mrf.mxu1  ;;  %v3531_v41 = vadd.f32 %v7017_v45, %v7023_v16 }
 0x323   : > { %v7029_v59 = vadd.f32 %v3300_v27, %v3251_v20 }
 0x324   : > { %3532 = vadd.xlane.f32.xlu1 %v3531_v41 }
 0x325   : > { %5080 = vst [vmem:[%s7019_s16 + $0x118] sm:$0xff] %v7029_v59 }
 0x327   : > { %v3153_v4 = vpop.f32.mrf.mxu2 }
 0x328   : > { %v7033_v36 = vadd.f32 %v3202_v26, %v3153_v4  ;;  %v3212_v50 = vpop.f32.mrf.mxu3  ;;  %v3264_v26 = vpop.f32.mrf.mxu0 }
 0x32a   : > { %5079 = vst [vmem:[%s7019_s16 + $0x110] sm:$0xff] %v7033_v36  ;;  %v3303_v46 = vpop.f32.mrf.mxu1  ;;  %v3534_v11 = vadd.f32 %v7029_v59, %v7033_v36 }
 0x32b   : > { %v7039_v1 = vadd.f32 %v3303_v46, %v3254_v21 }
 0x32c   : > { %3535 = vadd.xlane.f32.xlu2 %v3534_v11 }
 0x32d   : > { %5082 = vst [vmem:[%s7019_s16 + $0x128] sm:$0xff] %v7039_v1 }
 0x32f   : > { %v3156_v57 = vpop.f32.mrf.mxu2 }
 0x330   : > { %v7043_v28 = vadd.f32 %v3205_v35, %v3156_v57  ;;  %v3215_v33 = vpop.f32.mrf.mxu3  ;;  %v3266_v6 = vpop.f32.mrf.mxu0 }
 0x332   : > { %5081 = vst [vmem:[%s7019_s16 + $0x120] sm:$0xff] %v7043_v28  ;;  %v3305_v54 = vpop.f32.mrf.mxu1  ;;  %v3537_v32 = vadd.f32 %v7039_v1, %v7043_v28 }
 0x333   : > { %v7049_v31 = vadd.f32 %v3305_v54, %v3256_v0 }
 0x334   : > { %3538 = vadd.xlane.f32.xlu0 %v3537_v32 }
 0x335   : > { %5084 = vst [vmem:[%s7019_s16 + $0x138] sm:$0xff] %v7049_v31 }
 0x337   : > { %v3158_v20 = vpop.f32.mrf.mxu2 }
 0x338   : > { %v7053_v44 = vadd.f32 %v3207_v62, %v3158_v20  ;;  %v3217_v27 = vpop.f32.mrf.mxu3  ;;  %v3269_v11 = vpop.f32.mrf.mxu0 }
 0x33a   : > { %5083 = vst [vmem:[%s7019_s16 + $0x130] sm:$0xff] %v7053_v44  ;;  %v3308_v53 = vpop.f32.mrf.mxu1  ;;  %v3540_v63 = vadd.f32 %v7049_v31, %v7053_v44 }
 0x33b   : > { %v7059_v21 = vadd.f32 %v3308_v53, %v3259_v49 }
 0x33c   : > { %3541 = vadd.xlane.f32.xlu1 %v3540_v63 }
 0x33d   : > { %5086 = vst [vmem:[%s7019_s16 + $0x148] sm:$0xff] %v7059_v21 }
 0x33f   : > { %v3161_v35 = vpop.f32.mrf.mxu2 }
 0x340   : > { %v7063_v52 = vadd.f32 %v3210_v40, %v3161_v35  ;;  %v3220_v54 = vpop.f32.mrf.mxu3 }
 0x342   : > { %5085 = vst [vmem:[%s7019_s16 + $0x140] sm:$0xff] %v7063_v52  ;;  %v3310_v17 = vpop.f32.mrf.mxu1  ;;  %v3543_v0 = vadd.f32 %v7059_v21, %v7063_v52 }
 0x343   : > { %v7069_v62 = vadd.f32 %v3310_v17, %v3261_v37 }
 0x344   : > { %3544 = vadd.xlane.f32.xlu2 %v3543_v0 }
 0x345   : > { %5088 = vst [vmem:[%s7019_s16 + $0x158] sm:$0xff] %v7069_v62 }
 0x347   : > { %v3163_v41 = vpop.f32.mrf.mxu2 }
 0x348   : > { %v7073_v49 = vadd.f32 %v3212_v50, %v3163_v41  ;;  %v3222_v17 = vpop.f32.mrf.mxu3 }
 0x34a   : > { %5087 = vst [vmem:[%s7019_s16 + $0x150] sm:$0xff] %v7073_v49  ;;  %v3313_v4 = vpop.f32.mrf.mxu1  ;;  %v3546_v40 = vadd.f32 %v7069_v62, %v7073_v49 }
 0x34b   : > { %v7079_v46 = vadd.f32 %v3313_v4, %v3264_v26  ;;  %v3271_v26 = vpop.f32.mrf.mxu0 }
 0x34c   : > { %3547 = vadd.xlane.f32.xlu0 %v3546_v40 }
 0x34d   : > { %5090 = vst [vmem:[%s7019_s16 + $0x168] sm:$0xff] %v7079_v46 }
 0x34f   : > { %v3166_v37 = vpop.f32.mrf.mxu2 }
 0x350   : > { %v7083_v57 = vadd.f32 %v3215_v33, %v3166_v37 }
 0x352   : > { %5089 = vst [vmem:[%s7019_s16 + $0x160] sm:$0xff] %v7083_v57  ;;  %v3315_v32 = vpop.f32.mrf.mxu1  ;;  %v3549_v50 = vadd.f32 %v7079_v46, %v7083_v57 }
 0x353   : > { %v7089_v20 = vadd.f32 %v3315_v32, %v3266_v6  ;;  %v3274_v4 = vpop.f32.mrf.mxu0  ;;  %v3225_v32 = vpop.f32.mrf.mxu3 }
 0x354   : > { %3550 = vadd.xlane.f32.xlu1 %v3549_v50 }
 0x355   : > { %5092 = vst [vmem:[%s7019_s16 + $0x178] sm:$0xff] %v7089_v20 }
 0x357   : > { %v3168_v53 = vpop.f32.mrf.mxu2 }
 0x358   : > { %v7093_v63 = vadd.f32 %v3217_v27, %v3168_v53 }
 0x35a   : > { %5091 = vst [vmem:[%s7019_s16 + $0x170] sm:$0xff] %v7093_v63  ;;  %v3318_v33 = vpop.f32.mrf.mxu1  ;;  %v3552_v35 = vadd.f32 %v7089_v20, %v7093_v63 }
 0x35b   : > { %v7099_v0 = vadd.f32 %v3318_v33, %v3269_v11  ;;  %v3276_v33 = vpop.f32.mrf.mxu0 }
 0x35c   : > { %3553 = vadd.xlane.f32.xlu2 %v3552_v35 }
 0x35d   : > { %5094 = vst [vmem:[%s7019_s16 + $0x188] sm:$0xff] %v7099_v0 }
 0x35f   : > { %v3171_v6 = vpop.f32.mrf.mxu2 }
 0x360   : > { %v7103_v41 = vadd.f32 %v3220_v54, %v3171_v6  ;;  %v3227_v6 = vpop.f32.mrf.mxu3 }
 0x362   : > { %5093 = vst [vmem:[%s7019_s16 + $0x180] sm:$0xff] %v7103_v41  ;;  %v3320_v27 = vpop.f32.mrf.mxu1  ;;  %v3555_v40 = vadd.f32 %v7099_v0, %v7103_v41 }
 0x363   : > { %v7109_v37 = vadd.f32 %v3320_v27, %v3271_v26  ;;  %v7123_v26 = vpop.xlane.xlu2 %3439  ;;  %v7125_v27 = vpop.xlane.xlu1 %3436 }
 0x364   : > { %3556 = vadd.xlane.f32.xlu0 %v3555_v40 }
 0x365   : > { %5096 = vst [vmem:[%s7019_s16 + $0x198] sm:$0xff] %v7109_v37 }
 0x367   : > { %v3173_v11 = vpop.f32.mrf.mxu2 }
 0x368   : > { %v7113_v50 = vadd.f32 %v3222_v17, %v3173_v11  ;;  %v3230_v5 = vpop.f32.mrf.mxu3 }
 0x36a   : > { %5095 = vst [vmem:[%s7019_s16 + $0x190] sm:$0xff] %v7113_v50  ;;  %v3323_v54 = vpop.f32.mrf.mxu1  ;;  %v3558_v53 = vadd.f32 %v7109_v37, %v7113_v50 }
 0x36b   : > { %v7119_v35 = vadd.f32 %v3323_v54, %v3274_v4  ;;  %v3279_v54 = vpop.f32.mrf.mxu0  ;;  %v7139_v47 = vpop.xlane.xlu1 %3448 }
 0x36c   : > { %3559 = vadd.xlane.f32.xlu1 %v3558_v53  ;;  %v7137_v53 = vpop.xlane.xlu2 %3445 }
 0x36d   : > { %7692 = vst [vmem:[#allocation20_spill] sm:$0xff] %v7119_v35 }
 0x36e   : > { %5098 = vst [vmem:[%s7019_s16 + $0x1a8] sm:$0xff] %v7119_v35 }
 0x36f   : > { %v3176_v17 = vpop.f32.mrf.mxu2 }
 0x370   : > { %v7127_v40 = vadd.f32 %v3225_v32, %v3176_v17  ;;  %v3232_v23 = vpop.f32.mrf.mxu3 }
 0x372   : > { %7693 = vst [vmem:[#allocation21_spill] sm:$0xff] %v7127_v40  ;;  %v3325_v11 = vpop.f32.mrf.mxu1  ;;  %v3561_v12 = vadd.f32 %v7119_v35, %v7127_v40 }
 0x373   : > { %5097 = vst [vmem:[%s7019_s16 + $0x1a0] sm:$0xff] %v7127_v40  ;;  %v7133_v4 = vadd.f32 %v3325_v11, %v3276_v33  ;;  %v3281_v18 = vpop.f32.mrf.mxu0 }
 0x374   : > { %3562 = vadd.xlane.f32.xlu2 %v3561_v12  ;;  %v7149_v12 = vpop.xlane.xlu0 %3442  ;;  %v7153_v7 = vpop.xlane.xlu2 %3451 }
 0x375   : > { %7694 = vst [vmem:[#allocation22_spill] sm:$0xff] %v7133_v4 }
 0x376   : > { %5100 = vst [vmem:[%s7019_s16 + $0x1b8] sm:$0xff] %v7133_v4 }
 0x377   : > { %v3178_v32 = vpop.f32.mrf.mxu2 }
 0x378   : > { %v7141_v17 = vadd.f32 %v3227_v6, %v3178_v32  ;;  %v7155_v6 = vpop.xlane.xlu1 %3457 }
 0x37a   : > { %7695 = vst [vmem:[#allocation23_spill] sm:$0xff] %v7141_v17  ;;  %v3328_v60 = vpop.f32.mrf.mxu1  ;;  %v3564_v33 = vadd.f32 %v7133_v4, %v7141_v17 }
 0x37b   : > { %5099 = vst [vmem:[%s7019_s16 + $0x1b0] sm:$0xff] %v7141_v17  ;;  %v7147_v11 = vadd.f32 %v3328_v60, %v3279_v54  ;;  %v3284_v13 = vpop.f32.mrf.mxu0 }
 0x37c   : > { %3565 = vadd.xlane.f32.xlu0 %v3564_v33  ;;  %v7165_v4 = vpop.xlane.xlu0 %3454  ;;  %v7169_v17 = vpop.xlane.xlu2 %3460 }
 0x37d   : > { %7696 = vst [vmem:[#allocation24_spill] sm:$0xff] %v7147_v11 }
 0x37e   : > { %5102 = vst [vmem:[%s7019_s16 + $0x1c8] sm:$0xff] %v7147_v11 }
 0x37f   : > { %v3181_v32 = vpop.f32.mrf.mxu2 }
 0x380   : > { %v7157_v38 = vadd.f32 %v3230_v5, %v3181_v32  ;;  %v7171_v56 = vpop.xlane.xlu1 %3466 }
 0x381   : > { %7699 = vst [vmem:[#allocation27_spill] sm:$0xff] %v7171_v56 }
 0x382   : > { %7697 = vst [vmem:[#allocation25_spill] sm:$0xff] %v7157_v38  ;;  %v3330_v60 = vpop.f32.mrf.mxu1  ;;  %v3567_v54 = vadd.f32 %v7147_v11, %v7157_v38 }
 0x383   : > { %5101 = vst [vmem:[%s7019_s16 + $0x1c0] sm:$0xff] %v7157_v38  ;;  %v7163_v33 = vadd.f32 %v3330_v60, %v3281_v18 }
 0x384   : > { %3568 = vadd.xlane.f32.xlu1 %v3567_v54  ;;  %v3235_v54 = vpop.f32.mrf.mxu3  ;;  %v7181_v38 = vpop.xlane.xlu0 %3463 }
 0x385   : > { %7698 = vst [vmem:[#allocation26_spill] sm:$0xff] %v7163_v33  ;;  %v7185_v8 = vpop.xlane.xlu2 %3469 }
 0x386   : > { %5104 = vst [vmem:[%s7019_s16 + $0x1d8] sm:$0xff] %v7163_v33 }
 0x387   : > { %v3183_v5 = vpop.f32.mrf.mxu2  ;;  %7702 = vst [vmem:[#allocation30_spill] sm:$0xff] %v7185_v8 }
 0x388   : > { %v7173_v32 = vadd.f32 %v3232_v23, %v3183_v5  ;;  %v7187_v23 = vpop.xlane.xlu1 %3475 }
 0x389   : > { %7703 = vst [vmem:[#allocation31_spill] sm:$0xff] %v7187_v23 }
 0x38a   : > { %7700 = vst [vmem:[#allocation28_spill] sm:$0xff] %v7173_v32  ;;  %v3333_v11 = vpop.f32.mrf.mxu1  ;;  %v3570_v18 = vadd.f32 %v7163_v33, %v7173_v32  ;;  %v3286_v33 = vpop.f32.mrf.mxu0 }
 0x38b   : > { %5103 = vst [vmem:[%s7019_s16 + $0x1d0] sm:$0xff] %v7173_v32  ;;  %v7179_v60 = vadd.f32 %v3333_v11, %v3284_v13 }
 0x38c   : > { %3571 = vadd.xlane.f32.xlu2 %v3570_v18  ;;  %v7197_v32 = vpop.xlane.xlu0 %3472  ;;  %v3237_v23 = vpop.f32.mrf.mxu3 }
 0x38d   : > { %7701 = vst [vmem:[#allocation29_spill] sm:$0xff] %v7179_v60  ;;  %v7201_v8 = vpop.xlane.xlu2 %3478 }
 0x38e   : > { %5106 = vst [vmem:[%s7019_s16 + $0x1e8] sm:$0xff] %v7179_v60 }
 0x38f   : > { %v3186_v5 = vpop.f32.mrf.mxu2  ;;  %7706 = vst [vmem:[#allocation34_spill] sm:$0xff] %v7201_v8 }
 0x390   : > { %v7189_v2 = vadd.f32 %v3235_v54, %v3186_v5 }
 0x392   : > { %7704 = vst [vmem:[#allocation32_spill] sm:$0xff] %v7189_v2  ;;  %v3335_v13 = vpop.f32.mrf.mxu1  ;;  %v3573_v11 = vadd.f32 %v7179_v60, %v7189_v2 }
 0x393   : > { %5105 = vst [vmem:[%s7019_s16 + $0x1e0] sm:$0xff] %v7189_v2  ;;  %v7195_v18 = vadd.f32 %v3335_v13, %v3286_v33 }
 0x394   : > { %3574 = vadd.xlane.f32.xlu0 %v3573_v11  ;;  %v7220_v2 = vpop.xlane.xlu0 %3481 }
 0x395   : > { %7705 = vst [vmem:[#allocation33_spill] sm:$0xff] %v7195_v18 }
 0x396   : > { %5108 = vst [vmem:[%s7019_s16 + $0x1f8] sm:$0xff] %v7195_v18 }
 0x397   : > { %v3188_v35 = vpop.f32.mrf.mxu2  ;;  %v3533_v54 = vpop.xlane.xlu1 %3532 }
 0x398   : > { %v7203_v5 = vadd.f32 %v3237_v23, %v3188_v35  ;;  %v3579_v40 = vadd.f32 %v3533_v54, %v7125_v27 }
 0x39a   : > { %7707 = vst [vmem:[#allocation35_spill] sm:$0xff] %v7203_v5  ;;  %v7208_v56 = vmul.f32 0.001953125, %v3579_v40  ;;  %v3576_v33 = vadd.f32 %v7195_v18, %v7203_v5 }
 0x39b   : > { %5107 = vst [vmem:[%s7019_s16 + $0x1f0] sm:$0xff] %v7203_v5 }
 0x39c   : > { %3577 = vadd.xlane.f32.xlu1 %v3576_v33  ;;  %v3739_v13 = vsub.f32 %v7023_v16, %v7208_v56  ;;  %v3740_v11 = vsub.f32 %v7017_v45, %v7208_v56  ;;  %v3611_v35 = vsub.f32 %v6886_v51, %v7208_v56  ;;  %v3612_v27 = vsub.f32 %v6883_v30, %v7208_v56 }
 0x39e   : > { %v3771_v23 = vmul.f32 %v3739_v13, %v3739_v13  ;;  %v3772_v54 = vmul.f32 %v3740_v11, %v3740_v11  ;;  %v3643_v40 = vmul.f32 %v3611_v35, %v3611_v35  ;;  %v3644_v60 = vmul.f32 %v3612_v27, %v3612_v27 }
 0x39f   : > { %v3536_v18 = vpop.xlane.xlu2 %3535 }
 0x3a0   : > { %v3580_v33 = vadd.f32 %v3536_v18, %v7123_v26  ;;  %v3803_v5 = vadd.f32 %v3772_v54, %v3771_v23  ;;  %v3675_v16 = vadd.f32 %v3644_v60, %v3643_v40 }
 0x3a2   : > { %v7223_v8 = vmul.f32 0.001953125, %v3580_v33  ;;  %3804 = vadd.xlane.f32.xlu0 %v3803_v5  ;;  %3676 = vadd.xlane.f32.xlu2 %v3675_v16 }
 0x3a4   : > { %v3741_v45 = vsub.f32 %v7033_v36, %v7223_v8  ;;  %v3742_v13 = vsub.f32 %v7029_v59, %v7223_v8  ;;  %v3613_v11 = vsub.f32 %v6892_v9, %v7223_v8  ;;  %v3614_v35 = vsub.f32 %v6894_v3, %v7223_v8 }
 0x3a6   : > { %v3773_v27 = vmul.f32 %v3741_v45, %v3741_v45  ;;  %v3774_v26 = vmul.f32 %v3742_v13, %v3742_v13  ;;  %v3645_v18 = vmul.f32 %v3613_v11, %v3613_v11  ;;  %v3646_v60 = vmul.f32 %v3614_v35, %v3614_v35 }
 0x3a7   : > { %v3539_v23 = vpop.xlane.xlu0 %3538 }
 0x3a8   : > { %v3581_v5 = vadd.f32 %v3539_v23, %v7149_v12  ;;  %v3806_v54 = vadd.f32 %v3774_v26, %v3773_v27  ;;  %v3678_v40 = vadd.f32 %v3646_v60, %v3645_v18 }
 0x3aa   : > { %v7234_v33 = vmul.f32 0.001953125, %v3581_v5  ;;  %3807 = vadd.xlane.f32.xlu1 %v3806_v54  ;;  %3679 = vadd.xlane.f32.xlu0 %v3678_v40 }
 0x3ac   : > { %v3615_v59 = vsub.f32 %v6902_v22, %v7234_v33  ;;  %v3616_v36 = vsub.f32 %v6899_v39, %v7234_v33  ;;  %v3743_v16 = vsub.f32 %v7043_v28, %v7234_v33  ;;  %v3744_v45 = vsub.f32 %v7039_v1, %v7234_v33 }
 0x3ae   : > { %v3647_v13 = vmul.f32 %v3615_v59, %v3615_v59  ;;  %v3648_v12 = vmul.f32 %v3616_v36, %v3616_v36  ;;  %v3775_v11 = vmul.f32 %v3743_v16, %v3743_v16  ;;  %v3776_v35 = vmul.f32 %v3744_v45, %v3744_v45 }
 0x3af   : > { %v3542_v27 = vpop.xlane.xlu1 %3541 }
 0x3b0   : > { %v3582_v26 = vadd.f32 %v3542_v27, %v7137_v53  ;;  %v3681_v18 = vadd.f32 %v3648_v12, %v3647_v13  ;;  %v3809_v60 = vadd.f32 %v3776_v35, %v3775_v11 }
 0x3b2   : > { %v7245_v23 = vmul.f32 0.001953125, %v3582_v26  ;;  %3682 = vadd.xlane.f32.xlu1 %v3681_v18  ;;  %3810 = vadd.xlane.f32.xlu2 %v3809_v60 }
 0x3b4   : > { %v3745_v5 = vsub.f32 %v7053_v44, %v7245_v23  ;;  %v3746_v28 = vsub.f32 %v7049_v31, %v7245_v23  ;;  %v3617_v1 = vsub.f32 %v6908_v55, %v7245_v23  ;;  %v3618_v54 = vsub.f32 %v6910_v15, %v7245_v23 }
 0x3b6   : > { %v3777_v40 = vmul.f32 %v3745_v5, %v3745_v5  ;;  %v3778_v53 = vmul.f32 %v3746_v28, %v3746_v28  ;;  %v3649_v59 = vmul.f32 %v3617_v1, %v3617_v1  ;;  %v3650_v36 = vmul.f32 %v3618_v54, %v3618_v54 }
 0x3b7   : > { %v3545_v16 = vpop.xlane.xlu2 %3544 }
 0x3b8   : > { %v3583_v45 = vadd.f32 %v3545_v16, %v7139_v47  ;;  %v3812_v13 = vadd.f32 %v3778_v53, %v3777_v40  ;;  %v3684_v12 = vadd.f32 %v3650_v36, %v3649_v59 }
 0x3ba   : > { %v7256_v11 = vmul.f32 0.001953125, %v3583_v45  ;;  %3813 = vadd.xlane.f32.xlu0 %v3812_v13  ;;  %3685 = vadd.xlane.f32.xlu2 %v3684_v12 }
 0x3bc   : > { %v3747_v31 = vsub.f32 %v7063_v52, %v7256_v11  ;;  %v3748_v44 = vsub.f32 %v7059_v21, %v7256_v11  ;;  %v3619_v35 = vsub.f32 %v6919_v61, %v7256_v11  ;;  %v3620_v27 = vsub.f32 %v6916_v43, %v7256_v11 }
 0x3be   : > { %v3779_v26 = vmul.f32 %v3747_v31, %v3747_v31  ;;  %v3780_v47 = vmul.f32 %v3748_v44, %v3748_v44  ;;  %v3651_v18 = vmul.f32 %v3619_v35, %v3619_v35  ;;  %v3652_v60 = vmul.f32 %v3620_v27, %v3620_v27 }
 0x3bf   : > { %v3548_v5 = vpop.xlane.xlu0 %3547 }
 0x3c0   : > { %v3584_v28 = vadd.f32 %v3548_v5, %v7153_v7  ;;  %v3815_v1 = vadd.f32 %v3780_v47, %v3779_v26  ;;  %v3687_v54 = vadd.f32 %v3652_v60, %v3651_v18 }
 0x3c2   : > { %v7267_v40 = vmul.f32 0.001953125, %v3584_v28  ;;  %3816 = vadd.xlane.f32.xlu1 %v3815_v1  ;;  %3688 = vadd.xlane.f32.xlu0 %v3687_v54 }
 0x3c4   : > { %v3621_v21 = vsub.f32 %v6926_v25, %v7267_v40  ;;  %v3622_v52 = vsub.f32 %v6928_v58, %v7267_v40  ;;  %v3749_v53 = vsub.f32 %v7073_v49, %v7267_v40  ;;  %v3750_v59 = vsub.f32 %v7069_v62, %v7267_v40 }
 0x3c6   : > { %v3653_v36 = vmul.f32 %v3621_v21, %v3621_v21  ;;  %v3654_v7 = vmul.f32 %v3622_v52, %v3622_v52  ;;  %v3781_v16 = vmul.f32 %v3749_v53, %v3749_v53  ;;  %v3782_v45 = vmul.f32 %v3750_v59, %v3750_v59 }
 0x3c7   : > { %v3551_v13 = vpop.xlane.xlu1 %3550 }
 0x3c8   : > { %v3585_v12 = vadd.f32 %v3551_v13, %v7165_v4  ;;  %v3690_v31 = vadd.f32 %v3654_v7, %v3653_v36  ;;  %v3818_v44 = vadd.f32 %v3782_v45, %v3781_v16 }
 0x3ca   : > { %v7278_v35 = vmul.f32 0.001953125, %v3585_v12  ;;  %3691 = vadd.xlane.f32.xlu1 %v3690_v31  ;;  %3819 = vadd.xlane.f32.xlu2 %v3818_v44 }
 0x3cc   : > { %v3751_v27 = vsub.f32 %v7083_v57, %v7278_v35  ;;  %v3752_v49 = vsub.f32 %v7079_v46, %v7278_v35  ;;  %v3623_v62 = vsub.f32 %v6937_v42, %v7278_v35  ;;  %v3624_v26 = vsub.f32 %v6934_v14, %v7278_v35 }
 0x3ce   : > { %v3783_v47 = vmul.f32 %v3751_v27, %v3751_v27  ;;  %v3784_v4 = vmul.f32 %v3752_v49, %v3752_v49  ;;  %v3655_v18 = vmul.f32 %v3623_v62, %v3623_v62  ;;  %v3656_v60 = vmul.f32 %v3624_v26, %v3624_v26 }
 0x3cf   : > { %v3554_v5 = vpop.xlane.xlu2 %3553 }
 0x3d0   : > { %v3586_v28 = vadd.f32 %v3554_v5, %v7155_v6  ;;  %v3821_v1 = vadd.f32 %v3784_v4, %v3783_v47  ;;  %v3693_v54 = vadd.f32 %v3656_v60, %v3655_v18 }
 0x3d2   : > { %v7289_v21 = vmul.f32 0.001953125, %v3586_v28  ;;  %3822 = vadd.xlane.f32.xlu0 %v3821_v1  ;;  %3694 = vadd.xlane.f32.xlu2 %v3693_v54 }
 0x3d4   : > { %v3753_v46 = vsub.f32 %v7093_v63, %v7289_v21  ;;  %v3754_v57 = vsub.f32 %v7089_v20, %v7289_v21  ;;  %v3625_v52 = vsub.f32 %v6943_v48, %v7289_v21  ;;  %v3626_v53 = vsub.f32 %v6945_v10, %v7289_v21 }
 0x3d6   : > { %v3785_v59 = vmul.f32 %v3753_v46, %v3753_v46  ;;  %v3786_v6 = vmul.f32 %v3754_v57, %v3754_v57  ;;  %v3657_v36 = vmul.f32 %v3625_v52, %v3625_v52  ;;  %v3658_v7 = vmul.f32 %v3626_v53, %v3626_v53  ;;  %v7708_v53 = vld [vmem:[#allocation27_spill] sm:$0xff] }
 0x3d7   : > { %v3557_v16 = vpop.xlane.xlu0 %3556 }
 0x3d8   : > { %v3587_v45 = vadd.f32 %v3557_v16, %v7169_v17  ;;  %v3824_v13 = vadd.f32 %v3786_v6, %v3785_v59  ;;  %v3696_v12 = vadd.f32 %v3658_v7, %v3657_v36  ;;  %v7710_v16 = vld [vmem:[#allocation20_spill] sm:$0xff] }
 0x3da   : > { %v7300_v31 = vmul.f32 0.001953125, %v3587_v45  ;;  %3825 = vadd.xlane.f32.xlu1 %v3824_v13  ;;  %3697 = vadd.xlane.f32.xlu0 %v3696_v12  ;;  %v7711_v13 = vld [vmem:[#allocation9_spill] sm:$0xff] }
 0x3dc   : > { %v3627_v20 = vsub.f32 %v6954_v19, %v7300_v31  ;;  %v3628_v63 = vsub.f32 %v6951_v34, %v7300_v31  ;;  %v3755_v44 = vsub.f32 %v7103_v41, %v7300_v31  ;;  %v3756_v27 = vsub.f32 %v7099_v0, %v7300_v31 }
 0x3de   : > { %v3659_v49 = vmul.f32 %v3627_v20, %v3627_v20  ;;  %v3660_v17 = vmul.f32 %v3628_v63, %v3628_v63  ;;  %v3787_v62 = vmul.f32 %v3755_v44, %v3755_v44  ;;  %v3788_v26 = vmul.f32 %v3756_v27, %v3756_v27  ;;  %v7712_v20 = vld [vmem:[#allocation8_spill] sm:$0xff] }
 0x3df   : > { %v3560_v47 = vpop.xlane.xlu1 %3559 }
 0x3e0   : > { %v3588_v4 = vadd.f32 %v3560_v47, %v7181_v38  ;;  %v3699_v18 = vadd.f32 %v3660_v17, %v3659_v49  ;;  %v3827_v60 = vadd.f32 %v3788_v26, %v3787_v62  ;;  %v7713_v26 = vld [vmem:[#allocation30_spill] sm:$0xff] }
 0x3e2   : > { %v7311_v5 = vmul.f32 0.001953125, %v3588_v4  ;;  %3700 = vadd.xlane.f32.xlu1 %v3699_v18  ;;  %3828 = vadd.xlane.f32.xlu2 %v3827_v60 }
 0x3e4   : > { %v3757_v28 = vsub.f32 %v7113_v50, %v7311_v5  ;;  %v3758_v41 = vsub.f32 %v7109_v37, %v7311_v5  ;;  %v3629_v0 = vsub.f32 %v6960_v29, %v7311_v5  ;;  %v3630_v1 = vsub.f32 %v6962_v24, %v7311_v5  ;;  %v7709_v37 = vld [vmem:[#allocation21_spill] sm:$0xff] }
 0x3e6   : > { %v3789_v54 = vmul.f32 %v3757_v28, %v3757_v28  ;;  %v3790_v38 = vmul.f32 %v3758_v41, %v3758_v41  ;;  %v3661_v46 = vmul.f32 %v3629_v0, %v3629_v0  ;;  %v3662_v57 = vmul.f32 %v3630_v1, %v3630_v1  ;;  %v7714_v28 = vld [vmem:[#allocation10_spill] sm:$0xff]  ;;  %v7715_v0 = vld [vmem:[#allocation11_spill] sm:$0xff] }
 0x3e7   : > { %v3563_v52 = vpop.xlane.xlu2 %3562 }
 0x3e8   : > { %v3589_v59 = vadd.f32 %v3563_v52, %v7708_v53  ;;  %v3830_v6 = vadd.f32 %v3790_v38, %v3789_v54  ;;  %v3702_v36 = vadd.f32 %v3662_v57, %v3661_v46  ;;  %v7716_v54 = vld [vmem:[#allocation23_spill] sm:$0xff]  ;;  %v7717_v46 = vld [vmem:[#allocation22_spill] sm:$0xff] }
 0x3ea   : > { %v7322_v7 = vmul.f32 0.001953125, %v3589_v59  ;;  %3831 = vadd.xlane.f32.xlu0 %v3830_v6  ;;  %3703 = vadd.xlane.f32.xlu2 %v3702_v36 }
 0x3ec   : > { %v3759_v50 = vsub.f32 %v7709_v37, %v7322_v7  ;;  %v3760_v45 = vsub.f32 %v7710_v16, %v7322_v7  ;;  %v3631_v12 = vsub.f32 %v7711_v13, %v7322_v7  ;;  %v3632_v63 = vsub.f32 %v7712_v20, %v7322_v7 }
 0x3ee   : > { %v3791_v44 = vmul.f32 %v3759_v50, %v3759_v50  ;;  %v3792_v27 = vmul.f32 %v3760_v45, %v3760_v45  ;;  %v3663_v49 = vmul.f32 %v3631_v12, %v3631_v12  ;;  %v3664_v17 = vmul.f32 %v3632_v63, %v3632_v63  ;;  %v7718_v12 = vld [vmem:[#allocation25_spill] sm:$0xff] }
 0x3ef   : > { %v3566_v62 = vpop.xlane.xlu0 %3565 }
 0x3f0   : > { %v3590_v47 = vadd.f32 %v3566_v62, %v7713_v26  ;;  %v3833_v4 = vadd.f32 %v3792_v27, %v3791_v44  ;;  %v3705_v18 = vadd.f32 %v3664_v17, %v3663_v49  ;;  %v7719_v44 = vld [vmem:[#allocation24_spill] sm:$0xff]  ;;  %v7720_v49 = vld [vmem:[#allocation13_spill] sm:$0xff] }
 0x3f1   : > { %v7721_v62 = vld [vmem:[#allocation12_spill] sm:$0xff] }
 0x3f2   : > { %v7333_v60 = vmul.f32 0.001953125, %v3590_v47  ;;  %3834 = vadd.xlane.f32.xlu1 %v3833_v4  ;;  %3706 = vadd.xlane.f32.xlu0 %v3705_v18 }
 0x3f4   : > { %v3633_v41 = vsub.f32 %v7714_v28, %v7333_v60  ;;  %v3634_v1 = vsub.f32 %v7715_v0, %v7333_v60  ;;  %v3761_v38 = vsub.f32 %v7716_v54, %v7333_v60  ;;  %v3762_v57 = vsub.f32 %v7717_v46, %v7333_v60 }
 0x3f6   : > { %v3665_v52 = vmul.f32 %v3633_v41, %v3633_v41  ;;  %v3666_v53 = vmul.f32 %v3634_v1, %v3634_v1  ;;  %v3793_v59 = vmul.f32 %v3761_v38, %v3761_v38  ;;  %v3794_v6 = vmul.f32 %v3762_v57, %v3762_v57  ;;  %v7722_v1 = vld [vmem:[#allocation31_spill] sm:$0xff] }
 0x3f7   : > { %v3569_v36 = vpop.xlane.xlu1 %3568 }
 0x3f8   : > { %v3591_v37 = vadd.f32 %v3569_v36, %v7197_v32  ;;  %v3708_v50 = vadd.f32 %v3666_v53, %v3665_v52  ;;  %v3836_v16 = vadd.f32 %v3794_v6, %v3793_v59  ;;  %v7723_v52 = vld [vmem:[#allocation28_spill] sm:$0xff]  ;;  %v7724_v59 = vld [vmem:[#allocation26_spill] sm:$0xff] }
 0x3f9   : > { %v7725_v36 = vld [vmem:[#allocation14_spill] sm:$0xff] }
 0x3fa   : > { %v7344_v45 = vmul.f32 0.001953125, %v3591_v37  ;;  %3709 = vadd.xlane.f32.xlu1 %v3708_v50  ;;  %3837 = vadd.xlane.f32.xlu2 %v3836_v16  ;;  %v7726_v50 = vld [vmem:[#allocation15_spill] sm:$0xff] }
 0x3fc   : > { %v3763_v63 = vsub.f32 %v7718_v12, %v7344_v45  ;;  %v3764_v27 = vsub.f32 %v7719_v44, %v7344_v45  ;;  %v3635_v17 = vsub.f32 %v7720_v49, %v7344_v45  ;;  %v3636_v26 = vsub.f32 %v7721_v62, %v7344_v45  ;;  %v4092_v62 = vld [vmem:[%s7398_s29 + $0x8] sm:$0xff] }
 0x3fe   : > { %v3795_v47 = vmul.f32 %v3763_v63, %v3763_v63  ;;  %v3796_v32 = vmul.f32 %v3764_v27, %v3764_v27  ;;  %v3667_v4 = vmul.f32 %v3635_v17, %v3635_v17  ;;  %v3668_v18 = vmul.f32 %v3636_v26, %v3636_v26  ;;  %v7727_v26 = vld [vmem:[#allocation34_spill] sm:$0xff] }
 0x3ff   : > { %v3572_v41 = vpop.xlane.xlu2 %3571 }
 0x400   : > { %v3592_v54 = vadd.f32 %v3572_v41, %v7722_v1  ;;  %v3839_v38 = vadd.f32 %v3796_v32, %v3795_v47  ;;  %v3711_v46 = vadd.f32 %v3668_v18, %v3667_v4  ;;  %v7728_v41 = vld [vmem:[#allocation17_spill] sm:$0xff] }
 0x402   : > { %v7355_v57 = vmul.f32 0.001953125, %v3592_v54  ;;  %3840 = vadd.xlane.f32.xlu0 %v3839_v38  ;;  %3712 = vadd.xlane.f32.xlu2 %v3711_v46  ;;  %v7729_v54 = vld [vmem:[#allocation16_spill] sm:$0xff] }
 0x403   : > { %v7730_v46 = vld [vmem:[#allocation32_spill] sm:$0xff] }
 0x404   : > { %v3765_v53 = vsub.f32 %v7723_v52, %v7355_v57  ;;  %v3766_v6 = vsub.f32 %v7724_v59, %v7355_v57  ;;  %v3637_v37 = vsub.f32 %v7725_v36, %v7355_v57  ;;  %v3638_v16 = vsub.f32 %v7726_v50, %v7355_v57 }
 0x406   : > { %v3797_v12 = vmul.f32 %v3765_v53, %v3765_v53  ;;  %v3798_v63 = vmul.f32 %v3766_v6, %v3766_v6  ;;  %v3669_v44 = vmul.f32 %v3637_v37, %v3637_v37  ;;  %v3670_v27 = vmul.f32 %v3638_v16, %v3638_v16  ;;  %v7731_v53 = vld [vmem:[#allocation29_spill] sm:$0xff] }
 0x407   : > { %v3575_v17 = vpop.xlane.xlu0 %3574 }
 0x408   : > { %v3593_v47 = vadd.f32 %v3575_v17, %v7727_v26  ;;  %v3842_v32 = vadd.f32 %v3798_v63, %v3797_v12  ;;  %v3714_v4 = vadd.f32 %v3670_v27, %v3669_v44 }
 0x40a   : > { %v7366_v18 = vmul.f32 0.001953125, %v3593_v47  ;;  %3843 = vadd.xlane.f32.xlu1 %v3842_v32  ;;  %3715 = vadd.xlane.f32.xlu0 %v3714_v4  ;;  %v7732_v47 = vld [vmem:[#allocation35_spill] sm:$0xff]  ;;  %v7733_v4 = vld [vmem:[#allocation33_spill] sm:$0xff] }
 0x40c   : > { %v3639_v1 = vsub.f32 %v7728_v41, %v7366_v18  ;;  %v3640_v38 = vsub.f32 %v7729_v54, %v7366_v18  ;;  %v3767_v52 = vsub.f32 %v7730_v46, %v7366_v18  ;;  %v3768_v59 = vsub.f32 %v7731_v53, %v7366_v18 }
 0x40e   : > { %v3671_v6 = vmul.f32 %v3639_v1, %v3639_v1  ;;  %v3672_v37 = vmul.f32 %v3640_v38, %v3640_v38  ;;  %v3799_v16 = vmul.f32 %v3767_v52, %v3767_v52  ;;  %v3800_v12 = vmul.f32 %v3768_v59, %v3768_v59  ;;  %v7734_v1 = vld [vmem:[#allocation18_spill] sm:$0xff]  ;;  %v7735_v52 = vld [vmem:[#allocation19_spill] sm:$0xff] }
 0x40f   : > { %v3578_v63 = vpop.xlane.xlu1 %3577 }
 0x410   : > { %v3594_v44 = vadd.f32 %v3578_v63, %v7220_v2  ;;  %v3717_v27 = vadd.f32 %v3672_v37, %v3671_v6  ;;  %v3845_v17 = vadd.f32 %v3800_v12, %v3799_v16 }
 0x412   : > { %v7377_v26 = vmul.f32 0.001953125, %v3594_v44  ;;  %3718 = vadd.xlane.f32.xlu1 %v3717_v27  ;;  %3846 = vadd.xlane.f32.xlu2 %v3845_v17 }
 0x414   : > { %v3769_v32 = vsub.f32 %v7732_v47, %v7377_v26  ;;  %v3770_v46 = vsub.f32 %v7733_v4, %v7377_v26  ;;  %v3641_v38 = vsub.f32 %v7734_v1, %v7377_v26  ;;  %v3642_v53 = vsub.f32 %v7735_v52, %v7377_v26 }
 0x415   : > { %v3805_v59 = vpop.xlane.xlu0 %3804  ;;  %v3677_v2 = vpop.xlane.xlu2 %3676 }
 0x416   : > { %v3851_v6 = vadd.f32 %v3805_v59, %v3677_v2  ;;  %v3801_v37 = vmul.f32 %v3769_v32, %v3769_v32  ;;  %v3802_v16 = vmul.f32 %v3770_v46, %v3770_v46  ;;  %v3673_v12 = vmul.f32 %v3641_v38, %v3641_v38 }
 0x417   : > { %v3674_v63 = vmul.f32 %v3642_v53, %v3642_v53 }
 0x418   : > { %v3867_v44 = vmul.f32 0.001953125, %v3851_v6  ;;  %v3848_v27 = vadd.f32 %v3802_v16, %v3801_v37 }
 0x419   : > { %v3720_v17 = vadd.f32 %v3674_v63, %v3673_v12 }
 0x41a   : > { %v3899_v47 = vadd.f32 1e-05, %v3867_v44  ;;  %3849 = vadd.xlane.f32.xlu0 %v3848_v27 }
 0x41b   : > { %3721 = vadd.xlane.f32.xlu2 %v3720_v17 }
 0x41c   : > { %5505 = vrsqrt.f32 %v3899_v47  ;;  %vm3921_vm3 = vweird.f32 %v3899_v47 }
 0x41d   : > { %v3680_v4 = vpop.xlane.xlu0 %3679  ;;  %v3808_v54 = vpop.xlane.xlu1 %3807 }
 0x41e   : > { %v3852_v41 = vadd.f32 %v3808_v54, %v3680_v4 }
 0x420   : > { %v3868_v1 = vmul.f32 0.001953125, %v3852_v41 }
 0x422   : > { %v5506_v52 = vpop.eup %5505  ;;  %v3900_v50 = vadd.f32 1e-05, %v3868_v1 }
 0x423   : > { %v3916_v36 = vmul.f32 %v5506_v52, %v3899_v47  ;;  %vm3922_vm2 = vweird.f32 %v5506_v52 }
 0x424   : > { %5507 = vrsqrt.f32 %v3900_v50  ;;  %vm3923_vm4 = vmor %vm3921_vm3, %vm3922_vm2  ;;  %vm3931_vm6 = vweird.f32 %v3900_v50 }
 0x425   : > { %v3917_v32 = vmul.f32 %v5506_v52, %v3916_v36  ;;  %v3811_v46 = vpop.xlane.xlu2 %3810  ;;  %v3683_v38 = vpop.xlane.xlu1 %3682  ;;  %v3883_v36 = vld [vmem:[%s7391_s20] sm:$0xff] }
 0x426   : > { %v3853_v53 = vadd.f32 %v3811_v46, %v3683_v38 }
 0x427   : > { %v3918_v59 = vmul.f32 0.5, %v3917_v32 }
 0x428   : > { %v3869_v2 = vmul.f32 0.001953125, %v3853_v53 }
 0x429   : > { %v3919_v6 = vsub.f32 1.5, %v3918_v59 }
 0x42a   : > { %v5508_v54 = vpop.eup %5507  ;;  %v3901_v41 = vadd.f32 1e-05, %v3869_v2  ;;  %v4091_v2 = vld [vmem:[%s7398_s29] sm:$0xff] }
 0x42b   : > { %v3920_v1 = vmul.f32 %v5506_v52, %v3919_v6  ;;  %v3926_v37 = vmul.f32 %v5508_v54, %v3900_v50  ;;  %vm3932_vm5 = vweird.f32 %v5508_v54  ;;  %v3884_v6 = vld [vmem:[%s7391_s20 + $0x8] sm:$0xff] }
 0x42c   : > { %5509 = vrsqrt.f32 %v3901_v41  ;;  %vm3933_vm7 = vmor %vm3931_vm6, %vm3932_vm5  ;;  %vm3941_vm9 = vweird.f32 %v3901_v41 }
 0x42d   : > { %v3927_v16 = vmul.f32 %v5508_v54, %v3926_v37  ;;  %v3814_v12 = vpop.xlane.xlu0 %3813  ;;  %v3686_v63 = vpop.xlane.xlu2 %3685  ;;  %v3924_v44 = vsel %vm3923_vm4, %v5506_v52, %v3920_v1 }
 0x42e   : > { %v3854_v27 = vadd.f32 %v3814_v12, %v3686_v63  ;;  %v4075_v17 = vmul.f32 %v3924_v44, %v3883_v36 }
 0x42f   : > { %v3928_v4 = vmul.f32 0.5, %v3927_v16 }
 0x430   : > { %v3870_v32 = vmul.f32 0.001953125, %v3854_v27  ;;  %4141 = vperm.xlu1 %5374, %v4075_v17   ;;  %v4107_v53 = vmul.f32 %v4075_v17, %v7208_v56 }
 0x431   : > { %v3929_v47 = vsub.f32 1.5, %v3928_v4 }
 0x432   : > { %v5510_v46 = vpop.eup %5509  ;;  %v3902_v38 = vadd.f32 1e-05, %v3870_v32  ;;  %v4123_v63 = vsub.f32 %v4091_v2, %v4107_v53 }
 0x433   : > { %v3930_v59 = vmul.f32 %v5508_v54, %v3929_v47  ;;  %v3936_v52 = vmul.f32 %v5510_v46, %v3901_v41  ;;  %vm3942_vm8 = vweird.f32 %v5510_v46 }
 0x434   : > { %5511 = vrsqrt.f32 %v3902_v38  ;;  %vm3943_vm10 = vmor %vm3941_vm9, %vm3942_vm8  ;;  %vm3951_vm12 = vweird.f32 %v3902_v38 }
 0x435   : > { %v3937_v1 = vmul.f32 %v5510_v46, %v3936_v52  ;;  %v3689_v37 = vpop.xlane.xlu0 %3688  ;;  %v3817_v36 = vpop.xlane.xlu1 %3816  ;;  %v3934_v16 = vsel %vm3933_vm7, %v5508_v54, %v3930_v59  ;;  %v3885_v54 = vld [vmem:[%s7391_s20 + $0x10] sm:$0xff] }
 0x436   : > { %v3855_v12 = vadd.f32 %v3817_v36, %v3689_v37  ;;  %v4076_v44 = vmul.f32 %v3934_v16, %v3884_v6 }
 0x437   : > { %v3938_v27 = vmul.f32 0.5, %v3937_v1 }
 0x438   : > { %v3871_v4 = vmul.f32 0.001953125, %v3855_v12  ;;  %4253 = vperm.xlu1 %5374, %v4123_v63   ;;  %4146 = vperm.xlu2 %5375, %v4076_v44   ;;  %v4108_v32 = vmul.f32 %v4076_v44, %v7223_v8 }
 0x439   : > { %v3939_v56 = vsub.f32 1.5, %v3938_v27 }
 0x43a   : > { %v5512_v50 = vpop.eup %5511  ;;  %v3903_v17 = vadd.f32 1e-05, %v3871_v4  ;;  %v4124_v37 = vsub.f32 %v4092_v62, %v4108_v32 }
 0x43b   : > { %v3940_v47 = vmul.f32 %v5510_v46, %v3939_v56  ;;  %v3946_v52 = vmul.f32 %v5512_v50, %v3902_v38  ;;  %vm3952_vm11 = vweird.f32 %v5512_v50  ;;  %v3886_v56 = vld [vmem:[%s7391_s20 + $0x18] sm:$0xff] }
 0x43c   : > { %5513 = vrsqrt.f32 %v3903_v17  ;;  %vm3953_vm13 = vmor %vm3951_vm12, %vm3952_vm11  ;;  %vm3961_vm14 = vweird.f32 %v3903_v17 }
 0x43d   : > { %v3947_v59 = vmul.f32 %v5512_v50, %v3946_v52  ;;  %v3820_v53 = vpop.xlane.xlu2 %3819  ;;  %v3692_v2 = vpop.xlane.xlu1 %3691  ;;  %v3944_v6 = vsel %vm3943_vm10, %v5510_v46, %v3940_v47  ;;  %v4093_v46 = vld [vmem:[%s7398_s29 + $0x10] sm:$0xff] }
 0x43e   : > { %v3856_v1 = vadd.f32 %v3820_v53, %v3692_v2  ;;  %v4077_v36 = vmul.f32 %v3944_v6, %v3885_v54 }
 0x43f   : > { %v3948_v16 = vmul.f32 0.5, %v3947_v59 }
 0x440   : > { %v3872_v12 = vmul.f32 0.001953125, %v3856_v1  ;;  %4258 = vperm.xlu2 %5375, %v4124_v37   ;;  %4151 = vperm.xlu0 %5376, %v4077_v36   ;;  %v4109_v44 = vmul.f32 %v4077_v36, %v7234_v33 }
 0x441   : > { %v3949_v8 = vsub.f32 1.5, %v3948_v16 }
 0x442   : > { %v5514_v41 = vpop.eup %5513  ;;  %v3904_v63 = vadd.f32 1e-05, %v3872_v12  ;;  %v4125_v53 = vsub.f32 %v4093_v46, %v4109_v44  ;;  %v4094_v12 = vld [vmem:[%s7398_s29 + $0x18] sm:$0xff] }
 0x443   : > { %v3950_v27 = vmul.f32 %v5512_v50, %v3949_v8  ;;  %v3956_v4 = vmul.f32 %v5514_v41, %v3903_v17  ;;  %vm3962_vm0 = vweird.f32 %v5514_v41 }
 0x444   : > { %5515 = vrsqrt.f32 %v3904_v63  ;;  %vm3963_vm15 = vmor %vm3961_vm14, %vm3962_vm0  ;;  %vm3971_vm2 = vweird.f32 %v3904_v63 }
 0x445   : > { %v3957_v47 = vmul.f32 %v5514_v41, %v3956_v4  ;;  %v3823_v62 = vpop.xlane.xlu0 %3822  ;;  %v3695_v32 = vpop.xlane.xlu2 %3694  ;;  %v3954_v52 = vsel %vm3953_vm13, %v5512_v50, %v3950_v27  ;;  %v3887_v50 = vld [vmem:[%s7391_s20 + $0x20] sm:$0xff] }
 0x446   : > { %v3857_v54 = vadd.f32 %v3823_v62, %v3695_v32  ;;  %v4078_v59 = vmul.f32 %v3954_v52, %v3886_v56 }
 0x447   : > { %v3958_v2 = vmul.f32 0.5, %v3957_v47 }
 0x448   : > { %v3873_v6 = vmul.f32 0.001953125, %v3857_v54  ;;  %4156 = vperm.xlu1 %5374, %v4078_v59   ;;  %4263 = vperm.xlu0 %5376, %v4125_v53   ;;  %v4110_v37 = vmul.f32 %v4078_v59, %v7245_v23 }
 0x449   : > { %v3959_v33 = vsub.f32 1.5, %v3958_v2  ;;  %v3888_v2 = vld [vmem:[%s7391_s20 + $0x28] sm:$0xff] }
 0x44a   : > { %v5516_v38 = vpop.eup %5515  ;;  %v3905_v1 = vadd.f32 1e-05, %v3873_v6  ;;  %v4126_v46 = vsub.f32 %v4094_v12, %v4110_v37 }
 0x44b   : > { %v3960_v36 = vmul.f32 %v5514_v41, %v3959_v33  ;;  %v3966_v16 = vmul.f32 %v5516_v38, %v3904_v63  ;;  %vm3972_vm1 = vweird.f32 %v5516_v38 }
 0x44c   : > { %5517 = vrsqrt.f32 %v3905_v1  ;;  %vm3973_vm3 = vmor %vm3971_vm2, %vm3972_vm1  ;;  %vm3981_vm5 = vweird.f32 %v3905_v1 }
 0x44d   : > { %v3967_v8 = vmul.f32 %v5516_v38, %v3966_v16  ;;  %v3698_v27 = vpop.xlane.xlu0 %3697  ;;  %v3826_v44 = vpop.xlane.xlu1 %3825  ;;  %v3964_v4 = vsel %vm3963_vm15, %v5514_v41, %v3960_v36  ;;  %v4095_v41 = vld [vmem:[%s7398_s29 + $0x20] sm:$0xff] }
 0x44e   : > { %v3858_v56 = vadd.f32 %v3826_v44, %v3698_v27  ;;  %v4079_v47 = vmul.f32 %v3964_v4, %v3887_v50  ;;  %v4096_v27 = vld [vmem:[%s7398_s29 + $0x28] sm:$0xff] }
 0x44f   : > { %v3968_v62 = vmul.f32 0.5, %v3967_v8 }
 0x450   : > { %v3874_v32 = vmul.f32 0.001953125, %v3858_v56  ;;  %4268 = vperm.xlu1 %5374, %v4126_v46   ;;  %4161 = vperm.xlu2 %5375, %v4079_v47   ;;  %v4111_v54 = vmul.f32 %v4079_v47, %v7256_v11 }
 0x451   : > { %v3969_v23 = vsub.f32 1.5, %v3968_v62  ;;  %v3889_v62 = vld [vmem:[%s7391_s20 + $0x30] sm:$0xff] }
 0x452   : > { %v5518_v17 = vpop.eup %5517  ;;  %v3906_v52 = vadd.f32 1e-05, %v3874_v32  ;;  %v4127_v12 = vsub.f32 %v4095_v41, %v4111_v54 }
 0x453   : > { %v3970_v59 = vmul.f32 %v5516_v38, %v3969_v23  ;;  %v3976_v53 = vmul.f32 %v5518_v17, %v3905_v1  ;;  %vm3982_vm4 = vweird.f32 %v5518_v17 }
 0x454   : > { %5519 = vrsqrt.f32 %v3906_v52  ;;  %vm3983_vm6 = vmor %vm3981_vm5, %vm3982_vm4  ;;  %vm3991_vm8 = vweird.f32 %v3906_v52 }
 0x455   : > { %v3977_v6 = vmul.f32 %v5518_v17, %v3976_v53  ;;  %v3829_v33 = vpop.xlane.xlu2 %3828  ;;  %v3701_v37 = vpop.xlane.xlu1 %3700  ;;  %v3974_v36 = vsel %vm3973_vm3, %v5516_v38, %v3970_v59 }
 0x456   : > { %v3859_v16 = vadd.f32 %v3829_v33, %v3701_v37  ;;  %v4080_v50 = vmul.f32 %v3974_v36, %v3888_v2  ;;  %v4097_v2 = vld [vmem:[%s7398_s29 + $0x30] sm:$0xff] }
 0x457   : > { %v3978_v8 = vmul.f32 0.5, %v3977_v6 }
 0x458   : > { %v3875_v44 = vmul.f32 0.001953125, %v3859_v16  ;;  %4273 = vperm.xlu2 %5375, %v4127_v12   ;;  %4166 = vperm.xlu1 %5374, %v4080_v50   ;;  %v4112_v11 = vmul.f32 %v4080_v50, %v7267_v40 }
 0x459   : > { %v3979_v63 = vsub.f32 1.5, %v3978_v8  ;;  %v3890_v8 = vld [vmem:[%s7391_s20 + $0x38] sm:$0xff] }
 0x45a   : > { %v5520_v4 = vpop.eup %5519  ;;  %v3907_v56 = vadd.f32 1e-05, %v3875_v44  ;;  %v4128_v46 = vsub.f32 %v4096_v27, %v4112_v11 }
 0x45b   : > { %v3980_v47 = vmul.f32 %v5518_v17, %v3979_v63  ;;  %v3986_v38 = vmul.f32 %v5520_v4, %v3906_v52  ;;  %vm3992_vm7 = vweird.f32 %v5520_v4 }
 0x45c   : > { %5521 = vrsqrt.f32 %v3907_v56  ;;  %4278 = vperm.xlu0 %5376, %v4128_v46   ;;  %vm3993_vm9 = vmor %vm3991_vm8, %vm3992_vm7  ;;  %vm4001_vm11 = vweird.f32 %v3907_v56 }
 0x45d   : > { %v3987_v32 = vmul.f32 %v5520_v4, %v3986_v38  ;;  %v3832_v23 = vpop.xlane.xlu0 %3831  ;;  %v3704_v54 = vpop.xlane.xlu2 %3703  ;;  %v3984_v59 = vsel %vm3983_vm6, %v5518_v17, %v3980_v47  ;;  %v4098_v47 = vld [vmem:[%s7398_s29 + $0x38] sm:$0xff] }
 0x45e   : > { %v3860_v53 = vadd.f32 %v3832_v23, %v3704_v54  ;;  %v4081_v40 = vmul.f32 %v3984_v59, %v3889_v62 }
 0x45f   : > { %v3988_v41 = vmul.f32 0.5, %v3987_v32 }
 0x460   : > { %v3876_v6 = vmul.f32 0.001953125, %v3860_v53  ;;  %4171 = vperm.xlu2 %5375, %v4081_v40   ;;  %v4113_v33 = vmul.f32 %v4081_v40, %v7278_v35  ;;  %v3891_v40 = vld [vmem:[%s7391_s20 + $0x40] sm:$0xff] }
 0x461   : > { %v3989_v37 = vsub.f32 1.5, %v3988_v41 }
 0x462   : > { %v5522_v1 = vpop.eup %5521  ;;  %v3908_v36 = vadd.f32 1e-05, %v3876_v6  ;;  %v4129_v16 = vsub.f32 %v4097_v2, %v4113_v33 }
 0x463   : > { %v3990_v12 = vmul.f32 %v5520_v4, %v3989_v37  ;;  %v3996_v50 = vmul.f32 %v5522_v1, %v3907_v56  ;;  %vm4002_vm10 = vweird.f32 %v5522_v1 }
 0x464   : > { %5523 = vrsqrt.f32 %v3908_v36  ;;  %4283 = vperm.xlu1 %5374, %v4129_v16   ;;  %vm4003_vm12 = vmor %vm4001_vm11, %vm4002_vm10  ;;  %v4099_v16 = vld [vmem:[%s7398_s29 + $0x40] sm:$0xff]  ;;  %vm4011_vm0 = vweird.f32 %v3908_v36 }
 0x465   : > { %v3997_v17 = vmul.f32 %v5522_v1, %v3996_v50  ;;  %v3707_v27 = vpop.xlane.xlu0 %3706  ;;  %v3835_v44 = vpop.xlane.xlu1 %3834  ;;  %v3994_v11 = vsel %vm3993_vm9, %v5520_v4, %v3990_v12 }
 0x466   : > { %v3861_v63 = vadd.f32 %v3835_v44, %v3707_v27  ;;  %v4082_v35 = vmul.f32 %v3994_v11, %v3890_v8  ;;  %v3892_v44 = vld [vmem:[%s7391_s20 + $0x48] sm:$0xff] }
 0x467   : > { %v3998_v46 = vmul.f32 0.5, %v3997_v17 }
 0x468   : > { %v3877_v38 = vmul.f32 0.001953125, %v3861_v63  ;;  %v4114_v62 = vmul.f32 %v4082_v35, %v7289_v21 }
 0x469   : > { %v3999_v32 = vsub.f32 1.5, %v3998_v46 }
 0x46a   : > { %v5524_v52 = vpop.eup %5523  ;;  %v3909_v23 = vadd.f32 1e-05, %v3877_v38  ;;  %v4130_v54 = vsub.f32 %v4098_v47, %v4114_v62 }
 0x46b   : > { %v4000_v59 = vmul.f32 %v5522_v1, %v3999_v32  ;;  %v4006_v53 = vmul.f32 %v5524_v52, %v3908_v36  ;;  %vm4012_vm13 = vweird.f32 %v5524_v52  ;;  %v4100_v32 = vld [vmem:[%s7398_s29 + $0x48] sm:$0xff] }
 0x46c   : > { %5525 = vrsqrt.f32 %v3909_v23  ;;  %4176 = vperm.xlu1 %5374, %v4082_v35   ;;  %4288 = vperm.xlu2 %5375, %v4130_v54   ;;  %vm4013_vm14 = vmor %vm4011_vm0, %vm4012_vm13  ;;  %vm4021_vm1 = vweird.f32 %v3909_v23 }
 0x46d   : > { %v4007_v4 = vmul.f32 %v5524_v52, %v4006_v53  ;;  %v3838_v41 = vpop.xlane.xlu2 %3837  ;;  %v3710_v2 = vpop.xlane.xlu1 %3709  ;;  %v4004_v6 = vsel %vm4003_vm12, %v5522_v1, %v4000_v59 }
 0x46e   : > { %v3862_v21 = vadd.f32 %v3838_v41, %v3710_v2  ;;  %v4083_v33 = vmul.f32 %v4004_v6, %v3891_v40  ;;  %v3893_v2 = vld [vmem:[%s7391_s20 + $0x50] sm:$0xff] }
 0x46f   : > { %v4008_v37 = vmul.f32 0.5, %v4007_v4 }
 0x470   : > { %v3878_v12 = vmul.f32 0.001953125, %v3862_v21  ;;  %v4115_v50 = vmul.f32 %v4083_v33, %v7300_v31 }
 0x471   : > { %v4009_v8 = vsub.f32 1.5, %v4008_v37 }
 0x472   : > { %v5526_v56 = vpop.eup %5525  ;;  %v3910_v17 = vadd.f32 1e-05, %v3878_v12  ;;  %v4131_v27 = vsub.f32 %v4099_v16, %v4115_v50  ;;  %v4101_v50 = vld [vmem:[%s7398_s29 + $0x50] sm:$0xff] }
 0x473   : > { %v4010_v11 = vmul.f32 %v5524_v52, %v4009_v8  ;;  %v4016_v63 = vmul.f32 %v5526_v56, %v3909_v23  ;;  %vm4022_vm15 = vweird.f32 %v5526_v56 }
 0x474   : > { %5527 = vrsqrt.f32 %v3910_v17  ;;  %4181 = vperm.xlu2 %5375, %v4083_v33   ;;  %4293 = vperm.xlu0 %5376, %v4131_v27   ;;  %vm4023_vm2 = vmor %vm4021_vm1, %vm4022_vm15  ;;  %vm4031_vm4 = vweird.f32 %v3910_v17 }
 0x475   : > { %v4014_v1 = vsel %vm4013_vm14, %v5524_v52, %v4010_v11  ;;  %v4017_v35 = vmul.f32 %v5526_v56, %v4016_v63  ;;  %v3841_v46 = vpop.xlane.xlu0 %3840  ;;  %v3713_v47 = vpop.xlane.xlu2 %3712 }
 0x476   : > { %v4084_v31 = vmul.f32 %v4014_v1, %v3892_v44  ;;  %v3863_v38 = vadd.f32 %v3841_v46, %v3713_v47  ;;  %v3894_v46 = vld [vmem:[%s7391_s20 + $0x58] sm:$0xff] }
 0x477   : > { %v4018_v62 = vmul.f32 0.5, %v4017_v35 }
 0x478   : > { %v3879_v54 = vmul.f32 0.001953125, %v3863_v38  ;;  %v4116_v59 = vmul.f32 %v4084_v31, %v7311_v5 }
 0x479   : > { %v4019_v53 = vsub.f32 1.5, %v4018_v62 }
 0x47a   : > { %v5528_v36 = vpop.eup %5527  ;;  %v3911_v40 = vadd.f32 1e-05, %v3879_v54  ;;  %v4132_v4 = vsub.f32 %v4100_v32, %v4116_v59  ;;  %v4102_v54 = vld [vmem:[%s7398_s29 + $0x58] sm:$0xff] }
 0x47b   : > { %v4020_v41 = vmul.f32 %v5526_v56, %v4019_v53  ;;  %v4026_v52 = vmul.f32 %v5528_v36, %v3910_v17  ;;  %vm4032_vm3 = vweird.f32 %v5528_v36 }
 0x47c   : > { %5529 = vrsqrt.f32 %v3911_v40  ;;  %4298 = vperm.xlu1 %5374, %v4132_v4   ;;  %4186 = vperm.xlu0 %5376, %v4084_v31   ;;  %vm4033_vm5 = vmor %vm4031_vm4, %vm4032_vm3  ;;  %vm4041_vm7 = vweird.f32 %v3911_v40 }
 0x47d   : > { %v4027_v6 = vmul.f32 %v5528_v36, %v4026_v52  ;;  %v3716_v21 = vpop.xlane.xlu0 %3715  ;;  %v3844_v33 = vpop.xlane.xlu1 %3843  ;;  %v4024_v37 = vsel %vm4023_vm2, %v5526_v56, %v4020_v41 }
 0x47e   : > { %v3864_v5 = vadd.f32 %v3844_v33, %v3716_v21  ;;  %v4085_v16 = vmul.f32 %v4024_v37, %v3893_v2  ;;  %v3895_v2 = vld [vmem:[%s7391_s20 + $0x60] sm:$0xff] }
 0x47f   : > { %v4028_v12 = vmul.f32 0.5, %v4027_v6 }
 0x480   : > { %v3880_v8 = vmul.f32 0.001953125, %v3864_v5  ;;  %v4117_v27 = vmul.f32 %v4085_v16, %v7322_v7 }
 0x481   : > { %v4029_v44 = vsub.f32 1.5, %v4028_v12 }
 0x482   : > { %v5530_v23 = vpop.eup %5529  ;;  %v3912_v11 = vadd.f32 1e-05, %v3880_v8  ;;  %v4133_v63 = vsub.f32 %v4101_v50, %v4117_v27  ;;  %v4103_v50 = vld [vmem:[%s7398_s29 + $0x60] sm:$0xff] }
 0x483   : > { %v4030_v1 = vmul.f32 %v5528_v36, %v4029_v44  ;;  %v4036_v35 = vmul.f32 %v5530_v23, %v3911_v40  ;;  %vm4042_vm6 = vweird.f32 %v5530_v23 }
 0x484   : > { %5531 = vrsqrt.f32 %v3912_v11  ;;  %4191 = vperm.xlu1 %5374, %v4085_v16   ;;  %4303 = vperm.xlu2 %5375, %v4133_v63   ;;  %vm4043_vm8 = vmor %vm4041_vm7, %vm4042_vm6  ;;  %vm4051_vm10 = vweird.f32 %v3912_v11 }
 0x485   : > { %v4037_v56 = vmul.f32 %v5530_v23, %v4036_v35  ;;  %v3847_v47 = vpop.xlane.xlu2 %3846  ;;  %v3719_v31 = vpop.xlane.xlu1 %3718  ;;  %v4034_v38 = vsel %vm4033_vm5, %v5528_v36, %v4030_v1 }
 0x486   : > { %v3865_v7 = vadd.f32 %v3847_v47, %v3719_v31  ;;  %v4086_v62 = vmul.f32 %v4034_v38, %v3894_v46  ;;  %v3896_v47 = vld [vmem:[%s7391_s20 + $0x68] sm:$0xff] }
 0x487   : > { %v4038_v32 = vmul.f32 0.5, %v4037_v56 }
 0x488   : > { %v3881_v59 = vmul.f32 0.001953125, %v3865_v7  ;;  %v4118_v53 = vmul.f32 %v4086_v62, %v7333_v60 }
 0x489   : > { %v4039_v4 = vsub.f32 1.5, %v4038_v32 }
 0x48a   : > { %v5532_v17 = vpop.eup %5531  ;;  %v3913_v41 = vadd.f32 1e-05, %v3881_v59  ;;  %v4134_v52 = vsub.f32 %v4102_v54, %v4118_v53  ;;  %v3897_v54 = vld [vmem:[%s7391_s20 + $0x70] sm:$0xff] }
 0x48b   : > { %v4040_v6 = vmul.f32 %v5530_v23, %v4039_v4  ;;  %v4046_v21 = vmul.f32 %v5532_v17, %v3912_v11  ;;  %vm4052_vm9 = vweird.f32 %v5532_v17  ;;  %v5143_v53 = vld [vmem:[%s7019_s16 + $0x110] sm:$0xff]  ;;  %v5144_v11 = vld [vmem:[%s7019_s16 + $0x118] sm:$0xff] }
 0x48c   : > { %5533 = vrsqrt.f32 %v3913_v41  ;;  %4196 = vperm.xlu2 %5375, %v4086_v62   ;;  %4308 = vperm.xlu0 %5376, %v4134_v52   ;;  %vm4053_vm11 = vmor %vm4051_vm10, %vm4052_vm9  ;;  %vm4061_vm13 = vweird.f32 %v3913_v41 }
 0x48d   : > { %v4044_v36 = vsel %vm4043_vm8, %v5530_v23, %v4040_v6  ;;  %v4047_v33 = vmul.f32 %v5532_v17, %v4046_v21  ;;  %v3850_v37 = vpop.xlane.xlu0 %3849 }
 0x48e   : > { %v4087_v5 = vmul.f32 %v4044_v36, %v3895_v2  ;;  %v3722_v16 = vpop.xlane.xlu2 %3721 }
 0x48f   : > { %v4048_v60 = vmul.f32 0.5, %v4047_v33  ;;  %v3866_v12 = vadd.f32 %v3850_v37, %v3722_v16 }
 0x490   : > { %v4119_v8 = vmul.f32 %v4087_v5, %v7344_v45 }
 0x491   : > { %v4049_v27 = vsub.f32 1.5, %v4048_v60  ;;  %v3882_v44 = vmul.f32 0.001953125, %v3866_v12 }
 0x492   : > { %v5534_v63 = vpop.eup %5533  ;;  %v4135_v40 = vsub.f32 %v4103_v50, %v4119_v8  ;;  %v4104_v50 = vld [vmem:[%s7398_s29 + $0x68] sm:$0xff] }
 0x493   : > { %v4050_v1 = vmul.f32 %v5532_v17, %v4049_v27  ;;  %v4056_v35 = vmul.f32 %v5534_v63, %v3913_v41  ;;  %v3914_v46 = vadd.f32 1e-05, %v3882_v44  ;;  %vm4062_vm12 = vweird.f32 %v5534_v63  ;;  %v3898_v27 = vld [vmem:[%s7391_s20 + $0x78] sm:$0xff] }
 0x494   : > { %4313 = vperm.xlu1 %5374, %v4135_v40   ;;  %4201 = vperm.xlu0 %5376, %v4087_v5   ;;  %vm4063_vm0 = vmor %vm4061_vm13, %vm4062_vm12 }
 0x495   : > { %v4057_v23 = vmul.f32 %v5534_v63, %v4056_v35  ;;  %5535 = vrsqrt.f32 %v3914_v46  ;;  %v4054_v31 = vsel %vm4053_vm11, %v5532_v17, %v4050_v1  ;;  %vm4071_vm15 = vweird.f32 %v3914_v46  ;;  %v5141_v1 = vld [vmem:[%s7019_s16 + $0x100] sm:$0xff] }
 0x496   : > { %v4147_v56 = vpop.permute.xlu2 %4146  ;;  %v4088_v7 = vmul.f32 %v4054_v31, %v3896_v47  ;;  %v4106_v31 = vld [vmem:[%s7398_s29 + $0x78] sm:$0xff] }
 0x497   : > { %v4058_v45 = vmul.f32 0.5, %v4057_v23  ;;  %v4221_v4 = vmul.f32 %v4147_v56, %v6892_v9  ;;  %v4222_v52 = vmul.f32 %v4147_v56, %v6894_v3  ;;  %v4429_v2 = vmul.f32 %v5143_v53, %v4147_v56  ;;  %v5142_v23 = vld [vmem:[%s7019_s16 + $0x108] sm:$0xff] }
 0x498   : > { %v4430_v21 = vmul.f32 %v5144_v11, %v4147_v56  ;;  %v4120_v12 = vmul.f32 %v4088_v7, %v7355_v57 }
 0x499   : > { %v4059_v38 = vsub.f32 1.5, %v4058_v45 }
 0x49b   : > { %v5536_v62 = vpop.eup %5535  ;;  %v4060_v32 = vmul.f32 %v5534_v63, %v4059_v38 }
 0x49c   : > { %v4066_v59 = vmul.f32 %v5536_v62, %v3914_v46  ;;  %4206 = vperm.xlu1 %5374, %v4088_v7   ;;  %vm4072_vm14 = vweird.f32 %v5536_v62 }
 0x49d   : > { %v4064_v17 = vsel %vm4063_vm0, %v5534_v63, %v4060_v32  ;;  %vm4073_vm1 = vmor %vm4071_vm15, %vm4072_vm14  ;;  %v4136_v63 = vsub.f32 %v4104_v50, %v4120_v12 }
 0x49e   : > { %v4067_v6 = vmul.f32 %v5536_v62, %v4066_v59  ;;  %v4259_v36 = vpop.permute.xlu2 %4258  ;;  %v4089_v41 = vmul.f32 %v4064_v17, %v3897_v54  ;;  %v4105_v54 = vld [vmem:[%s7398_s29 + $0x70] sm:$0xff] }
 0x49f   : > { %v4333_v33 = vadd.f32 %v4259_v36, %v4221_v4  ;;  %v4334_v37 = vadd.f32 %v4259_v36, %v4222_v52  ;;  %v4461_v5 = vadd.f32 %v4429_v2, %v4259_v36  ;;  %v4462_v60 = vadd.f32 %v4430_v21, %v4259_v36 }
 0x4a0   : > { %v4068_v16 = vmul.f32 0.5, %v4067_v6  ;;  %4211 = vperm.xlu2 %5375, %v4089_v41   ;;  %v4121_v7 = vmul.f32 %v4089_v41, %v7366_v18  ;;  %v5150_v18 = vld [vmem:[%s7019_s16 + $0x148] sm:$0xff] }
 0x4a1   : > { %4365 = vst [vmem:[%s7019_s16 + $0x10] sm:$0xff] %v4333_v33 }
 0x4a2   : > { %v4069_v9 = vsub.f32 1.5, %v4068_v16  ;;  %4366 = vst [vmem:[%s7019_s16 + $0x18] sm:$0xff] %v4334_v37  ;;  %v4142_v3 = vpop.permute.xlu1 %4141  ;;  %v5145_v37 = vld [vmem:[%s7019_s16 + $0x120] sm:$0xff] }
 0x4a3   : > { %5175 = vst [vmem:[%s7019_s16 + $0x110] sm:$0xff] %v4461_v5  ;;  %v4219_v57 = vmul.f32 %v4142_v3, %v6886_v51  ;;  %v4220_v46 = vmul.f32 %v4142_v3, %v6883_v30  ;;  %v4427_v56 = vmul.f32 %v5141_v1, %v4142_v3  ;;  %v4428_v38 = vmul.f32 %v5142_v23, %v4142_v3  ;;  %v5149_v51 = vld [vmem:[%s7019_s16 + $0x140] sm:$0xff] }
 0x4a4   : > { %v4070_v8 = vmul.f32 %v5536_v62, %v4069_v9  ;;  %5176 = vst [vmem:[%s7019_s16 + $0x118] sm:$0xff] %v4462_v60  ;;  %v4137_v30 = vsub.f32 %v4105_v54, %v4121_v7 }
 0x4a6   : > { %v4074_v44 = vsel %vm4073_vm1, %v5536_v62, %v4070_v8 }
 0x4a7   : > { %v4090_v40 = vmul.f32 %v4074_v44, %v3898_v27 }
 0x4a8   : > { %4318 = vperm.xlu2 %5375, %v4136_v63  }
 0x4a9   : > { %4216 = vperm.xlu0 %5376, %v4090_v40   ;;  %v4122_v35 = vmul.f32 %v4090_v40, %v7377_v26 }
 0x4aa   : > { %v4162_v45 = vpop.permute.xlu2 %4161  ;;  %v4254_v47 = vpop.permute.xlu1 %4253 }
 0x4ab   : > { %v4331_v62 = vadd.f32 %v4254_v47, %v4219_v57  ;;  %v4332_v26 = vadd.f32 %v4254_v47, %v4220_v46  ;;  %v4459_v32 = vadd.f32 %v4427_v56, %v4254_v47  ;;  %v4460_v59 = vadd.f32 %v4428_v38, %v4254_v47  ;;  %v5151_v47 = vld [vmem:[%s7019_s16 + $0x150] sm:$0xff] }
 0x4ac   : > { %v4138_v53 = vsub.f32 %v4106_v31, %v4122_v35  ;;  %v4227_v11 = vmul.f32 %v4162_v45, %v6919_v61  ;;  %v4228_v4 = vmul.f32 %v4162_v45, %v6916_v43  ;;  %v4435_v52 = vmul.f32 %v5149_v51, %v4162_v45  ;;  %v5146_v61 = vld [vmem:[%s7019_s16 + $0x128] sm:$0xff] }
 0x4ad   : > { %4363 = vst [vmem:[%s7019_s16] sm:$0xff] %v4331_v62  ;;  %v4436_v6 = vmul.f32 %v5150_v18, %v4162_v45 }
 0x4ae   : > { %4364 = vst [vmem:[%s7019_s16 + $0x8] sm:$0xff] %v4332_v26  ;;  %4328 = vperm.xlu1 %5374, %v4138_v53  }
 0x4af   : > { %5173 = vst [vmem:[%s7019_s16 + $0x100] sm:$0xff] %v4459_v32 }
 0x4b0   : > { %5174 = vst [vmem:[%s7019_s16 + $0x108] sm:$0xff] %v4460_v59 }
 0x4b1   : > { %4323 = vperm.xlu0 %5376, %v4137_v30   ;;  %v5153_v30 = vld [vmem:[%s7019_s16 + $0x160] sm:$0xff] }
 0x4b2   : > { %v4152_v2 = vpop.permute.xlu0 %4151  ;;  %v4274_v17 = vpop.permute.xlu2 %4273 }
 0x4b3   : > { %v4339_v21 = vadd.f32 %v4274_v17, %v4227_v11  ;;  %v4340_v36 = vadd.f32 %v4274_v17, %v4228_v4  ;;  %v4467_v41 = vadd.f32 %v4435_v52, %v4274_v17  ;;  %v4468_v33 = vadd.f32 %v4436_v6, %v4274_v17 }
 0x4b4   : > { %v4223_v43 = vmul.f32 %v4152_v2, %v6902_v22  ;;  %v4224_v5 = vmul.f32 %v4152_v2, %v6899_v39  ;;  %v4431_v16 = vmul.f32 %v5145_v37, %v4152_v2  ;;  %v4432_v60 = vmul.f32 %v5146_v61, %v4152_v2  ;;  %v5147_v22 = vld [vmem:[%s7019_s16 + $0x130] sm:$0xff]  ;;  %v5148_v39 = vld [vmem:[%s7019_s16 + $0x138] sm:$0xff] }
 0x4b5   : > { %4371 = vst [vmem:[%s7019_s16 + $0x40] sm:$0xff] %v4339_v21 }
 0x4b6   : > { %4372 = vst [vmem:[%s7019_s16 + $0x48] sm:$0xff] %v4340_v36  ;;  %v5155_v36 = vld [vmem:[%s7019_s16 + $0x170] sm:$0xff] }
 0x4b7   : > { %5181 = vst [vmem:[%s7019_s16 + $0x140] sm:$0xff] %v4467_v41 }
 0x4b8   : > { %5182 = vst [vmem:[%s7019_s16 + $0x148] sm:$0xff] %v4468_v33 }
 0x4ba   : > { %v4264_v9 = vpop.permute.xlu0 %4263  ;;  %v4157_v8 = vpop.permute.xlu1 %4156 }
 0x4bb   : > { %v4335_v3 = vadd.f32 %v4264_v9, %v4223_v43  ;;  %v4336_v12 = vadd.f32 %v4264_v9, %v4224_v5  ;;  %v4463_v50 = vadd.f32 %v4431_v16, %v4264_v9  ;;  %v4464_v27 = vadd.f32 %v4432_v60, %v4264_v9  ;;  %v4172_v59 = vpop.permute.xlu2 %4171 }
 0x4bc   : > { %v4225_v44 = vmul.f32 %v4157_v8, %v6908_v55  ;;  %v4226_v63 = vmul.f32 %v4157_v8, %v6910_v15  ;;  %v4433_v40 = vmul.f32 %v5147_v22, %v4157_v8  ;;  %v4434_v1 = vmul.f32 %v5148_v39, %v4157_v8  ;;  %v5152_v55 = vld [vmem:[%s7019_s16 + $0x158] sm:$0xff] }
 0x4bd   : > { %4367 = vst [vmem:[%s7019_s16 + $0x20] sm:$0xff] %v4335_v3  ;;  %v4232_v51 = vmul.f32 %v4172_v59, %v6934_v14  ;;  %v4439_v18 = vmul.f32 %v5153_v30, %v4172_v59  ;;  %v5157_v3 = vld [vmem:[%s7019_s16 + $0x180] sm:$0xff] }
 0x4be   : > { %4368 = vst [vmem:[%s7019_s16 + $0x28] sm:$0xff] %v4336_v12  ;;  %v5158_v12 = vld [vmem:[%s7019_s16 + $0x188] sm:$0xff] }
 0x4bf   : > { %5177 = vst [vmem:[%s7019_s16 + $0x120] sm:$0xff] %v4463_v50 }
 0x4c0   : > { %5178 = vst [vmem:[%s7019_s16 + $0x128] sm:$0xff] %v4464_v27 }
 0x4c2   : > { %v4269_v35 = vpop.permute.xlu1 %4268 }
 0x4c3   : > { %v4337_v23 = vadd.f32 %v4269_v35, %v4225_v44  ;;  %v4338_v57 = vadd.f32 %v4269_v35, %v4226_v63  ;;  %v4465_v46 = vadd.f32 %v4433_v40, %v4269_v35  ;;  %v4466_v56 = vadd.f32 %v4434_v1, %v4269_v35  ;;  %v5160_v40 = vld [vmem:[%s7019_s16 + $0x198] sm:$0xff] }
 0x4c5   : > { %4369 = vst [vmem:[%s7019_s16 + $0x30] sm:$0xff] %v4337_v23 }
 0x4c6   : > { %4370 = vst [vmem:[%s7019_s16 + $0x38] sm:$0xff] %v4338_v57  ;;  %v4289_v6 = vpop.permute.xlu2 %4288 }
 0x4c7   : > { %5179 = vst [vmem:[%s7019_s16 + $0x130] sm:$0xff] %v4465_v46 }
 0x4c8   : > { %5180 = vst [vmem:[%s7019_s16 + $0x138] sm:$0xff] %v4466_v56 }
 0x4ca   : > { %v4167_v45 = vpop.permute.xlu1 %4166 }
 0x4cb   : > { %v4229_v15 = vmul.f32 %v4167_v45, %v6926_v25  ;;  %v4230_v31 = vmul.f32 %v4167_v45, %v6928_v58  ;;  %v4437_v38 = vmul.f32 %v5151_v47, %v4167_v45  ;;  %v4438_v7 = vmul.f32 %v5152_v55, %v4167_v45  ;;  %v5154_v25 = vld [vmem:[%s7019_s16 + $0x168] sm:$0xff] }
 0x4cc   : > { %v4231_v58 = vmul.f32 %v4172_v59, %v6937_v42  ;;  %v4440_v11 = vmul.f32 %v5154_v25, %v4172_v59  ;;  %v5156_v42 = vld [vmem:[%s7019_s16 + $0x178] sm:$0xff]  ;;  %v5163_v25 = vld [vmem:[%s7019_s16 + $0x1b0] sm:$0xff] }
 0x4ce   : > { %v4279_v62 = vpop.permute.xlu0 %4278  ;;  %v4182_v60 = vpop.permute.xlu2 %4181 }
 0x4cf   : > { %v4341_v26 = vadd.f32 %v4279_v62, %v4229_v15  ;;  %v4342_v32 = vadd.f32 %v4279_v62, %v4230_v31  ;;  %v4469_v54 = vadd.f32 %v4437_v38, %v4279_v62  ;;  %v4470_v53 = vadd.f32 %v4438_v7, %v4279_v62  ;;  %v5161_v31 = vld [vmem:[%s7019_s16 + $0x1a0] sm:$0xff]  ;;  %v5162_v38 = vld [vmem:[%s7019_s16 + $0x1a8] sm:$0xff] }
 0x4d0   : > { %v4443_v50 = vmul.f32 %v5157_v3, %v4182_v60  ;;  %v4444_v8 = vmul.f32 %v5158_v12, %v4182_v60  ;;  %v7737_v3 = vld [vmem:[#allocation14_spill] sm:$0xff] }
 0x4d1   : > { %4373 = vst [vmem:[%s7019_s16 + $0x50] sm:$0xff] %v4341_v26 }
 0x4d2   : > { %4374 = vst [vmem:[%s7019_s16 + $0x58] sm:$0xff] %v4342_v32 }
 0x4d3   : > { %5183 = vst [vmem:[%s7019_s16 + $0x150] sm:$0xff] %v4469_v54 }
 0x4d4   : > { %5184 = vst [vmem:[%s7019_s16 + $0x158] sm:$0xff] %v4470_v53 }
 0x4d6   : > { %v4284_v4 = vpop.permute.xlu1 %4283 }
 0x4d7   : > { %v4343_v52 = vadd.f32 %v4284_v4, %v4231_v58  ;;  %v4344_v2 = vadd.f32 %v4284_v4, %v4232_v51  ;;  %v4471_v17 = vadd.f32 %v4439_v18, %v4284_v4  ;;  %v4472_v21 = vadd.f32 %v4440_v11, %v4284_v4  ;;  %v5164_v58 = vld [vmem:[%s7019_s16 + $0x1b8] sm:$0xff] }
 0x4d9   : > { %4375 = vst [vmem:[%s7019_s16 + $0x60] sm:$0xff] %v4343_v52 }
 0x4da   : > { %4376 = vst [vmem:[%s7019_s16 + $0x68] sm:$0xff] %v4344_v2 }
 0x4db   : > { %5185 = vst [vmem:[%s7019_s16 + $0x160] sm:$0xff] %v4471_v17 }
 0x4dc   : > { %5186 = vst [vmem:[%s7019_s16 + $0x168] sm:$0xff] %v4472_v21 }
 0x4de   : > { %v4177_v41 = vpop.permute.xlu1 %4176  ;;  %v4304_v56 = vpop.permute.xlu2 %4303 }
 0x4df   : > { %v4233_v14 = vmul.f32 %v4177_v41, %v6943_v48  ;;  %v4234_v33 = vmul.f32 %v4177_v41, %v6945_v10  ;;  %v4441_v37 = vmul.f32 %v5155_v36, %v4177_v41  ;;  %v4442_v61 = vmul.f32 %v5156_v42, %v4177_v41  ;;  %v7736_v41 = vld [vmem:[#allocation12_spill] sm:$0xff] }
 0x4e0   : > { %v4235_v48 = vmul.f32 %v4182_v60, %v6954_v19  ;;  %v4236_v10 = vmul.f32 %v4182_v60, %v6951_v34  ;;  %v5159_v19 = vld [vmem:[%s7019_s16 + $0x190] sm:$0xff] }
 0x4e1   : > { %v4345_v43 = vadd.f32 %v4289_v6, %v4233_v14  ;;  %v4346_v5 = vadd.f32 %v4289_v6, %v4234_v33  ;;  %v4473_v16 = vadd.f32 %v4441_v37, %v4289_v6  ;;  %v4474_v9 = vadd.f32 %v4442_v61, %v4289_v6  ;;  %v5166_v6 = vld [vmem:[%s7019_s16 + $0x1c8] sm:$0xff]  ;;  %v5167_v60 = vld [vmem:[%s7019_s16 + $0x1d0] sm:$0xff] }
 0x4e3   : > { %4377 = vst [vmem:[%s7019_s16 + $0x70] sm:$0xff] %v4345_v43 }
 0x4e4   : > { %4378 = vst [vmem:[%s7019_s16 + $0x78] sm:$0xff] %v4346_v5 }
 0x4e5   : > { %5187 = vst [vmem:[%s7019_s16 + $0x170] sm:$0xff] %v4473_v16 }
 0x4e6   : > { %5188 = vst [vmem:[%s7019_s16 + $0x178] sm:$0xff] %v4474_v9  ;;  %v4294_v27 = vpop.permute.xlu0 %4293  ;;  %v4197_v53 = vpop.permute.xlu2 %4196  ;;  %v5168_v9 = vld [vmem:[%s7019_s16 + $0x1d8] sm:$0xff] }
 0x4e7   : > { %v4347_v22 = vadd.f32 %v4294_v27, %v4235_v48  ;;  %v4348_v39 = vadd.f32 %v4294_v27, %v4236_v10  ;;  %v4475_v44 = vadd.f32 %v4443_v50, %v4294_v27  ;;  %v4476_v63 = vadd.f32 %v4444_v8, %v4294_v27  ;;  %v7738_v48 = vld [vmem:[#allocation15_spill] sm:$0xff] }
 0x4e8   : > { %v4449_v51 = vmul.f32 %v5163_v25, %v4197_v53  ;;  %v4450_v18 = vmul.f32 %v5164_v58, %v4197_v53 }
 0x4e9   : > { %4379 = vst [vmem:[%s7019_s16 + $0x80] sm:$0xff] %v4347_v22 }
 0x4ea   : > { %4380 = vst [vmem:[%s7019_s16 + $0x88] sm:$0xff] %v4348_v39 }
 0x4eb   : > { %5189 = vst [vmem:[%s7019_s16 + $0x180] sm:$0xff] %v4475_v44 }
 0x4ec   : > { %5190 = vst [vmem:[%s7019_s16 + $0x188] sm:$0xff] %v4476_v63 }
 0x4ee   : > { %v4187_v34 = vpop.permute.xlu0 %4186  ;;  %v4299_v1 = vpop.permute.xlu1 %4298 }
 0x4ef   : > { %v4237_v35 = vmul.f32 %v4187_v34, %v6960_v29  ;;  %v4238_v23 = vmul.f32 %v4187_v34, %v6962_v24  ;;  %v4445_v57 = vmul.f32 %v5159_v19, %v4187_v34  ;;  %v4446_v46 = vmul.f32 %v5160_v40, %v4187_v34  ;;  %v5171_v40 = vld [vmem:[%s7019_s16 + $0x1f0] sm:$0xff] }
 0x4f0   : > { %v7739_v34 = vld [vmem:[#allocation18_spill] sm:$0xff] }
 0x4f1   : > { %v4349_v45 = vadd.f32 %v4299_v1, %v4237_v35  ;;  %v4350_v47 = vadd.f32 %v4299_v1, %v4238_v23  ;;  %v4477_v55 = vadd.f32 %v4445_v57, %v4299_v1  ;;  %v4478_v15 = vadd.f32 %v4446_v46, %v4299_v1  ;;  %v7740_v35 = vld [vmem:[#allocation19_spill] sm:$0xff] }
 0x4f2   : > { %v5172_v57 = vld [vmem:[%s7019_s16 + $0x1f8] sm:$0xff] }
 0x4f3   : > { %4381 = vst [vmem:[%s7019_s16 + $0x90] sm:$0xff] %v4349_v45 }
 0x4f4   : > { %4382 = vst [vmem:[%s7019_s16 + $0x98] sm:$0xff] %v4350_v47 }
 0x4f5   : > { %5191 = vst [vmem:[%s7019_s16 + $0x190] sm:$0xff] %v4477_v55 }
 0x4f6   : > { %5192 = vst [vmem:[%s7019_s16 + $0x198] sm:$0xff] %v4478_v15  ;;  %v4192_v29 = vpop.permute.xlu1 %4191 }
 0x4f7   : > { %v4239_v24 = vmul.f32 %v4192_v29, %v7711_v13  ;;  %v4240_v7 = vmul.f32 %v4192_v29, %v7712_v20  ;;  %v4447_v62 = vmul.f32 %v5161_v31, %v4192_v29  ;;  %v4448_v26 = vmul.f32 %v5162_v38, %v4192_v29  ;;  %v7741_v31 = vld [vmem:[#allocation17_spill] sm:$0xff] }
 0x4f8   : > { %v4241_v13 = vmul.f32 %v4197_v53, %v7714_v28  ;;  %v4242_v20 = vmul.f32 %v4197_v53, %v7715_v0  ;;  %v5165_v0 = vld [vmem:[%s7019_s16 + $0x1c0] sm:$0xff] }
 0x4f9   : > { %v4351_v32 = vadd.f32 %v4304_v56, %v4239_v24  ;;  %v4352_v54 = vadd.f32 %v4304_v56, %v4240_v7  ;;  %v4479_v59 = vadd.f32 %v4447_v62, %v4304_v56  ;;  %v4480_v30 = vadd.f32 %v4448_v26, %v4304_v56  ;;  %v7742_v24 = vld [vmem:[#allocation16_spill] sm:$0xff] }
 0x4fa   : > { %v4212_v28 = vpop.permute.xlu2 %4211  ;;  %v5169_v62 = vld [vmem:[%s7019_s16 + $0x1e0] sm:$0xff] }
 0x4fb   : > { %4383 = vst [vmem:[%s7019_s16 + $0xa0] sm:$0xff] %v4351_v32  ;;  %v4247_v38 = vmul.f32 %v4212_v28, %v7741_v31  ;;  %v4248_v7 = vmul.f32 %v4212_v28, %v7742_v24  ;;  %v5170_v32 = vld [vmem:[%s7019_s16 + $0x1e8] sm:$0xff] }
 0x4fc   : > { %4384 = vst [vmem:[%s7019_s16 + $0xa8] sm:$0xff] %v4352_v54  ;;  %v4455_v54 = vmul.f32 %v5169_v62, %v4212_v28  ;;  %v4456_v53 = vmul.f32 %v5170_v32, %v4212_v28 }
 0x4fd   : > { %5193 = vst [vmem:[%s7019_s16 + $0x1a0] sm:$0xff] %v4479_v59 }
 0x4fe   : > { %5194 = vst [vmem:[%s7019_s16 + $0x1a8] sm:$0xff] %v4480_v30  ;;  %v4309_v11 = vpop.permute.xlu0 %4308 }
 0x4ff   : > { %v4353_v4 = vadd.f32 %v4309_v11, %v4241_v13  ;;  %v4354_v52 = vadd.f32 %v4309_v11, %v4242_v20  ;;  %v4481_v2 = vadd.f32 %v4449_v51, %v4309_v11  ;;  %v4482_v17 = vadd.f32 %v4450_v18, %v4309_v11 }
 0x501   : > { %4385 = vst [vmem:[%s7019_s16 + $0xb0] sm:$0xff] %v4353_v4 }
 0x502   : > { %4386 = vst [vmem:[%s7019_s16 + $0xb8] sm:$0xff] %v4354_v52  ;;  %v4319_v27 = vpop.permute.xlu2 %4318 }
 0x503   : > { %5195 = vst [vmem:[%s7019_s16 + $0x1b0] sm:$0xff] %v4481_v2 }
 0x504   : > { %5196 = vst [vmem:[%s7019_s16 + $0x1b8] sm:$0xff] %v4482_v17 }
 0x506   : > { %v4202_v21 = vpop.permute.xlu0 %4201  ;;  %v4314_v36 = vpop.permute.xlu1 %4313 }
 0x507   : > { %v4243_v42 = vmul.f32 %v4202_v21, %v7720_v49  ;;  %v4244_v14 = vmul.f32 %v4202_v21, %v7736_v41  ;;  %v4451_v33 = vmul.f32 %v5165_v0, %v4202_v21  ;;  %v4452_v37 = vmul.f32 %v5166_v6, %v4202_v21 }
 0x509   : > { %v4355_v61 = vadd.f32 %v4314_v36, %v4243_v42  ;;  %v4356_v43 = vadd.f32 %v4314_v36, %v4244_v14  ;;  %v4483_v5 = vadd.f32 %v4451_v33, %v4314_v36  ;;  %v4484_v16 = vadd.f32 %v4452_v37, %v4314_v36 }
 0x50b   : > { %4387 = vst [vmem:[%s7019_s16 + $0xc0] sm:$0xff] %v4355_v61 }
 0x50c   : > { %4388 = vst [vmem:[%s7019_s16 + $0xc8] sm:$0xff] %v4356_v43 }
 0x50d   : > { %5197 = vst [vmem:[%s7019_s16 + $0x1c0] sm:$0xff] %v4483_v5 }
 0x50e   : > { %5198 = vst [vmem:[%s7019_s16 + $0x1c8] sm:$0xff] %v4484_v16  ;;  %v4207_v49 = vpop.permute.xlu1 %4206 }
 0x50f   : > { %v4245_v12 = vmul.f32 %v4207_v49, %v7737_v3  ;;  %v4246_v10 = vmul.f32 %v4207_v49, %v7738_v48  ;;  %v4453_v50 = vmul.f32 %v5167_v60, %v4207_v49  ;;  %v4454_v8 = vmul.f32 %v5168_v9, %v4207_v49 }
 0x511   : > { %v4357_v22 = vadd.f32 %v4319_v27, %v4245_v12  ;;  %v4358_v39 = vadd.f32 %v4319_v27, %v4246_v10  ;;  %v4485_v44 = vadd.f32 %v4453_v50, %v4319_v27  ;;  %v4486_v63 = vadd.f32 %v4454_v8, %v4319_v27 }
 0x513   : > { %4389 = vst [vmem:[%s7019_s16 + $0xd0] sm:$0xff] %v4357_v22 }
 0x514   : > { %4390 = vst [vmem:[%s7019_s16 + $0xd8] sm:$0xff] %v4358_v39 }
 0x515   : > { %5199 = vst [vmem:[%s7019_s16 + $0x1d0] sm:$0xff] %v4485_v44 }
 0x516   : > { %5200 = vst [vmem:[%s7019_s16 + $0x1d8] sm:$0xff] %v4486_v63 }
 0x51b   : > { %v4217_v19 = vpop.permute.xlu0 %4216 }
 0x51c   : > { %v4249_v1 = vmul.f32 %v4217_v19, %v7739_v34  ;;  %v4250_v23 = vmul.f32 %v4217_v19, %v7740_v35  ;;  %v4457_v46 = vmul.f32 %v5171_v40, %v4217_v19  ;;  %v4458_v56 = vmul.f32 %v5172_v57, %v4217_v19 }
 0x520   : > { %v4329_v45 = vpop.permute.xlu1 %4328 }
 0x521   : > { %v4361_v47 = vadd.f32 %v4329_v45, %v4249_v1  ;;  %v4362_v55 = vadd.f32 %v4329_v45, %v4250_v23  ;;  %v4489_v15 = vadd.f32 %v4457_v46, %v4329_v45  ;;  %v4490_v29 = vadd.f32 %v4458_v56, %v4329_v45 }
 0x523   : > { %v4324_v26 = vpop.permute.xlu0 %4323  ;;  %4393 = vst [vmem:[%s7019_s16 + $0xf0] sm:$0xff] %v4361_v47 }
 0x524   : > { %v4359_v59 = vadd.f32 %v4324_v26, %v4247_v38  ;;  %4394 = vst [vmem:[%s7019_s16 + $0xf8] sm:$0xff] %v4362_v55  ;;  %v4360_v30 = vadd.f32 %v4324_v26, %v4248_v7  ;;  %v4487_v25 = vadd.f32 %v4455_v54, %v4324_v26  ;;  %v4488_v58 = vadd.f32 %v4456_v53, %v4324_v26 }
 0x525   : > { %5203 = vst [vmem:[%s7019_s16 + $0x1f0] sm:$0xff] %v4489_v15 }
 0x526   : > { %5204 = vst [vmem:[%s7019_s16 + $0x1f8] sm:$0xff] %v4490_v29 }
 0x527   : > { %4391 = vst [vmem:[%s7019_s16 + $0xe0] sm:$0xff] %v4359_v59 }
 0x528   : > { %4392 = vst [vmem:[%s7019_s16 + $0xe8] sm:$0xff] %v4360_v30 }
 0x529   : > { %5201 = vst [vmem:[%s7019_s16 + $0x1e0] sm:$0xff] %v4487_v25 }
 0x52a   : > { %5202 = vst [vmem:[%s7019_s16 + $0x1e8] sm:$0xff] %v4488_v58 }
 0x52b   : > { %s5293_s9 = sshll.u32 %s5643_s28, 8  ;;  %s4547_s13 = sshll.u32 %s7019_s16, 4  ;;  %s4548_s13 = int_to_ptr.vmem [resolvable:$true] %s4547_s13 }
 0x52c   : > { %s4536_s22 = scalar_lea.hbm %s7620_s7, %s5293_s9  ;;  %s5576_s18 = smov 4096  }
 0x52d   : > { %s4549_s17 = sshll.u32 %s4536_s22, 4  ;;  %5314 = sst [smem:[#allocation6]] (%p5660_p5), %s5576_s18  ;;  %s4550_s17 = int_to_ptr.hbm [resolvable:$true] %s4549_s17 }
 0x52e   : > { %s5577_s8 = smov 8192   ;;  %s5578_s20 = smov 16  }
 0x52f   : > { %5315 = sst [smem:[#allocation6 + $0x1]] (%p5660_p5), %s5577_s8  ;;  %s5579_s21 = smov 256  }
 0x530   : > { %5316 = sst [smem:[#allocation6 + $0x2]] (%p5660_p5), %s5578_s20  ;;  %s5580_s28 = smov [#allocation5]  }
 0x531   : > { %5317 = sst [smem:[#allocation6 + $0x3]] (%p5660_p5), %s5579_s21  ;;  %s5581_s16 = smov 0  }
 0x532   : > { %5318 = sst [smem:[#allocation6 + $0x4]] (%p5660_p5), %s5579_s21 }
 0x533   : > { %5319 = sst [smem:[#allocation6 + $0x5]] (%p5660_p5), %s5578_s20 }
 0x534   : > { %5320 = dma.general (%p5660_p5), %s4548_s13, 8192, %s4550_s17, %s4524_s19, %s5580_s28, [#allocation6], %s5581_s16, 0  }
 0x535 PF: > { %p5326_p11 = scmp.ge.s32.totalorder %s5571_s27, 2  ;;  %s4577_s23 = sand.u32 1, %s5559_s24  }
 0x536   : > { %s4578_s29 = scalar_lea.sflag [#allocation4], %s4577_s23 }
 0x537   : > { %p5323_p12 = pnand %p5326_p11, %p5664_p6 }
 0x539   : > { %p5324_p13 = pneg %p5323_p12 }
 0x53b   : > { %5554 = dma.done.wait (%p5324_p13), %s4578_s29, 8192  }
 0x53c   : > { %5556 = vsyncadd (%p5324_p13), %s4578_s29, 4294959104  ;;  %p17_p0 = scmp.ge.s32.totalorder %s5647_s30, 4   ;;  %s7743_s24 = smov %s5563_s25 }
 0x53d   : > { %s7744_s25 = smov %s5567_s26  ;;  %s7745_s26 = smov %s5658_s10 }
 0x53e   : > { %s7746_s27 = smov %s5647_s30  ;;  %19 = sbr.rel (!%p17_p0) target bundleno = 3 (0x3), region = 96 }
 0x543   :  { %4584 = vsyncpa [#allocation4], 1 }
 0x544   :  { %4586 = vsyncpa [#allocation4 + $0x1], 1 }

</bundles_post_ra>
